<compile_context>
chip_gen: v7x
topology: tpu7x:2x2x1
jax: 0.10.0
libtpu: 0.0.40
codegen_flags: <defaults>
</compile_context>

<pallas_src>
import functools

import jax
import jax.numpy as jnp
from jax.experimental import pallas as pl
from jax.experimental.pallas import tpu as pltpu


def _round_up(x, m):
    return (x + m - 1) // m * m


def _qkT_kernel(q_ref, k_ref, out_ref, *, compute_dtype=None):
    # q_ref: (G, tq, D), k_ref: (G, tk, D), out_ref: (G, tq, tk)
    q = q_ref[...]
    k = k_ref[...]
    if compute_dtype is not None:
        # Optional narrower MXU input dtype (accumulation stays f32).
        q = q.astype(compute_dtype)
        k = k.astype(compute_dtype)
    # Batched NT matmul: contract on D for both operands (no k.T materialized).
    out_ref[...] = jax.lax.dot_general(
        q,
        k,
        dimension_numbers=(((2,), (2,)), ((0,), (0,))),
        preferred_element_type=jnp.float32,
    ).astype(out_ref.dtype)


def _divisors_leq(n, cap):
    return [d for d in range(1, min(n, cap) + 1) if n % d == 0]


def _seq_tile_candidates(s_pad):
    """Lane-aligned sequence tiles (multiples of 128) that divide s_pad."""
    if s_pad % 128 == 0:
        n = s_pad // 128
        cands = {k * 128 for k in range(1, n + 1) if n % k == 0 and k * 128 <= 512}
        if s_pad <= 512:
            cands.add(s_pad)
        return sorted(cands)
    # Small, non-aligned S: single full-extent block (valid BlockSpec).
    return [s_pad]


def _select_tiles(bh, s_pad, d, itemsize, vmem_budget_bytes, head_cap=8):
    """Pick (heads/step g, tq, tk) maximizing tile size within the VMEM budget
    while keeping >= 4 total grid steps (>= 2 per v7x core) and a balanced
    megacore split, preferring large tq to minimize K re-streaming."""
    d_lanes = max(_round_up(d, 128), 128)
    seq_cands = _seq_tile_candidates(s_pad)
    best_key, best = None, None
    for g in _divisors_leq(bh, head_cap):
        lead = bh // g
        for tq in seq_cands:
            for tk in seq_cands:
                tq_sub = _round_up(tq, 8)
                tk_sub = _round_up(tk, 8)
                tk_lanes = max(_round_up(tk, 128), 128)
                blocks_bytes = 2 * g * itemsize * (
                    tq_sub * d_lanes + tk_sub * d_lanes + tq_sub * tk_lanes)
                if blocks_bytes > vmem_budget_bytes:
                    continue
                steps = lead * (s_pad // tq) * (s_pad // tk)
                key = (
                    min(steps, 4),                               # pipelining depth per core
                    1 if (lead % 2 == 0 or steps >= 8) else 0,   # balanced megacore split
                    tq,                                          # fewer K re-streams
                    g * tq * tk,                                 # big blocks, fewer steps
                    tk,
                )
                if best_key is None or key > best_key:
                    best_key, best = key, (g, tq, tk, blocks_bytes)
    if best is None:
        # Fallback: minimal legal tiles (pathological D); still correct.
        g, tq, tk = 1, min(seq_cands), min(seq_cands)
        blocks_bytes = 2 * itemsize * (
            _round_up(tq, 8) * d_lanes
            + _round_up(tk, 8) * d_lanes
            + _round_up(tq, 8) * max(_round_up(tk, 128), 128))
        best = (g, tq, tk, blocks_bytes)
    return best


def transpose_matmul(x35, x46, *, use_bf16_inputs=False,
                     vmem_budget_bytes=12 * 1024 * 1024):
    """Computes matmul(x46, x35.transpose(-1, -2)) for [B, H, S, D] inputs."""
    B, H, S, D = x35.shape
    assert x46.shape == (B, H, S, D)
    BH = B * H

    # Pad S up to a multiple of 128 when tiling is required; a small unaligned
    # S is kept as one full-extent block (no padding needed).
    if S % 128 == 0 or S > 512:
        S_pad = _round_up(S, 128)
    else:
        S_pad = S

    itemsize = jnp.dtype(x46.dtype).itemsize
    g, tq, tk, blocks_bytes = _select_tiles(BH, S_pad, D, itemsize, vmem_budget_bytes)

    x35_f = x35.reshape(BH, S, D)
    x46_f = x46.reshape(BH, S, D)
    if S_pad != S:
        pad = ((0, 0), (0, S_pad - S), (0, 0))
        x35_f = jnp.pad(x35_f, pad)
        x46_f = jnp.pad(x46_f, pad)

    cost = pl.CostEstimate(
        flops=2 * BH * S_pad * S_pad * D,
        transcendentals=0,
        bytes_accessed=2 * BH * S_pad * D * itemsize + BH * S_pad * S_pad * itemsize,
    )

    kernel = functools.partial(
        _qkT_kernel,
        compute_dtype=jnp.bfloat16 if use_bf16_inputs else None,
    )

    # Explicit scoped-VMEM limit: enough for the double-buffered blocks plus
    # headroom, safe on every generation (<= v5e's raise-able limit, well under
    # v7x's 64 MiB physical VMEM).
    vmem_limit = int(min(max(blocks_bytes + (8 << 20), 16 << 20), 32 << 20))

    out_f = pl.pallas_call(
        kernel,
        out_shape=jax.ShapeDtypeStruct((BH, S_pad, S_pad), x46.dtype),
        grid_spec=pltpu.PrefetchScalarGridSpec(
            num_scalar_prefetch=0,
            # K-tile axis (j) innermost: Q block index is constant across the
            # inner loop, so only K re-streams for long sequences.
            grid=(BH // g, S_pad // tq, S_pad // tk),
            in_specs=[
                pl.BlockSpec((g, tq, D), lambda b, i, j: (b, i, 0)),  # x46 (Q)
                pl.BlockSpec((g, tk, D), lambda b, i, j: (b, j, 0)),  # x35 (K)
            ],
            out_specs=pl.BlockSpec((g, tq, tk), lambda b, i, j: (b, i, j)),
        ),
        compiler_params=pltpu.CompilerParams(
            dimension_semantics=("parallel", "parallel", "parallel"),
            vmem_limit_bytes=vmem_limit,
        ),
        cost_estimate=cost,
    )(x46_f, x35_f)

    if S_pad != S:
        out_f = out_f[:, :S, :S]
    return out_f.reshape(B, H, S, S)
    # TODO(synk): if the consumer is a softmax/attention, fuse flash-style so
    # the S x S scores (>= 75% of this kernel's HBM traffic) never hit HBM.


if __name__ == "__main__":
    # Shapes from the original module: [1, 12, 384, 64]
    B, H, S, D = 1, 12, 384, 64
    key = jax.random.PRNGKey(0)
    k35, k46 = jax.random.split(key)
    x35 = jax.random.normal(k35, (B, H, S, D), dtype=jnp.float32)
    x46 = jax.random.normal(k46, (B, H, S, D), dtype=jnp.float32)

    out = jax.block_until_ready(transpose_matmul(x35, x46))

    # Reference check against plain JAX (f32 path preserves module numerics).
    ref = jnp.einsum("bhqd,bhkd->bhqk", x46, x35)
    assert out.shape == (B, H, S, S)
    assert jnp.allclose(out, ref, atol=1e-4, rtol=1e-4)

    print("KERNEL_OK")
</pallas_src>

<mosaic_0001>
module attributes {stable_mosaic.version = 11 : i64} {
  func.func @_qkT_kernel(%arg0: i32, %arg1: i32, %arg2: i32, %arg3: memref<3x384x64xf32, #tpu.memory_space<vmem>>, %arg4: memref<3x384x64xf32, #tpu.memory_space<vmem>>, %arg5: memref<3x384x384xf32, #tpu.memory_space<vmem>>) attributes {dimension_semantics = [#tpu.dimension_semantics<parallel>, #tpu.dimension_semantics<parallel>, #tpu.dimension_semantics<parallel>], iteration_bounds = array<i64: 4, 1, 1>, scalar_prefetch = 0 : i64, scratch_operands = 0 : i64, tpu.core_type = #tpu.core_type<tc>, window_params = [{transform_indices = @transform_0, window_bounds = array<i64: 3, 384, 64>}, {transform_indices = @transform_1, window_bounds = array<i64: 3, 384, 64>}, {transform_indices = @transform_2, window_bounds = array<i64: 3, 384, 384>}]} {
    %c0 = arith.constant 0 : index
    %c0_0 = arith.constant 0 : index
    %c0_1 = arith.constant 0 : index
    %0 = vector.load %arg3[%c0, %c0_0, %c0_1] : memref<3x384x64xf32, #tpu.memory_space<vmem>>, vector<3x384x64xf32>
    %c0_2 = arith.constant 0 : index
    %c0_3 = arith.constant 0 : index
    %c0_4 = arith.constant 0 : index
    %1 = vector.load %arg4[%c0_2, %c0_3, %c0_4] : memref<3x384x64xf32, #tpu.memory_space<vmem>>, vector<3x384x64xf32>
    %cst = arith.constant dense<0.000000e+00> : vector<3x384x384xf32>
    %2 = tpu.matmul %0, %1, %cst {dimension_numbers = #tpu.dot_dimension_numbers<[2], [2], [1], [1], [0, 0, 0, 1, 1, 1], [0], [0]>} : vector<3x384x64xf32>, vector<3x384x64xf32>, vector<3x384x384xf32> -> vector<3x384x384xf32>
    %c0_5 = arith.constant 0 : index
    %c0_6 = arith.constant 0 : index
    %c0_7 = arith.constant 0 : index
    %3 = vector.load %arg5[%c0_5, %c0_6, %c0_7] : memref<3x384x384xf32, #tpu.memory_space<vmem>>, vector<3x384x384xf32>
    tpu.vector_store %arg5[%c0_5, %c0_6, %c0_7], %2 {strides = array<i32>} : memref<3x384x384xf32, #tpu.memory_space<vmem>>, vector<3x384x384xf32>,
    return
  }
  func.func @transform_0(%arg0: i32, %arg1: i32, %arg2: i32) -> (i32, i32, i32) {
    %c0_i32 = arith.constant 0 : i32
    %c0_i32_0 = arith.constant 0 : i32
    return %arg0, %arg1, %c0_i32 : i32, i32, i32
  }
  func.func @transform_1(%arg0: i32, %arg1: i32, %arg2: i32) -> (i32, i32, i32) {
    %c0_i32 = arith.constant 0 : i32
    %c0_i32_0 = arith.constant 0 : i32
    return %arg0, %arg2, %c0_i32 : i32, i32, i32
  }
  func.func @transform_2(%arg0: i32, %arg1: i32, %arg2: i32) -> (i32, i32, i32) {
    %c0_i32 = arith.constant 0 : i32
    return %arg0, %arg1, %arg2 : i32, i32, i32
  }
}

</mosaic_0001>

<bundles_post_ra>
// kernel: tpu_custom_call.1
= control target key start
LH: loop header
LB: loop body
LE: loop exit
PB: predicated region body
PF: predicated region fallthrough
CT: control target
= control target key end

     0   :  { %7 = vsyncpa [#allocation3], 0  ;;  %s7923_s0 = inlined_call_operand.vmem [shape: f32[12,384,64], index: 0, kind: input, shape index: {}]   ;;  %s7924_s1 = inlined_call_operand.vmem [shape: f32[12,384,64], index: 1, kind: input, shape index: {}]   ;;  %s7925_s2 = inlined_call_operand.hbm [shape: f32[12,384,384], index: 2, kind: output, shape index: {}]  }
   0x1   :  { %9 = vsyncpa [#allocation3 + $0x1], 0  ;;  %s5704_s9 = smov 0   ;;  %s5706_s10 = smov 0  }
   0x2   :  { %s5708_s11 = smov 0   ;;  %s5710_s12 = smov 0  }
   0x3   :  { %s5712_s13 = smov 0   ;;  %s5714_s14 = smov 0  }
   0x4 LB: > { %s3911_s15 = sadd.s32 4294967295, %s5684_s14   ;;  %s3912_s16 = sadd.s32 4294967294, %s5684_s14   ;;  %s5684_s14 = sphi %s5714_s14, %s15_s14   ;;  %s5680_s13 = sphi %s5712_s13, %s7934_s13   ;;  %s5676_s12 = sphi %s5710_s12, %s7933_s12   ;;  %s5672_s11 = sphi %s5708_s11, %s7932_s11   ;;  %s5668_s10 = sphi %s5706_s10, %s7931_s10   ;;  %s5664_s9 = sphi %s5704_s9, %s7930_s9  }
   0x5   : > { %s34_s17 = sadd.s32 1, %s5680_s13  ;;  %s101_s18 = sadd.s32 1, %s5672_s11 }
   0x6   : > { %p36_p0 = scmp.ge.s32.totalorder %s34_s17, 4  ;;  %p111_p1 = scmp.ne.s32.totalorder %s5672_s11, %s5668_s10 }
   0x7   : > { %p112_p2 = scmp.eq.s32.totalorder %s3911_s15, 3  ;;  %p117_p3 = scmp.ne.s32.totalorder %s5668_s10, %s5664_s9 }
   0x8   : > { %s7936_s17 = smov (%p36_p0, %s34_s17), 0  ;;  %p118_p5 = scmp.eq.s32.totalorder %s3912_s16, 3 }
   0x9   : > { %p5744_p4 = por %p112_p2, %p111_p1  ;;  %s94_s20 = ssub.s32 %s5680_s13, %s7936_s17 }
   0xa   : > { %p3915_p6 = scmp.ge.s32.totalorder %s5684_s14, 1  ;;  %p99_p7 = scmp.eq.s32.totalorder %s94_s20, 0 }
   0xb   : > { %p5751_p8 = por %p118_p5, %p117_p3  ;;  %p166_p9 = scmp.lt.s32.totalorder %s5684_s14, 5 }
   0xc   : > { %s5757_s22 = scalar_select %p99_p7, %s5672_s11, %s101_s18  }
   0xd   : > { %p167_p10 = pnand %p3915_p6, %p166_p9 }
   0xe   : > { %s203_s23 = smul.u32 (!%p167_p10), 3, %s5676_s12  ;;  %vm518_vm0 = vcmask (!%p167_p10), 523264   ;;  %s200_s3 = sand.u32 (!%p167_p10), 1, %s5668_s10  }
   0xf   : > { %170 = sbr.rel (%p167_p10) target bundleno = 767 (0x2ff), region = 28  ;;  %vm5772_vm1 = vmpackc.low (!%p167_p10), %vm518_vm0, %vm518_vm0  ;;  %s5686_s20 = smov (!%p167_p10), [#allocation2]  }
  0x10   : > { %p205_p11 = scmp.lt.s32.totalorder (!%p167_p10), %s203_s23, 11  ;;  %s5545_s4 = smul.u32 (!%p167_p10), 3456, %s200_s3 }
  0x11   : > { %s5554_s6 = smul.u32 (!%p167_p10), 55296, %s5676_s12  ;;  %s7877_s12 = scalar_lea.sflag (!%p167_p10), [#allocation3], %s200_s3 }
  0x12   : > { %s6757_s5 = scalar_lea.vmem (!%p167_p10), [#allocation2], %s5545_s4 }
  0x13   : > { %s3809_s7 = sshll.u32 (!%p167_p10), %s6757_s5, 4  ;;  %s7867_s16 = scalar_lea.hbm (!%p167_p10), %s7925_s2, %s5554_s6  ;;  %s7869_s7 = int_to_ptr.vmem [resolvable:$true] %s3809_s7 }
  0x14   : > { %s5606_s18 = scalar_lea.vmem (!%p167_p10), %s7869_s7, 55296 }
  0x15   : > { %p5607_p12 = scmp.ne.s32.totalorder (!%p167_p10), %s7869_s7, %s5606_s18 }
  0x16   : > { %s7938_s23 = smov (!%p205_p11, %s203_s23), 11 }
  0x17   : > { %s5546_s24 = smul.u32 384, %s7938_s23  ;;  %p5608_p13 = pnand %p5607_p12, %p5744_p4 }
  0x18   : > { %s5610_s23 = sshll.u32 %s5686_s20, 4  ;;  %s5611_s23 = int_to_ptr.vmem [resolvable:$false] %s5610_s23 }
  0x19   : > { %s5768_s27 = scalar_lea.vmem %s7924_s1, %s5546_s24  ;;  %s5817_s30 = scalar_lea.vmem %s7923_s0, %s5546_s24 }
  0x1a   : > { %v390_v1 = vld [vmem:[%s5768_s27 + $0x80] sm:$0xff]  ;;  %v391_v2 = vld [vmem:[%s5768_s27 + $0x88] sm:$0xff]  ;;  %v392_v10 = vld [vmem:[%s5768_s27 + $0x90] sm:$0xff]  ;;  %p5609_p0 = pneg %p5608_p13  ;;  %s5612_s24 = scalar_lea.vmem %s5611_s23, 110592 }
  0x1b   : > { %v374_v3 = vld [vmem:[%s5768_s27] sm:$0xff]  ;;  %v5241_v4 = vpack.c.bf16 %v391_v2, %v390_v1  ;;  %v375_v5 = vld [vmem:[%s5768_s27 + $0x8] sm:$0xff]  ;;  %v393_v11 = vld [vmem:[%s5768_s27 + $0x98] sm:$0xff]  ;;  %p5613_p1 = scmp.lt.s32.totalorder %s7869_s7, %s5611_s23  ;;  %p5614_p2 = scmp.lt.s32.totalorder %s5612_s24, %s5606_s18 }
  0x1c   : > { %v406_v6 = vld [vmem:[%s5768_s27 + $0x100] sm:$0xff]  ;;  %v407_v7 = vld [vmem:[%s5768_s27 + $0x108] sm:$0xff]  ;;  %v5244_v8 = vpack.c.bf16 %v375_v5, %v374_v3  ;;  %v5247_v12 = vpack.c.bf16 %v393_v11, %v392_v10  ;;  %v408_v13 = vld [vmem:[%s5768_s27 + $0x110] sm:$0xff] }
  0x1d   : > { %v5289_v9 = vpack.c.bf16 %v407_v7, %v406_v6  ;;  %5243 = vmatprep.subr.msk.bf16.mxu0 %vm5772_vm1, %v5241_v4  ;;  %v409_v14 = vld [vmem:[%s5768_s27 + $0x118] sm:$0xff]  ;;  %v376_v16 = vld [vmem:[%s5768_s27 + $0x10] sm:$0xff]  ;;  %v394_v18 = vld [vmem:[%s5768_s27 + $0xa0] sm:$0xff]  ;;  %p5615_p3 = por %p5614_p2, %p5613_p1 }
  0x1e   : > { %5246 = vmatpush3.bf16.xpose.msk.msra.mxu0 %vm5772_vm1, %v5244_v8  ;;  %v5295_v15 = vpack.c.bf16 %v409_v14, %v408_v13  ;;  %v377_v17 = vld [vmem:[%s5768_s27 + $0x18] sm:$0xff]  ;;  %v395_v19 = vld [vmem:[%s5768_s27 + $0xa8] sm:$0xff]  ;;  %v410_v20 = vld [vmem:[%s5768_s27 + $0x120] sm:$0xff] }
  0x1f   : > { %5291 = vmatprep.subr.msk.bf16.mxu1 %vm5772_vm1, %v5289_v9  ;;  %5249 = vmatprep.subr.msk.bf16.mxu0 %vm5772_vm1, %v5247_v12  ;;  %v411_v21 = vld [vmem:[%s5768_s27 + $0x128] sm:$0xff]  ;;  %v5250_v22 = vpack.c.bf16 %v377_v17, %v376_v16  ;;  %v5253_v23 = vpack.c.bf16 %v395_v19, %v394_v18  ;;  %v378_v25 = vld [vmem:[%s5768_s27 + $0x20] sm:$0xff]  ;;  %v396_v27 = vld [vmem:[%s5768_s27 + $0xb0] sm:$0xff]  ;;  %p5616_p5 = pnand %p5615_p3, %p5609_p0 }
  0x20   : > { %5294 = vmatpush3.bf16.xpose.msk.msra.mxu1 %vm5772_vm1, %v5289_v9  ;;  %v5301_v24 = vpack.c.bf16 %v411_v21, %v410_v20  ;;  %v379_v26 = vld [vmem:[%s5768_s27 + $0x28] sm:$0xff]  ;;  %v397_v28 = vld [vmem:[%s5768_s27 + $0xb8] sm:$0xff]  ;;  %v412_v29 = vld [vmem:[%s5768_s27 + $0x130] sm:$0xff] }
  0x21   : > { %5297 = vmatprep.subr.msk.bf16.mxu1 %vm5772_vm1, %v5295_v15  ;;  %v413_v30 = vld [vmem:[%s5768_s27 + $0x138] sm:$0xff]  ;;  %v5256_v31 = vpack.c.bf16 %v379_v26, %v378_v25  ;;  %v5826_v32 = vld [vmem:[%s5817_s30] sm:$0xff]  ;;  %v5259_v33 = vpack.c.bf16 %v397_v28, %v396_v27  ;;  %v380_v35 = vld [vmem:[%s5768_s27 + $0x30] sm:$0xff] }
  0x22   : > { %4385 = vmatprep.mubr.msk.f32.mxu0 %vm518_vm0, %v5826_v32  ;;  %4961 = vmatprep.mubr.msk.f32.mxu1 %vm518_vm0, %v5826_v32  ;;  %v5307_v34 = vpack.c.bf16 %v413_v30, %v412_v29  ;;  %v381_v36 = vld [vmem:[%s5768_s27 + $0x38] sm:$0xff]  ;;  %v398_v37 = vld [vmem:[%s5768_s27 + $0xc0] sm:$0xff]  ;;  %v399_v38 = vld [vmem:[%s5768_s27 + $0xc8] sm:$0xff] }
  0x23   : > { %v414_v39 = vld [vmem:[%s5768_s27 + $0x140] sm:$0xff]  ;;  %v415_v40 = vld [vmem:[%s5768_s27 + $0x148] sm:$0xff]  ;;  %v5262_v41 = vpack.c.bf16 %v381_v36, %v380_v35  ;;  %v5265_v42 = vpack.c.bf16 %v399_v38, %v398_v37  ;;  %v400_v46 = vld [vmem:[%s5768_s27 + $0xd0] sm:$0xff] }
  0x24   : > { %v5313_v43 = vpack.c.bf16 %v415_v40, %v414_v39  ;;  %v382_v44 = vld [vmem:[%s5768_s27 + $0x40] sm:$0xff]  ;;  %v383_v45 = vld [vmem:[%s5768_s27 + $0x48] sm:$0xff]  ;;  %v401_v47 = vld [vmem:[%s5768_s27 + $0xd8] sm:$0xff] }
  0x25   : > { %v416_v48 = vld [vmem:[%s5768_s27 + $0x150] sm:$0xff]  ;;  %v417_v49 = vld [vmem:[%s5768_s27 + $0x158] sm:$0xff]  ;;  %v5268_v50 = vpack.c.bf16 %v383_v45, %v382_v44  ;;  %v5271_v51 = vpack.c.bf16 %v401_v47, %v400_v46  ;;  %v402_v55 = vld [vmem:[%s5768_s27 + $0xe0] sm:$0xff] }
  0x26   : > { %5252 = vmatpush3.bf16.xpose.msk.msra.mxu0 %vm5772_vm1, %v5250_v22  ;;  %v5319_v52 = vpack.c.bf16 %v417_v49, %v416_v48  ;;  %v384_v53 = vld [vmem:[%s5768_s27 + $0x50] sm:$0xff]  ;;  %v385_v54 = vld [vmem:[%s5768_s27 + $0x58] sm:$0xff]  ;;  %v403_v56 = vld [vmem:[%s5768_s27 + $0xe8] sm:$0xff] }
  0x27   : > { %5255 = vmatprep.subr.msk.bf16.mxu0 %vm5772_vm1, %v5253_v23  ;;  %v418_v57 = vld [vmem:[%s5768_s27 + $0x160] sm:$0xff]  ;;  %v419_v58 = vld [vmem:[%s5768_s27 + $0x168] sm:$0xff]  ;;  %v5274_v59 = vpack.c.bf16 %v385_v54, %v384_v53  ;;  %v5277_v60 = vpack.c.bf16 %v403_v56, %v402_v55  ;;  %v404_v1 = vld [vmem:[%s5768_s27 + $0xf0] sm:$0xff] }
  0x28   : > { %5300 = vmatpush3.bf16.xpose.msk.msra.mxu1 %vm5772_vm1, %v5295_v15  ;;  %v5325_v61 = vpack.c.bf16 %v419_v58, %v418_v57  ;;  %v386_v62 = vld [vmem:[%s5768_s27 + $0x60] sm:$0xff]  ;;  %v387_v63 = vld [vmem:[%s5768_s27 + $0x68] sm:$0xff]  ;;  %v405_v2 = vld [vmem:[%s5768_s27 + $0xf8] sm:$0xff] }
  0x29   : > { %5303 = vmatprep.subr.msk.bf16.mxu1 %vm5772_vm1, %v5301_v24  ;;  %v420_v3 = vld [vmem:[%s5768_s27 + $0x170] sm:$0xff]  ;;  %v421_v4 = vld [vmem:[%s5768_s27 + $0x178] sm:$0xff]  ;;  %v5280_v5 = vpack.c.bf16 %v387_v63, %v386_v62  ;;  %v5283_v6 = vpack.c.bf16 %v405_v2, %v404_v1  ;;  %v454_v10 = vld [vmem:[%s5768_s27 + $0x280] sm:$0xff] }
  0x2a   : > { %v5331_v7 = vpack.c.bf16 %v421_v4, %v420_v3  ;;  %v388_v8 = vld [vmem:[%s5768_s27 + $0x70] sm:$0xff]  ;;  %v389_v9 = vld [vmem:[%s5768_s27 + $0x78] sm:$0xff]  ;;  %v455_v11 = vld [vmem:[%s5768_s27 + $0x288] sm:$0xff] }
  0x2b   : > { %v438_v12 = vld [vmem:[%s5768_s27 + $0x200] sm:$0xff]  ;;  %v439_v13 = vld [vmem:[%s5768_s27 + $0x208] sm:$0xff]  ;;  %v5286_v14 = vpack.c.bf16 %v389_v9, %v388_v8  ;;  %v5902_v15 = vpack.c.bf16 %v455_v11, %v454_v10  ;;  %v440_v19 = vld [vmem:[%s5768_s27 + $0x210] sm:$0xff] }
  0x2c   : > { %v5337_v16 = vpack.c.bf16 %v439_v13, %v438_v12  ;;  %v422_v17 = vld [vmem:[%s5768_s27 + $0x180] sm:$0xff]  ;;  %v423_v18 = vld [vmem:[%s5768_s27 + $0x188] sm:$0xff]  ;;  %v441_v20 = vld [vmem:[%s5768_s27 + $0x218] sm:$0xff] }
  0x2d   : > { %v456_v21 = vld [vmem:[%s5768_s27 + $0x290] sm:$0xff]  ;;  %v457_v22 = vld [vmem:[%s5768_s27 + $0x298] sm:$0xff]  ;;  %v231_v23 = vld [vmem:[%s5817_s30 + $0x8] sm:$0xff]  ;;  %v5343_v25 = vpack.c.bf16 %v441_v20, %v440_v19 }
  0x2e   : > { %5258 = vmatpush3.bf16.xpose.msk.msra.mxu0 %vm5772_vm1, %v5256_v31  ;;  %v232_v26 = vld [vmem:[%s5817_s30 + $0x10] sm:$0xff]  ;;  %v5923_v27 = vpack.c.bf16 %v457_v22, %v456_v21  ;;  %v233_v28 = vld [vmem:[%s5817_s30 + $0x18] sm:$0xff]  ;;  %v234_v29 = vld [vmem:[%s5817_s30 + $0x20] sm:$0xff] }
  0x2f   : > { %5261 = vmatprep.subr.msk.bf16.mxu0 %vm5772_vm1, %v5259_v33  ;;  %v424_v30 = vld [vmem:[%s5768_s27 + $0x190] sm:$0xff]  ;;  %v425_v31 = vld [vmem:[%s5768_s27 + $0x198] sm:$0xff]  ;;  %v443_v33 = vld [vmem:[%s5768_s27 + $0x228] sm:$0xff] }
  0x30   : > { %5306 = vmatpush3.bf16.xpose.msk.msra.mxu1 %vm5772_vm1, %v5301_v24  ;;  %v5340_v24 = vpack.c.bf16 %v423_v18, %v422_v17  ;;  %v459_v35 = vld [vmem:[%s5768_s27 + $0x2a8] sm:$0xff]  ;;  %v5346_v37 = vpack.c.bf16 %v425_v31, %v424_v30  ;;  %v236_v38 = vld [vmem:[%s5817_s30 + $0x30] sm:$0xff]  ;;  %v445_v46 = vld [vmem:[%s5768_s27 + $0x238] sm:$0xff] }
  0x31   : > { %5309 = vmatprep.subr.msk.bf16.mxu1 %vm5772_vm1, %v5307_v34  ;;  %v235_v36 = vld [vmem:[%s5817_s30 + $0x28] sm:$0xff]  ;;  %v444_v45 = vld [vmem:[%s5768_s27 + $0x230] sm:$0xff]  ;;  %v461_v48 = vld [vmem:[%s5768_s27 + $0x2b8] sm:$0xff] }
  0x32   : > { %v427_v44 = vld [vmem:[%s5768_s27 + $0x1a8] sm:$0xff]  ;;  %v460_v47 = vld [vmem:[%s5768_s27 + $0x2b0] sm:$0xff]  ;;  %v5998_v54 = vld [vmem:[%s5817_s30 + $0x58] sm:$0xff] }
  0x33   : > { %v5984_v49 = vld [vmem:[%s5817_s30 + $0x48] sm:$0xff]  ;;  %v5990_v53 = vpack.c.bf16 %v461_v48, %v460_v47  ;;  %v6003_v55 = vld [vmem:[%s5817_s30 + $0x60] sm:$0xff]  ;;  %v428_v56 = vld [vmem:[%s5768_s27 + $0x1b0] sm:$0xff] }
  0x34   : > { %v429_v57 = vld [vmem:[%s5768_s27 + $0x1b8] sm:$0xff]  ;;  %v446_v58 = vld [vmem:[%s5768_s27 + $0x240] sm:$0xff]  ;;  %v6026_v62 = vld [vmem:[%s5817_s30 + $0x68] sm:$0xff] }
  0x35   : > { %v5358_v63 = vpack.c.bf16 %v429_v57, %v428_v56  ;;  %v6029_v1 = vld [vmem:[%s5817_s30 + $0x70] sm:$0xff]  ;;  %v6040_v4 = vld [vmem:[%s5817_s30 + $0x78] sm:$0xff]  ;;  %v6069_v12 = vld [vmem:[%s5817_s30 + $0x88] sm:$0xff] }
  0x36   : > { %5264 = vmatpush3.bf16.xpose.msk.msra.mxu0 %vm5772_vm1, %v5262_v41  ;;  %v237_v41 = vld [vmem:[%s5817_s30 + $0x38] sm:$0xff]  ;;  %v448_v8 = vld [vmem:[%s5768_s27 + $0x250] sm:$0xff]  ;;  %v6090_v19 = vld [vmem:[%s5817_s30 + $0xa0] sm:$0xff] }
  0x37   : > { %5267 = vmatprep.subr.msk.bf16.mxu0 %vm5772_vm1, %v5265_v42  ;;  %v5962_v42 = vld [vmem:[%s5817_s30 + $0x40] sm:$0xff]  ;;  %v449_v9 = vld [vmem:[%s5768_s27 + $0x258] sm:$0xff]  ;;  %v464_v10 = vld [vmem:[%s5768_s27 + $0x2d0] sm:$0xff] }
  0x38   : > { %5312 = vmatpush3.bf16.xpose.msk.msra.mxu1 %vm5772_vm1, %v5307_v34  ;;  %v458_v34 = vld [vmem:[%s5768_s27 + $0x2a0] sm:$0xff]  ;;  %v465_v11 = vld [vmem:[%s5768_s27 + $0x2d8] sm:$0xff]  ;;  %v432_v20 = vld [vmem:[%s5768_s27 + $0x1d0] sm:$0xff] }
  0x39   : > { %5315 = vmatprep.subr.msk.bf16.mxu1 %vm5772_vm1, %v5313_v43  ;;  %v5953_v40 = vpack.c.bf16 %v459_v35, %v458_v34  ;;  %v6076_v17 = vpack.c.bf16 %v465_v11, %v464_v10  ;;  %v6085_v18 = vld [vmem:[%s5817_s30 + $0x98] sm:$0xff]  ;;  %v450_v22 = vld [vmem:[%s5768_s27 + $0x260] sm:$0xff]  ;;  %v435_v35 = vld [vmem:[%s5768_s27 + $0x1e8] sm:$0xff] }
  0x3a   : > { %v433_v21 = vld [vmem:[%s5768_s27 + $0x1d8] sm:$0xff]  ;;  %v434_v34 = vld [vmem:[%s5768_s27 + $0x1e0] sm:$0xff]  ;;  %v436_v48 = vld [vmem:[%s5768_s27 + $0x1f0] sm:$0xff] }
  0x3b   : > { %v6182_v47 = vld [vmem:[%s5817_s30 + $0xe0] sm:$0xff]  ;;  %v6239_v56 = vld [vmem:[%s5817_s30 + $0x108] sm:$0xff]  ;;  %v6330_v10 = vld [vmem:[%s5817_s30 + $0x170] sm:$0xff] }
  0x3c   : > { %v486_v57 = vld [vmem:[%s5768_s27 + $0x380] sm:$0xff]  ;;  %v6341_v11 = vld [vmem:[%s5817_s30 + $0x178] sm:$0xff]  ;;  %v7353_v0 = vld [vmem:[%s5817_s30 + $0x3c8] sm:$0xff] }
  0x3e   : > { %5270 = vmatpush3.bf16.xpose.msk.msra.mxu0 %vm5772_vm1, %v5268_v50 }
  0x3f   : > { %5273 = vmatprep.subr.msk.bf16.mxu0 %vm5772_vm1, %v5271_v51  ;;  %v5987_v51 = vld [vmem:[%s5817_s30 + $0x50] sm:$0xff] }
  0x40   : > { %5318 = vmatpush3.bf16.xpose.msk.msra.mxu1 %vm5772_vm1, %v5313_v43  ;;  %v426_v43 = vld [vmem:[%s5768_s27 + $0x1a0] sm:$0xff] }
  0x41   : > { %5321 = vmatprep.subr.msk.bf16.mxu1 %vm5772_vm1, %v5319_v52  ;;  %v5352_v50 = vpack.c.bf16 %v427_v44, %v426_v43  ;;  %v6164_v43 = vld [vmem:[%s5817_s30 + $0xd0] sm:$0xff] }
  0x46   : > { %5276 = vmatpush3.bf16.xpose.msk.msra.mxu0 %vm5772_vm1, %v5274_v59  ;;  %v447_v59 = vld [vmem:[%s5768_s27 + $0x248] sm:$0xff] }
  0x47   : > { %5279 = vmatprep.subr.msk.bf16.mxu0 %vm5772_vm1, %v5277_v60  ;;  %v462_v60 = vld [vmem:[%s5768_s27 + $0x2c0] sm:$0xff]  ;;  %v5361_v2 = vpack.c.bf16 %v447_v59, %v446_v58  ;;  %v487_v58 = vld [vmem:[%s5768_s27 + $0x388] sm:$0xff]  ;;  %v6244_v59 = vld [vmem:[%s5817_s30 + $0x110] sm:$0xff] }
  0x48   : > { %5324 = vmatpush3.bf16.xpose.msk.msra.mxu1 %vm5772_vm1, %v5319_v52  ;;  %v5355_v52 = vpack.c.bf16 %v445_v46, %v444_v45  ;;  %v6177_v46 = vld [vmem:[%s5817_s30 + $0xd8] sm:$0xff] }
  0x49   : > { %5327 = vmatprep.subr.msk.bf16.mxu1 %vm5772_vm1, %v5325_v61 }
  0x4e   : > { %5282 = vmatpush3.bf16.xpose.msk.msra.mxu0 %vm5772_vm1, %v5280_v5  ;;  %v6045_v5 = vld [vmem:[%s5817_s30 + $0x80] sm:$0xff] }
  0x4f   : > { %5285 = vmatprep.subr.msk.bf16.mxu0 %vm5772_vm1, %v5283_v6  ;;  %v430_v6 = vld [vmem:[%s5768_s27 + $0x1c0] sm:$0xff] }
  0x50   : > { %5330 = vmatpush3.bf16.xpose.msk.msra.mxu1 %vm5772_vm1, %v5325_v61  ;;  %v463_v61 = vld [vmem:[%s5768_s27 + $0x2c8] sm:$0xff] }
  0x51   : > { %5333 = vmatprep.subr.msk.bf16.mxu1 %vm5772_vm1, %v5331_v7  ;;  %v6032_v3 = vpack.c.bf16 %v463_v61, %v462_v60  ;;  %v5433_v60 = vpack.c.bf16 %v487_v58, %v486_v57  ;;  %v6255_v61 = vld [vmem:[%s5817_s30 + $0x118] sm:$0xff]  ;;  %v492_v57 = vld [vmem:[%s5768_s27 + $0x3b0] sm:$0xff] }
  0x52   : > { %v493_v58 = vld [vmem:[%s5768_s27 + $0x3b8] sm:$0xff] }
  0x56   : > { %5288 = vmatpush3.bf16.xpose.msk.msra.mxu0 %vm5772_vm1, %v5286_v14  ;;  %v6072_v14 = vld [vmem:[%s5817_s30 + $0x90] sm:$0xff] }
  0x57   : > { %5387 = vmatprep.subr.msk.bf16.mxu0 %vm5772_vm1, %v5902_v15 }
  0x58   : > { %5336 = vmatpush3.bf16.xpose.msk.msra.mxu1 %vm5772_vm1, %v5331_v7  ;;  %v431_v7 = vld [vmem:[%s5768_s27 + $0x1c8] sm:$0xff] }
  0x59   : > { %5339 = vmatprep.subr.msk.bf16.mxu1 %vm5772_vm1, %v5337_v16  ;;  %v5364_v13 = vpack.c.bf16 %v431_v7, %v430_v6  ;;  %v5367_v16 = vpack.c.bf16 %v449_v9, %v448_v8  ;;  %v6302_v6 = vld [vmem:[%s5817_s30 + $0x150] sm:$0xff]  ;;  %v6313_v7 = vld [vmem:[%s5817_s30 + $0x158] sm:$0xff]  ;;  %v6316_v8 = vld [vmem:[%s5817_s30 + $0x160] sm:$0xff] }
  0x5a   : > { %v6327_v9 = vld [vmem:[%s5817_s30 + $0x168] sm:$0xff] }
  0x5d   : > { %4386 = vmatmul.mubr.msk.f32.vlgmr.msra.gmra.mrb[0].mxu0 %vm518_vm0, %v5826_v32  ;;  %v442_v32 = vld [vmem:[%s5768_s27 + $0x220] sm:$0xff] }
  0x5e   : > { %5390 = vmatpush3.bf16.xpose.msk.msra.mxu0 %vm5772_vm1, %v5902_v15  ;;  %4387 = vmatprep.mubr.msk.f32.mxu0 %vm518_vm0, %v231_v23  ;;  %v5349_v39 = vpack.c.bf16 %v443_v33, %v442_v32  ;;  %v6131_v32 = vld [vmem:[%s5817_s30 + $0xb8] sm:$0xff]  ;;  %v6136_v33 = vld [vmem:[%s5817_s30 + $0xc0] sm:$0xff] }
  0x5f   : > { %4962 = vmatmul.mubr.msk.f32.vlgmr.msra.gmra.mrb[0].mxu1 %vm518_vm0, %v231_v23  ;;  %5393 = vmatprep.subr.msk.bf16.mxu0 %vm5772_vm1, %v5923_v27 }
  0x60   : > { %5342 = vmatpush3.bf16.xpose.msk.msra.mxu1 %vm5772_vm1, %v5340_v24  ;;  %4964 = vmatprep.mubr.msk.f32.mxu1 %vm518_vm0, %v232_v26  ;;  %v466_v24 = vld [vmem:[%s5768_s27 + $0x2e0] sm:$0xff] }
  0x61   : > { %5345 = vmatprep.subr.msk.bf16.mxu1 %vm5772_vm1, %v5343_v25  ;;  %4388 = vmatmul.mubr.msk.f32.gmra.mrb[2].mxu0 %vm518_vm0, %v231_v23  ;;  %v451_v23 = vld [vmem:[%s5768_s27 + $0x268] sm:$0xff] }
  0x62   : > { %4389 = vmatprep.mubr.msk.f32.mxu0 %vm518_vm0, %v232_v26  ;;  %v467_v25 = vld [vmem:[%s5768_s27 + $0x2e8] sm:$0xff]  ;;  %v5373_v30 = vpack.c.bf16 %v451_v23, %v450_v22  ;;  %v6537_v22 = vld [vmem:[%s5817_s30 + $0x1f0] sm:$0xff]  ;;  %v6551_v23 = vld [vmem:[%s5817_s30 + $0x1f8] sm:$0xff] }
  0x63   : > { %4965 = vmatmul.mubr.msk.f32.gmra.mrb[2].mxu1 %vm518_vm0, %v233_v28  ;;  %v6122_v31 = vpack.c.bf16 %v467_v25, %v466_v24  ;;  %v6565_v24 = vld [vmem:[%s5817_s30 + $0x200] sm:$0xff] }
  0x64   : > { %4967 = vmatprep.mubr.msk.f32.mxu1 %vm518_vm0, %v234_v29  ;;  %v502_v25 = vld [vmem:[%s5768_s27 + $0x400] sm:$0xff] }
  0x65   : > { %4390 = vmatmul.mubr.msk.f32.gmra.mrb[4].mxu0 %vm518_vm0, %v232_v26  ;;  %v6115_v26 = vld [vmem:[%s5817_s30 + $0xa8] sm:$0xff] }
  0x66   : > { %4391 = vmatprep.mubr.msk.f32.mxu0 %vm518_vm0, %v233_v28  ;;  %5396 = vmatpush3.bf16.xpose.msk.msra.mxu0 %vm5772_vm1, %v5923_v27 }
  0x67   : > { %4968 = vmatmul.mubr.msk.f32.gmra.mrb[4].mxu1 %vm518_vm0, %v235_v36  ;;  %5399 = vmatprep.subr.msk.bf16.mxu0 %vm5772_vm1, %v5953_v40 }
  0x68   : > { %4970 = vmatprep.mubr.msk.f32.mxu1 %vm518_vm0, %v236_v38  ;;  %5348 = vmatpush3.bf16.xpose.msk.msra.mxu1 %vm5772_vm1, %v5346_v37  ;;  %v453_v37 = vld [vmem:[%s5768_s27 + $0x278] sm:$0xff] }
  0x69   : > { %5351 = vmatprep.subr.msk.bf16.mxu1 %vm5772_vm1, %v5349_v39  ;;  %4392 = vmatmul.mubr.msk.f32.gmra.mrb[6].mxu0 %vm518_vm0, %v233_v28  ;;  %v5370_v28 = vpack.c.bf16 %v433_v21, %v432_v20  ;;  %v469_v39 = vld [vmem:[%s5768_s27 + $0x2f8] sm:$0xff]  ;;  %v6481_v20 = vld [vmem:[%s5817_s30 + $0x1d0] sm:$0xff]  ;;  %v6509_v21 = vld [vmem:[%s5817_s30 + $0x1e0] sm:$0xff] }
  0x6a   : > { %4393 = vmatprep.mubr.msk.f32.mxu0 %vm518_vm0, %v234_v29 }
  0x6b   : > { %4971 = vmatmul.mubr.msk.f32.gmra.mrb[6].mxu1 %vm518_vm0, %v237_v41 }
  0x6c   : > { %4973 = vmatprep.mubr.msk.f32.mxu1 %vm518_vm0, %v5962_v42 }
  0x6d   : > { %4394 = vmatmul.mubr.msk.f32.gmra.mrb[8].mxu0 %vm518_vm0, %v234_v29  ;;  %v6118_v29 = vld [vmem:[%s5817_s30 + $0xb0] sm:$0xff] }
  0x6e   : > { %4395 = vmatprep.mubr.msk.f32.mxu0 %vm518_vm0, %v235_v36  ;;  %5402 = vmatpush3.bf16.xpose.msk.msra.mxu0 %vm5772_vm1, %v5953_v40 }
  0x6f   : > { %4974 = vmatmul.mubr.msk.f32.gmra.mrb[8].mxu1 %vm518_vm0, %v5984_v49  ;;  %5405 = vmatprep.subr.msk.bf16.mxu0 %vm5772_vm1, %v5990_v53 }
  0x70   : > { %4976 = vmatprep.mubr.msk.f32.mxu1 %vm518_vm0, %v5987_v51  ;;  %5354 = vmatpush3.bf16.xpose.msk.msra.mxu1 %vm5772_vm1, %v5352_v50  ;;  %v6203_v50 = vld [vmem:[%s5817_s30 + $0xe8] sm:$0xff] }
  0x71   : > { %5357 = vmatprep.subr.msk.bf16.mxu1 %vm5772_vm1, %v5355_v52  ;;  %4396 = vmatmul.mubr.msk.f32.gmra.mrb[10].mxu0 %vm518_vm0, %v235_v36  ;;  %v452_v36 = vld [vmem:[%s5768_s27 + $0x270] sm:$0xff] }
  0x72   : > { %4397 = vmatprep.mubr.msk.f32.mxu0 %vm518_vm0, %v236_v38  ;;  %v5379_v44 = vpack.c.bf16 %v453_v37, %v452_v36  ;;  %v6206_v52 = vld [vmem:[%s5817_s30 + $0xf0] sm:$0xff]  ;;  %v470_v36 = vld [vmem:[%s5768_s27 + $0x300] sm:$0xff]  ;;  %v471_v37 = vld [vmem:[%s5768_s27 + $0x308] sm:$0xff] }
  0x73   : > { %4977 = vmatmul.mubr.msk.f32.gmra.mrb[10].mxu1 %vm518_vm0, %v5998_v54 }
  0x74   : > { %4979 = vmatprep.mubr.msk.f32.mxu1 %vm518_vm0, %v6003_v55 }
  0x75   : > { %4398 = vmatmul.mubr.msk.f32.gmra.mrb[12].mxu0 %vm518_vm0, %v236_v38  ;;  %v468_v38 = vld [vmem:[%s5768_s27 + $0x2f0] sm:$0xff] }
  0x76   : > { %4399 = vmatprep.mubr.msk.f32.mxu0 %vm518_vm0, %v237_v41  ;;  %5408 = vmatpush3.bf16.xpose.msk.msra.mxu0 %vm5772_vm1, %v5990_v53  ;;  %v6168_v45 = vpack.c.bf16 %v469_v39, %v468_v38  ;;  %v6662_v38 = vld [vmem:[%s5817_s30 + $0x240] sm:$0xff]  ;;  %v488_v39 = vld [vmem:[%s5768_s27 + $0x390] sm:$0xff] }
  0x77   : > { %4980 = vmatmul.mubr.msk.f32.gmra.mrb[12].mxu1 %vm518_vm0, %v6026_v62  ;;  %5411 = vmatprep.subr.msk.bf16.mxu0 %vm5772_vm1, %v6032_v3 }
  0x78   : > { %4982 = vmatprep.mubr.msk.f32.mxu1 %vm518_vm0, %v6029_v1  ;;  %5360 = vmatpush3.bf16.xpose.msk.msra.mxu1 %vm5772_vm1, %v5358_v63  ;;  %v6271_v63 = vld [vmem:[%s5817_s30 + $0x128] sm:$0xff] }
  0x79   : > { %5363 = vmatprep.subr.msk.bf16.mxu1 %vm5772_vm1, %v5361_v2  ;;  %4400 = vmatmul.mubr.msk.f32.gmra.mrb[14].mxu0 %vm518_vm0, %v237_v41  ;;  %v6161_v41 = vld [vmem:[%s5817_s30 + $0xc8] sm:$0xff]  ;;  %v6285_v2 = vld [vmem:[%s5817_s30 + $0x138] sm:$0xff] }
  0x7a   : > { %4401 = vmatprep.mubr.msk.f32.mxu0 %vm518_vm0, %v5962_v42 }
  0x7b   : > { %4983 = vmatmul.mubr.msk.f32.gmra.mrb[14].mxu1 %vm518_vm0, %v6040_v4 }
  0x7c   : > { %4985 = vmatprep.mubr.msk.f32.mxu1 %vm518_vm0, %v6045_v5 }
  0x7d   : > { %4402 = vmatmul.mubr.msk.f32.gmra.mrb[16].mxu0 %vm518_vm0, %v5962_v42  ;;  %v5376_v42 = vpack.c.bf16 %v435_v35, %v434_v34  ;;  %v6638_v34 = vld [vmem:[%s5817_s30 + $0x230] sm:$0xff]  ;;  %v6649_v35 = vld [vmem:[%s5817_s30 + $0x238] sm:$0xff] }
  0x7e   : > { %4403 = vmatprep.mubr.msk.f32.mxu0 %vm518_vm0, %v5984_v49  ;;  %5414 = vmatpush3.bf16.xpose.msk.msra.mxu0 %vm5772_vm1, %v6032_v3 }
  0x7f   : > { %4986 = vmatmul.mubr.msk.f32.gmra.mrb[16].mxu1 %vm518_vm0, %v6069_v12  ;;  %5417 = vmatprep.subr.msk.bf16.mxu0 %vm5772_vm1, %v6076_v17 }
  0x80   : > { %4988 = vmatprep.mubr.msk.f32.mxu1 %vm518_vm0, %v6072_v14  ;;  %5366 = vmatpush3.bf16.xpose.msk.msra.mxu1 %vm5772_vm1, %v5364_v13  ;;  %v6355_v13 = vld [vmem:[%s5817_s30 + $0x188] sm:$0xff] }
  0x81   : > { %5369 = vmatprep.subr.msk.bf16.mxu1 %vm5772_vm1, %v5367_v16  ;;  %4404 = vmatmul.mubr.msk.f32.gmra.mrb[18].mxu0 %vm518_vm0, %v5984_v49  ;;  %v437_v49 = vld [vmem:[%s5768_s27 + $0x1f8] sm:$0xff]  ;;  %v6397_v16 = vld [vmem:[%s5817_s30 + $0x1a0] sm:$0xff] }
  0x82   : > { %4405 = vmatprep.mubr.msk.f32.mxu0 %vm518_vm0, %v5987_v51 }
  0x83   : > { %4989 = vmatmul.mubr.msk.f32.gmra.mrb[18].mxu1 %vm518_vm0, %v6085_v18 }
  0x84   : > { %4991 = vmatprep.mubr.msk.f32.mxu1 %vm518_vm0, %v6090_v19 }
  0x85   : > { %4406 = vmatmul.mubr.msk.f32.gmra.mrb[20].mxu0 %vm518_vm0, %v5987_v51  ;;  %v5382_v51 = vpack.c.bf16 %v437_v49, %v436_v48  ;;  %v490_v48 = vld [vmem:[%s5768_s27 + $0x3a0] sm:$0xff]  ;;  %v491_v49 = vld [vmem:[%s5768_s27 + $0x3a8] sm:$0xff] }
  0x86   : > { %4407 = vmatprep.mubr.msk.f32.mxu0 %vm518_vm0, %v5998_v54  ;;  %5420 = vmatpush3.bf16.xpose.msk.msra.mxu0 %vm5772_vm1, %v6076_v17 }
  0x87   : > { %4992 = vmatmul.mubr.msk.f32.gmra.mrb[20].mxu1 %vm518_vm0, %v6115_v26  ;;  %5423 = vmatprep.subr.msk.bf16.mxu0 %vm5772_vm1, %v6122_v31 }
  0x88   : > { %4994 = vmatprep.mubr.msk.f32.mxu1 %vm518_vm0, %v6118_v29  ;;  %5372 = vmatpush3.bf16.xpose.msk.msra.mxu1 %vm5772_vm1, %v5370_v28 }
  0x89   : > { %5375 = vmatprep.subr.msk.bf16.mxu1 %vm5772_vm1, %v5373_v30  ;;  %4408 = vmatmul.mubr.msk.f32.gmra.mrb[22].mxu0 %vm518_vm0, %v5998_v54  ;;  %v6217_v54 = vld [vmem:[%s5817_s30 + $0xf8] sm:$0xff]  ;;  %v6594_v30 = vld [vmem:[%s5817_s30 + $0x210] sm:$0xff] }
  0x8a   : > { %4409 = vmatprep.mubr.msk.f32.mxu0 %vm518_vm0, %v6003_v55 }
  0x8b   : > { %4995 = vmatmul.mubr.msk.f32.gmra.mrb[22].mxu1 %vm518_vm0, %v6131_v32 }
  0x8c   : > { %4997 = vmatprep.mubr.msk.f32.mxu1 %vm518_vm0, %v6136_v33 }
  0x8d   : > { %4410 = vmatmul.mubr.msk.f32.gmra.mrb[24].mxu0 %vm518_vm0, %v6003_v55  ;;  %v6222_v55 = vld [vmem:[%s5817_s30 + $0x100] sm:$0xff] }
  0x8e   : > { %4411 = vmatprep.mubr.msk.f32.mxu0 %vm518_vm0, %v6026_v62  ;;  %5426 = vmatpush3.bf16.xpose.msk.msra.mxu0 %vm5772_vm1, %v6122_v31 }
  0x8f   : > { %4998 = vmatmul.mubr.msk.f32.gmra.mrb[24].mxu1 %vm518_vm0, %v6161_v41  ;;  %5429 = vmatprep.subr.msk.bf16.mxu0 %vm5772_vm1, %v6168_v45 }
  0x90   : > { %5000 = vmatprep.mubr.msk.f32.mxu1 %vm518_vm0, %v6164_v43  ;;  %5378 = vmatpush3.bf16.xpose.msk.msra.mxu1 %vm5772_vm1, %v5376_v42  ;;  %v5436_v42 = vpack.c.bf16 %v471_v37, %v470_v36  ;;  %v481_v37 = vld [vmem:[%s5768_s27 + $0x358] sm:$0xff] }
  0x91   : > { %5381 = vmatprep.subr.msk.bf16.mxu1 %vm5772_vm1, %v5379_v44  ;;  %4412 = vmatmul.mubr.msk.f32.gmra.mrb[26].mxu0 %vm518_vm0, %v6026_v62  ;;  %v6260_v62 = vld [vmem:[%s5817_s30 + $0x120] sm:$0xff] }
  0x92   : > { %4413 = vmatprep.mubr.msk.f32.mxu0 %vm518_vm0, %v6029_v1 }
  0x93   : > { %5001 = vmatmul.mubr.msk.f32.gmra.mrb[26].mxu1 %vm518_vm0, %v6177_v46 }
  0x94   : > { %5003 = vmatprep.mubr.msk.f32.mxu1 %vm518_vm0, %v6182_v47 }
  0x95   : > { %4414 = vmatmul.mubr.msk.f32.gmra.mrb[28].mxu0 %vm518_vm0, %v6029_v1  ;;  %v6274_v1 = vld [vmem:[%s5817_s30 + $0x130] sm:$0xff] }
  0x96   : > { %4415 = vmatprep.mubr.msk.f32.mxu0 %vm518_vm0, %v6040_v4  ;;  %5432 = vmatpush3.bf16.xpose.msk.msra.mxu0 %vm5772_vm1, %v6168_v45 }
  0x97   : > { %5004 = vmatmul.mubr.msk.f32.gmra.mrb[28].mxu1 %vm518_vm0, %v6203_v50  ;;  %5435 = vmatprep.subr.msk.bf16.mxu0 %vm5772_vm1, %v5433_v60  ;;  %v6738_v60 = vld [vmem:[%s5817_s30 + $0x268] sm:$0xff] }
  0x98   : > { %5006 = vmatprep.mubr.msk.f32.mxu1 %vm518_vm0, %v6206_v52  ;;  %5384 = vmatpush3.bf16.xpose.msk.msra.mxu1 %vm5772_vm1, %v5382_v51  ;;  %v6705_v51 = vld [vmem:[%s5817_s30 + $0x258] sm:$0xff] }
  0x99   : > { %5529 = vmatprep.subr.msk.bf16.mxu1 %vm5772_vm1, %v5902_v15  ;;  %4416 = vmatmul.mubr.msk.f32.gmra.mrb[30].mxu0 %vm518_vm0, %v6040_v4  ;;  %v6288_v4 = vld [vmem:[%s5817_s30 + $0x140] sm:$0xff] }
  0x9a   : > { %4417 = vmatprep.mubr.msk.f32.mxu0 %vm518_vm0, %v6045_v5 }
  0x9b   : > { %5007 = vmatmul.mubr.msk.f32.gmra.mrb[30].mxu1 %vm518_vm0, %v6217_v54 }
  0x9c   : > { %5009 = vmatprep.mubr.msk.f32.mxu1 %vm518_vm0, %v6222_v55 }
  0x9d   : > { %4418 = vmatmul.mubr.msk.f32.gmra.mrb[32].mxu0 %vm518_vm0, %v6045_v5  ;;  %v6299_v5 = vld [vmem:[%s5817_s30 + $0x148] sm:$0xff] }
  0x9e   : > { %4419 = vmatprep.mubr.msk.f32.mxu0 %vm518_vm0, %v6069_v12 }
  0x9f   : > { %5010 = vmatmul.mubr.msk.f32.gmra.mrb[32].mxu1 %vm518_vm0, %v6239_v56 }
  0xa0   : > { %5012 = vmatprep.mubr.msk.f32.mxu1 %vm518_vm0, %v6244_v59 }
  0xa1   : > { %4420 = vmatmul.mubr.msk.f32.gmra.mrb[34].mxu0 %vm518_vm0, %v6069_v12  ;;  %v6344_v12 = vld [vmem:[%s5817_s30 + $0x180] sm:$0xff] }
  0xa2   : > { %4421 = vmatprep.mubr.msk.f32.mxu0 %vm518_vm0, %v6072_v14 }
  0xa3   : > { %5013 = vmatmul.mubr.msk.f32.gmra.mrb[34].mxu1 %vm518_vm0, %v6255_v61 }
  0xa4   : > { %5015 = vmatprep.mubr.msk.f32.mxu1 %vm518_vm0, %v6260_v62 }
  0xa5   : > { %4422 = vmatmul.mubr.msk.f32.gmra.mrb[36].mxu0 %vm518_vm0, %v6072_v14  ;;  %v6369_v14 = vld [vmem:[%s5817_s30 + $0x190] sm:$0xff] }
  0xa6   : > { %4423 = vmatprep.mubr.msk.f32.mxu0 %vm518_vm0, %v6085_v18 }
  0xa7   : > { %5016 = vmatmul.mubr.msk.f32.gmra.mrb[36].mxu1 %vm518_vm0, %v6271_v63 }
  0xa8   : > { %5018 = vmatprep.mubr.msk.f32.mxu1 %vm518_vm0, %v6274_v1 }
  0xa9   : > { %4424 = vmatmul.mubr.msk.f32.gmra.mrb[38].mxu0 %vm518_vm0, %v6085_v18  ;;  %v6425_v18 = vld [vmem:[%s5817_s30 + $0x1b0] sm:$0xff] }
  0xaa   : > { %4425 = vmatprep.mubr.msk.f32.mxu0 %vm518_vm0, %v6090_v19 }
  0xab   : > { %5019 = vmatmul.mubr.msk.f32.gmra.mrb[38].mxu1 %vm518_vm0, %v6285_v2 }
  0xac   : > { %5021 = vmatprep.mubr.msk.f32.mxu1 %vm518_vm0, %v6288_v4 }
  0xad   : > { %4426 = vmatmul.mubr.msk.f32.gmra.mrb[40].mxu0 %vm518_vm0, %v6090_v19  ;;  %v6453_v19 = vld [vmem:[%s5817_s30 + $0x1c0] sm:$0xff] }
  0xae   : > { %4427 = vmatprep.mubr.msk.f32.mxu0 %vm518_vm0, %v6115_v26 }
  0xaf   : > { %5022 = vmatmul.mubr.msk.f32.gmra.mrb[40].mxu1 %vm518_vm0, %v6299_v5 }
  0xb0   : > { %5024 = vmatprep.mubr.msk.f32.mxu1 %vm518_vm0, %v6302_v6 }
  0xb1   : > { %4428 = vmatmul.mubr.msk.f32.gmra.mrb[42].mxu0 %vm518_vm0, %v6115_v26  ;;  %v503_v26 = vld [vmem:[%s5768_s27 + $0x408] sm:$0xff] }
  0xb2   : > { %4429 = vmatprep.mubr.msk.f32.mxu0 %vm518_vm0, %v6118_v29  ;;  %v6577_v28 = vpack.c.bf16 %v503_v26, %v502_v25 }
  0xb3   : > { %5025 = vmatmul.mubr.msk.f32.gmra.mrb[42].mxu1 %vm518_vm0, %v6313_v7 }
  0xb4   : > { %5027 = vmatprep.mubr.msk.f32.mxu1 %vm518_vm0, %v6316_v8 }
  0xb5   : > { %4430 = vmatmul.mubr.msk.f32.gmra.mrb[44].mxu0 %vm518_vm0, %v6118_v29  ;;  %v6580_v29 = vld [vmem:[%s5817_s30 + $0x208] sm:$0xff] }
  0xb6   : > { %4431 = vmatprep.mubr.msk.f32.mxu0 %vm518_vm0, %v6131_v32 }
  0xb7   : > { %5028 = vmatmul.mubr.msk.f32.gmra.mrb[44].mxu1 %vm518_vm0, %v6327_v9 }
  0xb8   : > { %5030 = vmatprep.mubr.msk.f32.mxu1 %vm518_vm0, %v6330_v10 }
  0xb9   : > { %4432 = vmatmul.mubr.msk.f32.gmra.mrb[46].mxu0 %vm518_vm0, %v6131_v32  ;;  %v6616_v32 = vld [vmem:[%s5817_s30 + $0x220] sm:$0xff] }
  0xba   : > { %4433 = vmatprep.mubr.msk.f32.mxu0 %vm518_vm0, %v6136_v33 }
  0xbb   : > { %5031 = vmatmul.mubr.msk.f32.gmra.mrb[46].mxu1 %vm518_vm0, %v6341_v11 }
  0xbc   : > { %4577 = vmatprep.mubr.msk.f32.mxu1 %vm518_vm0, %v6344_v12 }
  0xbd   : > { %4434 = vmatmul.mubr.msk.f32.gmra.mrb[48].mxu0 %vm518_vm0, %v6136_v33  ;;  %v6627_v33 = vld [vmem:[%s5817_s30 + $0x228] sm:$0xff] }
  0xbe   : > { %4435 = vmatprep.mubr.msk.f32.mxu0 %vm518_vm0, %v6161_v41 }
  0xbf   : > { %4578 = vmatmul.mubr.msk.f32.vlgmr.msra.gmra.mrb[48].mxu1 %vm518_vm0, %v6344_v12 }
  0xc0   : > { %5537 = vmatpush3.bf16.xpose.msk.msra.mxu1 %vm5772_vm1, %v5902_v15  ;;  %4579 = vmatprep.mubr.msk.f32.mxu1 %vm518_vm0, %v6355_v13  ;;  %v6383_v15 = vld [vmem:[%s5817_s30 + $0x198] sm:$0xff] }
  0xc1   : > { %5530 = vmatprep.subr.msk.bf16.mxu1 %vm5772_vm1, %v5923_v27  ;;  %4436 = vmatmul.mubr.msk.f32.gmra.mrb[50].mxu0 %vm518_vm0, %v6161_v41  ;;  %v489_v41 = vld [vmem:[%s5768_s27 + $0x398] sm:$0xff] }
  0xc2   : > { %4437 = vmatprep.mubr.msk.f32.mxu0 %vm518_vm0, %v6164_v43  ;;  %v5439_v44 = vpack.c.bf16 %v489_v41, %v488_v39  ;;  %v6831_v41 = vld [vmem:[%s5817_s30 + $0x290] sm:$0xff] }
  0xc3   : > { %4580 = vmatmul.mubr.msk.f32.gmra.mrb[50].mxu1 %vm518_vm0, %v6355_v13 }
  0xc4   : > { %4581 = vmatprep.mubr.msk.f32.mxu1 %vm518_vm0, %v6369_v14 }
  0xc5   : > { %4438 = vmatmul.mubr.msk.f32.gmra.mrb[52].mxu0 %vm518_vm0, %v6164_v43  ;;  %v6675_v43 = vld [vmem:[%s5817_s30 + $0x248] sm:$0xff] }
  0xc6   : > { %4439 = vmatprep.mubr.msk.f32.mxu0 %vm518_vm0, %v6177_v46 }
  0xc7   : > { %4582 = vmatmul.mubr.msk.f32.gmra.mrb[52].mxu1 %vm518_vm0, %v6369_v14 }
  0xc8   : > { %4583 = vmatprep.mubr.msk.f32.mxu1 %vm518_vm0, %v6383_v15  ;;  %5538 = vmatpush3.bf16.xpose.msk.msra.mxu1 %vm5772_vm1, %v5923_v27  ;;  %v6411_v27 = vld [vmem:[%s5817_s30 + $0x1a8] sm:$0xff] }
  0xc9   : > { %5531 = vmatprep.subr.msk.bf16.mxu1 %vm5772_vm1, %v5953_v40  ;;  %4440 = vmatmul.mubr.msk.f32.gmra.mrb[54].mxu0 %vm518_vm0, %v6177_v46  ;;  %v473_v46 = vld [vmem:[%s5768_s27 + $0x318] sm:$0xff] }
  0xca   : > { %4441 = vmatprep.mubr.msk.f32.mxu0 %vm518_vm0, %v6182_v47 }
  0xcb   : > { %4584 = vmatmul.mubr.msk.f32.gmra.mrb[54].mxu1 %vm518_vm0, %v6383_v15 }
  0xcc   : > { %4585 = vmatprep.mubr.msk.f32.mxu1 %vm518_vm0, %v6397_v16 }
  0xcd   : > { %4442 = vmatmul.mubr.msk.f32.gmra.mrb[56].mxu0 %vm518_vm0, %v6182_v47  ;;  %v6690_v47 = vld [vmem:[%s5817_s30 + $0x250] sm:$0xff] }
  0xce   : > { %4443 = vmatprep.mubr.msk.f32.mxu0 %vm518_vm0, %v6203_v50 }
  0xcf   : > { %4586 = vmatmul.mubr.msk.f32.gmra.mrb[56].mxu1 %vm518_vm0, %v6397_v16 }
  0xd0   : > { %4587 = vmatprep.mubr.msk.f32.mxu1 %vm518_vm0, %v6411_v27  ;;  %5539 = vmatpush3.bf16.xpose.msk.msra.mxu1 %vm5772_vm1, %v5953_v40  ;;  %v6439_v40 = vld [vmem:[%s5817_s30 + $0x1b8] sm:$0xff] }
  0xd1   : > { %5532 = vmatprep.subr.msk.bf16.mxu1 %vm5772_vm1, %v5990_v53  ;;  %4444 = vmatmul.mubr.msk.f32.gmra.mrb[58].mxu0 %vm518_vm0, %v6203_v50 }
  0xd2   : > { %4445 = vmatprep.mubr.msk.f32.mxu0 %vm518_vm0, %v6206_v52 }
  0xd3   : > { %4588 = vmatmul.mubr.msk.f32.gmra.mrb[58].mxu1 %vm518_vm0, %v6411_v27 }
  0xd4   : > { %4589 = vmatprep.mubr.msk.f32.mxu1 %vm518_vm0, %v6425_v18 }
  0xd5   : > { %4446 = vmatmul.mubr.msk.f32.gmra.mrb[60].mxu0 %vm518_vm0, %v6206_v52  ;;  %v5445_v52 = vpack.c.bf16 %v491_v49, %v490_v48  ;;  %v6850_v49 = vld [vmem:[%s5817_s30 + $0x298] sm:$0xff] }
  0xd6   : > { %4447 = vmatprep.mubr.msk.f32.mxu0 %vm518_vm0, %v6217_v54 }
  0xd7   : > { %4590 = vmatmul.mubr.msk.f32.gmra.mrb[60].mxu1 %vm518_vm0, %v6425_v18 }
  0xd8   : > { %4591 = vmatprep.mubr.msk.f32.mxu1 %vm518_vm0, %v6439_v40  ;;  %5540 = vmatpush3.bf16.xpose.msk.msra.mxu1 %vm5772_vm1, %v5990_v53  ;;  %v6467_v53 = vld [vmem:[%s5817_s30 + $0x1c8] sm:$0xff] }
  0xd9   : > { %5533 = vmatprep.subr.msk.bf16.mxu1 %vm5772_vm1, %v6032_v3  ;;  %4448 = vmatmul.mubr.msk.f32.gmra.mrb[62].mxu0 %vm518_vm0, %v6217_v54  ;;  %v474_v54 = vld [vmem:[%s5768_s27 + $0x320] sm:$0xff] }
  0xda   : > { %4449 = vmatprep.mubr.msk.f32.mxu0 %vm518_vm0, %v6222_v55 }
  0xdb   : > { %4592 = vmatmul.mubr.msk.f32.gmra.mrb[62].mxu1 %vm518_vm0, %v6439_v40 }
  0xdc   : > { %4593 = vmatprep.mubr.msk.f32.mxu1 %vm518_vm0, %v6453_v19 }
  0xdd   : > { %4450 = vmatmul.mubr.msk.f32.gmra.mrb[64].mxu0 %vm518_vm0, %v6222_v55  ;;  %v475_v55 = vld [vmem:[%s5768_s27 + $0x328] sm:$0xff] }
  0xde   : > { %4451 = vmatprep.mubr.msk.f32.mxu0 %vm518_vm0, %v6239_v56 }
  0xdf   : > { %4594 = vmatmul.mubr.msk.f32.gmra.mrb[64].mxu1 %vm518_vm0, %v6453_v19 }
  0xe0   : > { %4595 = vmatprep.mubr.msk.f32.mxu1 %vm518_vm0, %v6467_v53  ;;  %5541 = vmatpush3.bf16.xpose.msk.msra.mxu1 %vm5772_vm1, %v6032_v3  ;;  %v6495_v3 = vld [vmem:[%s5817_s30 + $0x1d8] sm:$0xff] }
  0xe1   : > { %5534 = vmatprep.subr.msk.bf16.mxu1 %vm5772_vm1, %v6076_v17  ;;  %4452 = vmatmul.mubr.msk.f32.gmra.mrb[66].mxu0 %vm518_vm0, %v6239_v56  ;;  %v6721_v56 = vld [vmem:[%s5817_s30 + $0x260] sm:$0xff] }
  0xe2   : > { %4453 = vmatprep.mubr.msk.f32.mxu0 %vm518_vm0, %v6244_v59 }
  0xe3   : > { %4596 = vmatmul.mubr.msk.f32.gmra.mrb[66].mxu1 %vm518_vm0, %v6467_v53 }
  0xe4   : > { %4597 = vmatprep.mubr.msk.f32.mxu1 %vm518_vm0, %v6481_v20 }
  0xe5   : > { %4454 = vmatmul.mubr.msk.f32.gmra.mrb[68].mxu0 %vm518_vm0, %v6244_v59  ;;  %v5448_v59 = vpack.c.bf16 %v475_v55, %v474_v54  ;;  %v483_v55 = vld [vmem:[%s5768_s27 + $0x368] sm:$0xff] }
  0xe6   : > { %4455 = vmatprep.mubr.msk.f32.mxu0 %vm518_vm0, %v6255_v61 }
  0xe7   : > { %4598 = vmatmul.mubr.msk.f32.gmra.mrb[68].mxu1 %vm518_vm0, %v6481_v20 }
  0xe8   : > { %4599 = vmatprep.mubr.msk.f32.mxu1 %vm518_vm0, %v6495_v3  ;;  %5542 = vmatpush3.bf16.xpose.msk.msra.mxu1 %vm5772_vm1, %v6076_v17  ;;  %v6523_v17 = vld [vmem:[%s5817_s30 + $0x1e8] sm:$0xff] }
  0xe9   : > { %5535 = vmatprep.subr.msk.bf16.mxu1 %vm5772_vm1, %v6122_v31  ;;  %4456 = vmatmul.mubr.msk.f32.gmra.mrb[70].mxu0 %vm518_vm0, %v6255_v61  ;;  %v5451_v61 = vpack.c.bf16 %v493_v58, %v492_v57  ;;  %v6869_v58 = vld [vmem:[%s5817_s30 + $0x2a0] sm:$0xff] }
  0xea   : > { %4457 = vmatprep.mubr.msk.f32.mxu0 %vm518_vm0, %v6260_v62 }
  0xeb   : > { %4600 = vmatmul.mubr.msk.f32.gmra.mrb[70].mxu1 %vm518_vm0, %v6495_v3 }
  0xec   : > { %4601 = vmatprep.mubr.msk.f32.mxu1 %vm518_vm0, %v6509_v21 }
  0xed   : > { %4458 = vmatmul.mubr.msk.f32.gmra.mrb[72].mxu0 %vm518_vm0, %v6260_v62  ;;  %v476_v62 = vld [vmem:[%s5768_s27 + $0x330] sm:$0xff] }
  0xee   : > { %4459 = vmatprep.mubr.msk.f32.mxu0 %vm518_vm0, %v6271_v63 }
  0xef   : > { %4602 = vmatmul.mubr.msk.f32.gmra.mrb[72].mxu1 %vm518_vm0, %v6509_v21 }
  0xf0   : > { %4603 = vmatprep.mubr.msk.f32.mxu1 %vm518_vm0, %v6523_v17  ;;  %5543 = vmatpush3.bf16.xpose.msk.msra.mxu1 %vm5772_vm1, %v6122_v31  ;;  %v6605_v31 = vld [vmem:[%s5817_s30 + $0x218] sm:$0xff] }
  0xf1   : > { %5536 = vmatprep.subr.msk.bf16.mxu1 %vm5772_vm1, %v6168_v45  ;;  %4460 = vmatmul.mubr.msk.f32.gmra.mrb[74].mxu0 %vm518_vm0, %v6271_v63  ;;  %v477_v63 = vld [vmem:[%s5768_s27 + $0x338] sm:$0xff] }
  0xf2   : > { %4461 = vmatprep.mubr.msk.f32.mxu0 %vm518_vm0, %v6274_v1 }
  0xf3   : > { %4604 = vmatmul.mubr.msk.f32.gmra.mrb[74].mxu1 %vm518_vm0, %v6523_v17 }
  0xf4   : > { %4605 = vmatprep.mubr.msk.f32.mxu1 %vm518_vm0, %v6537_v22 }
  0xf5   : > { %4462 = vmatmul.mubr.msk.f32.gmra.mrb[76].mxu0 %vm518_vm0, %v6274_v1 }
  0xf6   : > { %4463 = vmatprep.mubr.msk.f32.mxu0 %vm518_vm0, %v6285_v2 }
  0xf7   : > { %4606 = vmatmul.mubr.msk.f32.gmra.mrb[76].mxu1 %vm518_vm0, %v6537_v22 }
  0xf8   : > { %4607 = vmatprep.mubr.msk.f32.mxu1 %vm518_vm0, %v6551_v23  ;;  %5544 = vmatpush3.bf16.xpose.msk.msra.mxu1 %vm5772_vm1, %v6168_v45  ;;  %v472_v45 = vld [vmem:[%s5768_s27 + $0x310] sm:$0xff] }
  0xf9   : > { %4464 = vmatmul.mubr.msk.f32.gmra.mrb[78].mxu0 %vm518_vm0, %v6285_v2  ;;  %5483 = vmatprep.subr.msk.bf16.mxu1 %vm5772_vm1, %v6577_v28  ;;  %v5442_v50 = vpack.c.bf16 %v473_v46, %v472_v45  ;;  %v6753_v2 = vld [vmem:[%s5817_s30 + $0x270] sm:$0xff]  ;;  %v499_v45 = vld [vmem:[%s5768_s27 + $0x3e8] sm:$0xff] }
  0xfa   : > { %4465 = vmatprep.mubr.msk.f32.mxu0 %vm518_vm0, %v6288_v4 }
  0xfb   : > { %4608 = vmatmul.mubr.msk.f32.gmra.mrb[78].mxu1 %vm518_vm0, %v6551_v23 }
  0xfc   : > { %4609 = vmatprep.mubr.msk.f32.mxu1 %vm518_vm0, %v6565_v24 }
  0xfd   : > { %4466 = vmatmul.mubr.msk.f32.gmra.mrb[80].mxu0 %vm518_vm0, %v6288_v4 }
  0xfe   : > { %4467 = vmatprep.mubr.msk.f32.mxu0 %vm518_vm0, %v6299_v5 }
  0xff   : > { %4610 = vmatmul.mubr.msk.f32.gmra.mrb[80].mxu1 %vm518_vm0, %v6565_v24 }
 0x100   : > { %4611 = vmatprep.mubr.msk.f32.mxu1 %vm518_vm0, %v6580_v29 }
 0x101   : > { %4468 = vmatmul.mubr.msk.f32.gmra.mrb[82].mxu0 %vm518_vm0, %v6299_v5 }
 0x102   : > { %4469 = vmatprep.mubr.msk.f32.mxu0 %vm518_vm0, %v6302_v6 }
 0x103   : > { %4612 = vmatmul.mubr.msk.f32.gmra.mrb[82].mxu1 %vm518_vm0, %v6580_v29 }
 0x104   : > { %4613 = vmatprep.mubr.msk.f32.mxu1 %vm518_vm0, %v6594_v30 }
 0x105   : > { %4470 = vmatmul.mubr.msk.f32.gmra.mrb[84].mxu0 %vm518_vm0, %v6302_v6  ;;  %v494_v6 = vld [vmem:[%s5768_s27 + $0x3c0] sm:$0xff] }
 0x106   : > { %4471 = vmatprep.mubr.msk.f32.mxu0 %vm518_vm0, %v6313_v7 }
 0x107   : > { %4614 = vmatmul.mubr.msk.f32.gmra.mrb[84].mxu1 %vm518_vm0, %v6594_v30 }
 0x108   : > { %4615 = vmatprep.mubr.msk.f32.mxu1 %vm518_vm0, %v6605_v31 }
 0x109   : > { %4472 = vmatmul.mubr.msk.f32.gmra.mrb[86].mxu0 %vm518_vm0, %v6313_v7  ;;  %v495_v7 = vld [vmem:[%s5768_s27 + $0x3c8] sm:$0xff] }
 0x10a   : > { %4473 = vmatprep.mubr.msk.f32.mxu0 %vm518_vm0, %v6316_v8 }
 0x10b   : > { %4616 = vmatmul.mubr.msk.f32.gmra.mrb[86].mxu1 %vm518_vm0, %v6605_v31 }
 0x10c   : > { %4617 = vmatprep.mubr.msk.f32.mxu1 %vm518_vm0, %v6616_v32 }
 0x10d   : > { %4474 = vmatmul.mubr.msk.f32.gmra.mrb[88].mxu0 %vm518_vm0, %v6316_v8 }
 0x10e   : > { %4475 = vmatprep.mubr.msk.f32.mxu0 %vm518_vm0, %v6327_v9 }
 0x10f   : > { %4618 = vmatmul.mubr.msk.f32.gmra.mrb[88].mxu1 %vm518_vm0, %v6616_v32 }
 0x110   : > { %4619 = vmatprep.mubr.msk.f32.mxu1 %vm518_vm0, %v6627_v33 }
 0x111   : > { %4476 = vmatmul.mubr.msk.f32.gmra.mrb[90].mxu0 %vm518_vm0, %v6327_v9  ;;  %v5454_v9 = vpack.c.bf16 %v477_v63, %v476_v62  ;;  %v501_v62 = vld [vmem:[%s5768_s27 + $0x3f8] sm:$0xff] }
 0x112   : > { %4477 = vmatprep.mubr.msk.f32.mxu0 %vm518_vm0, %v6330_v10 }
 0x113   : > { %4620 = vmatmul.mubr.msk.f32.gmra.mrb[90].mxu1 %vm518_vm0, %v6627_v33 }
 0x114   : > { %4621 = vmatprep.mubr.msk.f32.mxu1 %vm518_vm0, %v6638_v34 }
 0x115   : > { %4478 = vmatmul.mubr.msk.f32.gmra.mrb[92].mxu0 %vm518_vm0, %v6330_v10 }
 0x116   : > { %4479 = vmatprep.mubr.msk.f32.mxu0 %vm518_vm0, %v6341_v11 }
 0x117   : > { %4622 = vmatmul.mubr.msk.f32.gmra.mrb[92].mxu1 %vm518_vm0, %v6638_v34 }
 0x118   : > { %4623 = vmatprep.mubr.msk.f32.mxu1 %vm518_vm0, %v6649_v35 }
 0x119   : > { %4480 = vmatmul.mubr.msk.f32.gmra.mrb[94].mxu0 %vm518_vm0, %v6341_v11  ;;  %v6774_v11 = vld [vmem:[%s5817_s30 + $0x278] sm:$0xff] }
 0x11a   : > { %5065 = vmatprep.mubr.msk.f32.mxu0 %vm518_vm0, %v6344_v12  ;;  %v5457_v12 = vpack.c.bf16 %v495_v7, %v494_v6 }
 0x11b   : > { %4624 = vmatmul.mubr.msk.f32.gmra.mrb[94].mxu1 %vm518_vm0, %v6649_v35 }
 0x11c   : > { %4625 = vmatprep.mubr.msk.f32.mxu1 %vm518_vm0, %v6662_v38 }
 0x11d   : > { %5066 = vmatmul.mubr.msk.f32.vlgmr.msra.gmra.mrb[96].mxu0 %vm518_vm0, %v6355_v13 }
 0x11e   : > { %5438 = vmatpush3.bf16.xpose.msk.msra.mxu0 %vm5772_vm1, %v5436_v42  ;;  %5068 = vmatprep.mubr.msk.f32.mxu0 %vm518_vm0, %v6369_v14 }
 0x11f   : > { %4626 = vmatmul.mubr.msk.f32.gmra.mrb[96].mxu1 %vm518_vm0, %v6662_v38  ;;  %5441 = vmatprep.subr.msk.bf16.mxu0 %vm5772_vm1, %v5439_v44 }
 0x120   : > { %4627 = vmatprep.mubr.msk.f32.mxu1 %vm518_vm0, %v6675_v43 }
 0x121   : > { %5069 = vmatmul.mubr.msk.f32.gmra.mrb[98].mxu0 %vm518_vm0, %v6383_v15 }
 0x122   : > { %5071 = vmatprep.mubr.msk.f32.mxu0 %vm518_vm0, %v6397_v16  ;;  %v478_v16 = vld [vmem:[%s5768_s27 + $0x340] sm:$0xff] }
 0x123   : > { %4628 = vmatmul.mubr.msk.f32.gmra.mrb[98].mxu1 %vm518_vm0, %v6675_v43 }
 0x124   : > { %4629 = vmatprep.mubr.msk.f32.mxu1 %vm518_vm0, %v6690_v47 }
 0x125   : > { %5072 = vmatmul.mubr.msk.f32.gmra.mrb[100].mxu0 %vm518_vm0, %v6411_v27  ;;  %v479_v27 = vld [vmem:[%s5768_s27 + $0x348] sm:$0xff] }
 0x126   : > { %5444 = vmatpush3.bf16.xpose.msk.msra.mxu0 %vm5772_vm1, %v5442_v50  ;;  %5074 = vmatprep.mubr.msk.f32.mxu0 %vm518_vm0, %v6425_v18 }
 0x127   : > { %4630 = vmatmul.mubr.msk.f32.gmra.mrb[100].mxu1 %vm518_vm0, %v6690_v47  ;;  %5447 = vmatprep.subr.msk.bf16.mxu0 %vm5772_vm1, %v5445_v52 }
 0x128   : > { %4631 = vmatprep.mubr.msk.f32.mxu1 %vm518_vm0, %v6705_v51 }
 0x129   : > { %5075 = vmatmul.mubr.msk.f32.gmra.mrb[102].mxu0 %vm518_vm0, %v6439_v40  ;;  %v6793_v40 = vld [vmem:[%s5817_s30 + $0x280] sm:$0xff] }
 0x12a   : > { %5077 = vmatprep.mubr.msk.f32.mxu0 %vm518_vm0, %v6453_v19 }
 0x12b   : > { %4632 = vmatmul.mubr.msk.f32.gmra.mrb[102].mxu1 %vm518_vm0, %v6705_v51 }
 0x12c   : > { %4633 = vmatprep.mubr.msk.f32.mxu1 %vm518_vm0, %v6721_v56 }
 0x12d   : > { %5078 = vmatmul.mubr.msk.f32.gmra.mrb[104].mxu0 %vm518_vm0, %v6467_v53 }
 0x12e   : > { %5450 = vmatpush3.bf16.xpose.msk.msra.mxu0 %vm5772_vm1, %v5448_v59  ;;  %5080 = vmatprep.mubr.msk.f32.mxu0 %vm518_vm0, %v6481_v20  ;;  %v496_v20 = vld [vmem:[%s5768_s27 + $0x3d0] sm:$0xff] }
 0x12f   : > { %4634 = vmatmul.mubr.msk.f32.gmra.mrb[104].mxu1 %vm518_vm0, %v6721_v56  ;;  %5453 = vmatprep.subr.msk.bf16.mxu0 %vm5772_vm1, %v5451_v61 }
 0x130   : > { %4635 = vmatprep.mubr.msk.f32.mxu1 %vm518_vm0, %v6738_v60  ;;  %v873_v1 = vpop.f32.mrb[0].mxu0 }
 0x131   : > { %3357 = vst [vmem:[%s6757_s5] sm:$0xff] %v873_v1  ;;  %v875_v4 = vpop.f32.mrb[1].mxu0  ;;  %5081 = vmatmul.mubr.msk.f32.gmra.mrb[106].mxu0 %vm518_vm0, %v6495_v3  ;;  %v497_v3 = vld [vmem:[%s5768_s27 + $0x3d8] sm:$0xff] }
 0x132   : > { %v4963_v5 = vpop.f32.mrb[0].mxu1  ;;  %3358 = vst [vmem:[%s6757_s5 + $0x8] sm:$0xff] %v875_v4  ;;  %5083 = vmatprep.mubr.msk.f32.mxu0 %vm518_vm0, %v6509_v21  ;;  %v5463_v25 = vpack.c.bf16 %v497_v3, %v496_v20  ;;  %v6888_v4 = vld [vmem:[%s5817_s30 + $0x2a8] sm:$0xff] }
 0x133   : > { %3362 = vst [vmem:[%s6757_s5 + $0x28] sm:$0xff] %v4963_v5  ;;  %v1226_v8 = vpop.f32.mrb[1].mxu1  ;;  %4636 = vmatmul.mubr.msk.f32.gmra.mrb[106].mxu1 %vm518_vm0, %v6738_v60  ;;  %v6959_v3 = vld [vmem:[%s5817_s30 + $0x308] sm:$0xff] }
 0x134   : > { %3359 = vst [vmem:[%s6757_s5 + $0x10] sm:$0xff] %v1226_v8  ;;  %4637 = vmatprep.mubr.msk.f32.mxu1 %vm518_vm0, %v6753_v2  ;;  %v879_v10 = vpop.f32.mrb[2].mxu0  ;;  %v485_v8 = vld [vmem:[%s5768_s27 + $0x378] sm:$0xff] }
 0x135   : > { %3360 = vst [vmem:[%s6757_s5 + $0x18] sm:$0xff] %v879_v10  ;;  %v881_v13 = vpop.f32.mrb[3].mxu0  ;;  %5084 = vmatmul.mubr.msk.f32.gmra.mrb[108].mxu0 %vm518_vm0, %v6523_v17  ;;  %v5460_v17 = vpack.c.bf16 %v479_v27, %v478_v16  ;;  %v6907_v10 = vld [vmem:[%s5817_s30 + $0x2b0] sm:$0xff] }
 0x136   : > { %v4966_v14 = vpop.f32.mrb[2].mxu1  ;;  %3361 = vst [vmem:[%s6757_s5 + $0x20] sm:$0xff] %v881_v13  ;;  %5456 = vmatpush3.bf16.xpose.msk.msra.mxu0 %vm5772_vm1, %v5454_v9  ;;  %5086 = vmatprep.mubr.msk.f32.mxu0 %vm518_vm0, %v6537_v22 }
 0x137   : > { %3368 = vst [vmem:[%s6757_s5 + $0x58] sm:$0xff] %v4966_v14  ;;  %v1236_v15 = vpop.f32.mrb[3].mxu1  ;;  %4638 = vmatmul.mubr.msk.f32.gmra.mrb[108].mxu1 %vm518_vm0, %v6753_v2  ;;  %5459 = vmatprep.subr.msk.bf16.mxu0 %vm5772_vm1, %v5457_v12 }
 0x138   : > { %3365 = vst [vmem:[%s6757_s5 + $0x40] sm:$0xff] %v1236_v15  ;;  %4639 = vmatprep.mubr.msk.f32.mxu1 %vm518_vm0, %v6774_v11  ;;  %v885_v18 = vpop.f32.mrb[4].mxu0 }
 0x139   : > { %3363 = vst [vmem:[%s6757_s5 + $0x30] sm:$0xff] %v885_v18  ;;  %v887_v19 = vpop.f32.mrb[5].mxu0  ;;  %5087 = vmatmul.mubr.msk.f32.gmra.mrb[110].mxu0 %vm518_vm0, %v6551_v23  ;;  %v6812_v23 = vld [vmem:[%s5817_s30 + $0x288] sm:$0xff] }
 0x13a   : > { %v4969_v53 = vpop.f32.mrb[4].mxu1  ;;  %3364 = vst [vmem:[%s6757_s5 + $0x38] sm:$0xff] %v887_v19  ;;  %5089 = vmatprep.mubr.msk.f32.mxu0 %vm518_vm0, %v6565_v24  ;;  %v6944_v19 = vld [vmem:[%s5817_s30 + $0x2c0] sm:$0xff] }
 0x13b   : > { %3374 = vst [vmem:[%s6757_s5 + $0x88] sm:$0xff] %v4969_v53  ;;  %v1246_v21 = vpop.f32.mrb[5].mxu1  ;;  %4640 = vmatmul.mubr.msk.f32.gmra.mrb[110].mxu1 %vm518_vm0, %v6774_v11 }
 0x13c   : > { %3371 = vst [vmem:[%s6757_s5 + $0x70] sm:$0xff] %v1246_v21  ;;  %4641 = vmatprep.mubr.msk.f32.mxu1 %vm518_vm0, %v6793_v40  ;;  %v891_v22 = vpop.f32.mrb[6].mxu0  ;;  %v6962_v21 = vld [vmem:[%s5817_s30 + $0x2c8] sm:$0xff] }
 0x13d   : > { %3366 = vst [vmem:[%s6757_s5 + $0x48] sm:$0xff] %v891_v22  ;;  %v893_v26 = vpop.f32.mrb[7].mxu0  ;;  %5090 = vmatmul.mubr.msk.f32.gmra.mrb[112].mxu0 %vm518_vm0, %v6580_v29  ;;  %v480_v29 = vld [vmem:[%s5768_s27 + $0x350] sm:$0xff] }
 0x13e   : > { %v4972_v36 = vpop.f32.mrb[6].mxu1  ;;  %3367 = vst [vmem:[%s6757_s5 + $0x50] sm:$0xff] %v893_v26  ;;  %5462 = vmatpush3.bf16.xpose.msk.msra.mxu0 %vm5772_vm1, %v5460_v17  ;;  %5092 = vmatprep.mubr.msk.f32.mxu0 %vm518_vm0, %v6594_v30  ;;  %v498_v30 = vld [vmem:[%s5768_s27 + $0x3e0] sm:$0xff]  ;;  %v5466_v48 = vpack.c.bf16 %v481_v37, %v480_v29  ;;  %v6977_v26 = vld [vmem:[%s5817_s30 + $0x310] sm:$0xff] }
 0x13f   : > { %3380 = vst [vmem:[%s6757_s5 + $0xb8] sm:$0xff] %v4972_v36  ;;  %v1256_v24 = vpop.f32.mrb[7].mxu1  ;;  %4642 = vmatmul.mubr.msk.f32.gmra.mrb[112].mxu1 %vm518_vm0, %v6793_v40  ;;  %5465 = vmatprep.subr.msk.bf16.mxu0 %vm5772_vm1, %v5463_v25  ;;  %v5469_v50 = vpack.c.bf16 %v499_v45, %v498_v30  ;;  %v6998_v30 = vld [vmem:[%s5817_s30 + $0x2d8] sm:$0xff] }
 0x140   : > { %3377 = vst [vmem:[%s6757_s5 + $0xa0] sm:$0xff] %v1256_v24  ;;  %4643 = vmatprep.mubr.msk.f32.mxu1 %vm518_vm0, %v6812_v23  ;;  %v897_v39 = vpop.f32.mrb[8].mxu0  ;;  %v6980_v24 = vld [vmem:[%s5817_s30 + $0x2d0] sm:$0xff] }
 0x141   : > { %3369 = vst [vmem:[%s6757_s5 + $0x60] sm:$0xff] %v897_v39  ;;  %v899_v42 = vpop.f32.mrb[9].mxu0  ;;  %5093 = vmatmul.mubr.msk.f32.gmra.mrb[114].mxu0 %vm518_vm0, %v6605_v31 }
 0x142   : > { %v4975_v44 = vpop.f32.mrb[8].mxu1  ;;  %3370 = vst [vmem:[%s6757_s5 + $0x68] sm:$0xff] %v899_v42  ;;  %5095 = vmatprep.mubr.msk.f32.mxu0 %vm518_vm0, %v6616_v32  ;;  %v6995_v42 = vld [vmem:[%s5817_s30 + $0x318] sm:$0xff] }
 0x143   : > { %3386 = vst [vmem:[%s6757_s5 + $0xe8] sm:$0xff] %v4975_v44  ;;  %v1266_v46 = vpop.f32.mrb[9].mxu1  ;;  %4644 = vmatmul.mubr.msk.f32.gmra.mrb[114].mxu1 %vm518_vm0, %v6812_v23 }
 0x144   : > { %3383 = vst [vmem:[%s6757_s5 + $0xd0] sm:$0xff] %v1266_v46  ;;  %4645 = vmatprep.mubr.msk.f32.mxu1 %vm518_vm0, %v6831_v41  ;;  %v903_v31 = vpop.f32.mrb[10].mxu0 }
 0x145   : > { %3372 = vst [vmem:[%s6757_s5 + $0x78] sm:$0xff] %v903_v31  ;;  %v905_v52 = vpop.f32.mrb[11].mxu0  ;;  %5096 = vmatmul.mubr.msk.f32.gmra.mrb[116].mxu0 %vm518_vm0, %v6627_v33  ;;  %v482_v33 = vld [vmem:[%s5768_s27 + $0x360] sm:$0xff] }
 0x146   : > { %v4978_v54 = vpop.f32.mrb[10].mxu1  ;;  %3373 = vst [vmem:[%s6757_s5 + $0x80] sm:$0xff] %v905_v52  ;;  %5468 = vmatpush3.bf16.xpose.msk.msra.mxu0 %vm5772_vm1, %v5466_v48  ;;  %5098 = vmatprep.mubr.msk.f32.mxu0 %vm518_vm0, %v6638_v34  ;;  %v500_v34 = vld [vmem:[%s5768_s27 + $0x3f0] sm:$0xff]  ;;  %v5472_v1 = vpack.c.bf16 %v483_v55, %v482_v33  ;;  %v7013_v31 = vld [vmem:[%s5817_s30 + $0x320] sm:$0xff]  ;;  %v7031_v55 = vld [vmem:[%s5817_s30 + $0x328] sm:$0xff] }
 0x147   : > { %3392 = vst [vmem:[%s6757_s5 + $0x118] sm:$0xff] %v4978_v54  ;;  %v1276_v32 = vpop.f32.mrb[11].mxu1  ;;  %4646 = vmatmul.mubr.msk.f32.gmra.mrb[116].mxu1 %vm518_vm0, %v6831_v41  ;;  %5471 = vmatprep.subr.msk.bf16.mxu0 %vm5772_vm1, %v5469_v50  ;;  %v5475_v5 = vpack.c.bf16 %v501_v62, %v500_v34  ;;  %v7016_v52 = vld [vmem:[%s5817_s30 + $0x2e0] sm:$0xff] }
 0x148   : > { %3389 = vst [vmem:[%s6757_s5 + $0x100] sm:$0xff] %v1276_v32  ;;  %4647 = vmatprep.mubr.msk.f32.mxu1 %vm518_vm0, %v6850_v49  ;;  %v909_v57 = vpop.f32.mrb[12].mxu0 }
 0x149   : > { %3375 = vst [vmem:[%s6757_s5 + $0x90] sm:$0xff] %v909_v57  ;;  %v911_v59 = vpop.f32.mrb[13].mxu0  ;;  %5099 = vmatmul.mubr.msk.f32.gmra.mrb[118].mxu0 %vm518_vm0, %v6649_v35 }
 0x14a   : > { %v4981_v61 = vpop.f32.mrb[12].mxu1  ;;  %3376 = vst [vmem:[%s6757_s5 + $0x98] sm:$0xff] %v911_v59  ;;  %5101 = vmatprep.mubr.msk.f32.mxu0 %vm518_vm0, %v6662_v38  ;;  %v7034_v59 = vld [vmem:[%s5817_s30 + $0x2e8] sm:$0xff] }
 0x14b   : > { %3398 = vst [vmem:[%s6757_s5 + $0x148] sm:$0xff] %v4981_v61  ;;  %v1286_v63 = vpop.f32.mrb[13].mxu1  ;;  %4648 = vmatmul.mubr.msk.f32.gmra.mrb[118].mxu1 %vm518_vm0, %v6850_v49 }
 0x14c   : > { %3395 = vst [vmem:[%s6757_s5 + $0x130] sm:$0xff] %v1286_v63  ;;  %4649 = vmatprep.mubr.msk.f32.mxu1 %vm518_vm0, %v6869_v58  ;;  %v915_v35 = vpop.f32.mrb[14].mxu0  ;;  %v7049_v63 = vld [vmem:[%s5817_s30 + $0x330] sm:$0xff] }
 0x14d   : > { %3378 = vst [vmem:[%s6757_s5 + $0xa8] sm:$0xff] %v915_v35  ;;  %v917_v6 = vpop.f32.mrb[15].mxu0  ;;  %5102 = vmatmul.mubr.msk.f32.gmra.mrb[120].mxu0 %vm518_vm0, %v6675_v43  ;;  %v484_v43 = vld [vmem:[%s5768_s27 + $0x370] sm:$0xff] }
 0x14e   : > { %v4984_v7 = vpop.f32.mrb[14].mxu1  ;;  %3379 = vst [vmem:[%s6757_s5 + $0xb0] sm:$0xff] %v917_v6  ;;  %5474 = vmatpush3.bf16.xpose.msk.msra.mxu0 %vm5772_vm1, %v5472_v1  ;;  %5104 = vmatprep.mubr.msk.f32.mxu0 %vm518_vm0, %v6690_v47  ;;  %v5478_v14 = vpack.c.bf16 %v485_v8, %v484_v43  ;;  %v7052_v35 = vld [vmem:[%s5817_s30 + $0x2f0] sm:$0xff]  ;;  %v7070_v8 = vld [vmem:[%s5817_s30 + $0x2f8] sm:$0xff] }
 0x14f   : > { %3404 = vst [vmem:[%s6757_s5 + $0x178] sm:$0xff] %v4984_v7  ;;  %v1296_v38 = vpop.f32.mrb[15].mxu1  ;;  %4650 = vmatmul.mubr.msk.f32.gmra.mrb[120].mxu1 %vm518_vm0, %v6869_v58  ;;  %5477 = vmatprep.subr.msk.bf16.mxu0 %vm5772_vm1, %v5475_v5 }
 0x150   : > { %3401 = vst [vmem:[%s6757_s5 + $0x160] sm:$0xff] %v1296_v38  ;;  %4651 = vmatprep.mubr.msk.f32.mxu1 %vm518_vm0, %v6888_v4  ;;  %v921_v9 = vpop.f32.mrb[16].mxu0  ;;  %v7067_v38 = vld [vmem:[%s5817_s30 + $0x338] sm:$0xff] }
 0x151   : > { %3381 = vst [vmem:[%s6757_s5 + $0xc0] sm:$0xff] %v921_v9  ;;  %v923_v12 = vpop.f32.mrb[17].mxu0  ;;  %5105 = vmatmul.mubr.msk.f32.gmra.mrb[122].mxu0 %vm518_vm0, %v6705_v51  ;;  %v6924_v51 = vld [vmem:[%s5817_s30 + $0x2b8] sm:$0xff] }
 0x152   : > { %v4987_v13 = vpop.f32.mrb[16].mxu1  ;;  %3382 = vst [vmem:[%s6757_s5 + $0xc8] sm:$0xff] %v923_v12  ;;  %5107 = vmatprep.mubr.msk.f32.mxu0 %vm518_vm0, %v6721_v56 }
 0x153   : > { %3410 = vst [vmem:[%s6757_s5 + $0x1a8] sm:$0xff] %v4987_v13  ;;  %v1306_v47 = vpop.f32.mrb[17].mxu1  ;;  %4652 = vmatmul.mubr.msk.f32.gmra.mrb[122].mxu1 %vm518_vm0, %v6888_v4 }
 0x154   : > { %3407 = vst [vmem:[%s6757_s5 + $0x190] sm:$0xff] %v1306_v47  ;;  %4653 = vmatprep.mubr.msk.f32.mxu1 %vm518_vm0, %v6907_v10  ;;  %v927_v15 = vpop.f32.mrb[18].mxu0  ;;  %v7085_v47 = vld [vmem:[%s5817_s30 + $0x340] sm:$0xff] }
 0x155   : > { %3384 = vst [vmem:[%s6757_s5 + $0xd8] sm:$0xff] %v927_v15  ;;  %v929_v16 = vpop.f32.mrb[19].mxu0  ;;  %5108 = vmatmul.mubr.msk.f32.gmra.mrb[124].mxu0 %vm518_vm0, %v6738_v60  ;;  %v6941_v60 = vld [vmem:[%s5817_s30 + $0x300] sm:$0xff] }
 0x156   : > { %v4990_v27 = vpop.f32.mrb[18].mxu1  ;;  %3385 = vst [vmem:[%s6757_s5 + $0xe0] sm:$0xff] %v929_v16  ;;  %5480 = vmatpush3.bf16.xpose.msk.msra.mxu0 %vm5772_vm1, %v5478_v14  ;;  %5110 = vmatprep.mubr.msk.f32.mxu0 %vm518_vm0, %v6753_v2 }
 0x157   : > { %3416 = vst [vmem:[%s6757_s5 + $0x1d8] sm:$0xff] %v4990_v27  ;;  %v1316_v56 = vpop.f32.mrb[19].mxu1  ;;  %4654 = vmatmul.mubr.msk.f32.gmra.mrb[124].mxu1 %vm518_vm0, %v6907_v10  ;;  %v504_v27 = vld [vmem:[%s5768_s27 + $0x410] sm:$0xff] }
 0x158   : > { %3413 = vst [vmem:[%s6757_s5 + $0x1c0] sm:$0xff] %v1316_v56  ;;  %4655 = vmatprep.mubr.msk.f32.mxu1 %vm518_vm0, %v6924_v51  ;;  %v933_v18 = vpop.f32.mrb[20].mxu0  ;;  %v505_v56 = vld [vmem:[%s5768_s27 + $0x418] sm:$0xff] }
 0x159   : > { %3387 = vst [vmem:[%s6757_s5 + $0xf0] sm:$0xff] %v933_v18  ;;  %v935_v53 = vpop.f32.mrb[21].mxu0  ;;  %5111 = vmatmul.mubr.msk.f32.gmra.mrb[126].mxu0 %vm518_vm0, %v6774_v11 }
 0x15a   : > { %v4993_v20 = vpop.f32.mrb[20].mxu1  ;;  %3388 = vst [vmem:[%s6757_s5 + $0xf8] sm:$0xff] %v935_v53  ;;  %4769 = vmatprep.mubr.msk.f32.mxu0 %vm518_vm0, %v6941_v60  ;;  %v7102_v53 = vld [vmem:[%s5817_s30 + $0x348] sm:$0xff] }
 0x15b   : > { %3422 = vst [vmem:[%s6757_s5 + $0x208] sm:$0xff] %v4993_v20  ;;  %v1326_v2 = vpop.f32.mrb[21].mxu1  ;;  %4656 = vmatmul.mubr.msk.f32.gmra.mrb[126].mxu1 %vm518_vm0, %v6924_v51 }
 0x15c   : > { %3419 = vst [vmem:[%s6757_s5 + $0x1f0] sm:$0xff] %v1326_v2  ;;  %4657 = vmatprep.mubr.msk.f32.mxu1 %vm518_vm0, %v6944_v19  ;;  %v939_v11 = vpop.f32.mrb[22].mxu0  ;;  %v5487_v2 = vpack.c.bf16 %v505_v56, %v504_v27  ;;  %v513_v56 = vld [vmem:[%s5768_s27 + $0x458] sm:$0xff] }
 0x15d   : > { %3390 = vst [vmem:[%s6757_s5 + $0x108] sm:$0xff] %v939_v11  ;;  %v941_v17 = vpop.f32.mrb[23].mxu0  ;;  %4770 = vmatmul.mubr.msk.f32.vlgmr.msra.gmra.mrb[128].mxu0 %vm518_vm0, %v6941_v60 }
 0x15e   : > { %v4996_v22 = vpop.f32.mrb[22].mxu1  ;;  %3391 = vst [vmem:[%s6757_s5 + $0x110] sm:$0xff] %v941_v17  ;;  %4771 = vmatprep.mubr.msk.f32.mxu0 %vm518_vm0, %v6959_v3 }
 0x15f   : > { %3428 = vst [vmem:[%s6757_s5 + $0x238] sm:$0xff] %v4996_v22  ;;  %v1336_v25 = vpop.f32.mrb[23].mxu1  ;;  %4658 = vmatmul.mubr.msk.f32.gmra.mrb[128].mxu1 %vm518_vm0, %v6944_v19 }
 0x160   : > { %3425 = vst [vmem:[%s6757_s5 + $0x220] sm:$0xff] %v1336_v25  ;;  %4659 = vmatprep.mubr.msk.f32.mxu1 %vm518_vm0, %v6962_v21  ;;  %v945_v36 = vpop.f32.mrb[24].mxu0 }
 0x161   : > { %3393 = vst [vmem:[%s6757_s5 + $0x120] sm:$0xff] %v945_v36  ;;  %v947_v29 = vpop.f32.mrb[25].mxu0  ;;  %4772 = vmatmul.mubr.msk.f32.gmra.mrb[130].mxu0 %vm518_vm0, %v6959_v3 }
 0x162   : > { %v4999_v37 = vpop.f32.mrb[24].mxu1  ;;  %3394 = vst [vmem:[%s6757_s5 + $0x128] sm:$0xff] %v947_v29  ;;  %4773 = vmatprep.mubr.msk.f32.mxu0 %vm518_vm0, %v6977_v26  ;;  %v506_v29 = vld [vmem:[%s5768_s27 + $0x420] sm:$0xff] }
 0x163   : > { %3434 = vst [vmem:[%s6757_s5 + $0x268] sm:$0xff] %v4999_v37  ;;  %v1346_v39 = vpop.f32.mrb[25].mxu1  ;;  %4660 = vmatmul.mubr.msk.f32.gmra.mrb[130].mxu1 %vm518_vm0, %v6962_v21 }
 0x164   : > { %3431 = vst [vmem:[%s6757_s5 + $0x250] sm:$0xff] %v1346_v39  ;;  %4661 = vmatprep.mubr.msk.f32.mxu1 %vm518_vm0, %v6980_v24  ;;  %v951_v44 = vpop.f32.mrb[26].mxu0 }
 0x165   : > { %3396 = vst [vmem:[%s6757_s5 + $0x138] sm:$0xff] %v951_v44  ;;  %v953_v45 = vpop.f32.mrb[27].mxu0  ;;  %4774 = vmatmul.mubr.msk.f32.gmra.mrb[132].mxu0 %vm518_vm0, %v6977_v26 }
 0x166   : > { %v5002_v46 = vpop.f32.mrb[26].mxu1  ;;  %3397 = vst [vmem:[%s6757_s5 + $0x140] sm:$0xff] %v953_v45  ;;  %4775 = vmatprep.mubr.msk.f32.mxu0 %vm518_vm0, %v6995_v42 }
 0x167   : > { %3440 = vst [vmem:[%s6757_s5 + $0x298] sm:$0xff] %v5002_v46  ;;  %v1356_v48 = vpop.f32.mrb[27].mxu1  ;;  %4662 = vmatmul.mubr.msk.f32.gmra.mrb[132].mxu1 %vm518_vm0, %v6980_v24 }
 0x168   : > { %3437 = vst [vmem:[%s6757_s5 + $0x280] sm:$0xff] %v1356_v48  ;;  %4663 = vmatprep.mubr.msk.f32.mxu1 %vm518_vm0, %v6998_v30  ;;  %v957_v50 = vpop.f32.mrb[28].mxu0 }
 0x169   : > { %3399 = vst [vmem:[%s6757_s5 + $0x150] sm:$0xff] %v957_v50  ;;  %v959_v54 = vpop.f32.mrb[29].mxu0  ;;  %4776 = vmatmul.mubr.msk.f32.gmra.mrb[134].mxu0 %vm518_vm0, %v6995_v42 }
 0x16a   : > { %v5005_v32 = vpop.f32.mrb[28].mxu1  ;;  %3400 = vst [vmem:[%s6757_s5 + $0x158] sm:$0xff] %v959_v54  ;;  %4777 = vmatprep.mubr.msk.f32.mxu0 %vm518_vm0, %v7013_v31 }
 0x16b   : > { %3446 = vst [vmem:[%s6757_s5 + $0x2c8] sm:$0xff] %v5005_v32  ;;  %v1366_v33 = vpop.f32.mrb[29].mxu1  ;;  %4664 = vmatmul.mubr.msk.f32.gmra.mrb[134].mxu1 %vm518_vm0, %v6998_v30  ;;  %v509_v32 = vld [vmem:[%s5768_s27 + $0x438] sm:$0xff] }
 0x16c   : > { %3443 = vst [vmem:[%s6757_s5 + $0x2b0] sm:$0xff] %v1366_v33  ;;  %4665 = vmatprep.mubr.msk.f32.mxu1 %vm518_vm0, %v7016_v52  ;;  %v963_v57 = vpop.f32.mrb[30].mxu0 }
 0x16d   : > { %3402 = vst [vmem:[%s6757_s5 + $0x168] sm:$0xff] %v963_v57  ;;  %v965_v61 = vpop.f32.mrb[31].mxu0  ;;  %4778 = vmatmul.mubr.msk.f32.gmra.mrb[136].mxu0 %vm518_vm0, %v7013_v31 }
 0x16e   : > { %v5008_v34 = vpop.f32.mrb[30].mxu1  ;;  %3403 = vst [vmem:[%s6757_s5 + $0x170] sm:$0xff] %v965_v61  ;;  %4779 = vmatprep.mubr.msk.f32.mxu0 %vm518_vm0, %v7031_v55 }
 0x16f   : > { %3452 = vst [vmem:[%s6757_s5 + $0x2f8] sm:$0xff] %v5008_v34  ;;  %v1376_v62 = vpop.f32.mrb[31].mxu1  ;;  %4666 = vmatmul.mubr.msk.f32.gmra.mrb[136].mxu1 %vm518_vm0, %v7016_v52 }
 0x170   : > { %3449 = vst [vmem:[%s6757_s5 + $0x2e0] sm:$0xff] %v1376_v62  ;;  %4667 = vmatprep.mubr.msk.f32.mxu1 %vm518_vm0, %v7034_v59  ;;  %v969_v1 = vpop.f32.mrb[32].mxu0 }
 0x171   : > { %3405 = vst [vmem:[%s6757_s5 + $0x180] sm:$0xff] %v969_v1  ;;  %v971_v5 = vpop.f32.mrb[33].mxu0  ;;  %4780 = vmatmul.mubr.msk.f32.gmra.mrb[138].mxu0 %vm518_vm0, %v7031_v55 }
 0x172   : > { %v5011_v6 = vpop.f32.mrb[32].mxu1  ;;  %3406 = vst [vmem:[%s6757_s5 + $0x188] sm:$0xff] %v971_v5  ;;  %4781 = vmatprep.mubr.msk.f32.mxu0 %vm518_vm0, %v7049_v63 }
 0x173   : > { %3458 = vst [vmem:[%s6757_s5 + $0x328] sm:$0xff] %v5011_v6  ;;  %v1386_v7 = vpop.f32.mrb[33].mxu1  ;;  %4668 = vmatmul.mubr.msk.f32.gmra.mrb[138].mxu1 %vm518_vm0, %v7034_v59 }
 0x174   : > { %3455 = vst [vmem:[%s6757_s5 + $0x310] sm:$0xff] %v1386_v7  ;;  %4669 = vmatprep.mubr.msk.f32.mxu1 %vm518_vm0, %v7052_v35  ;;  %v975_v43 = vpop.f32.mrb[34].mxu0  ;;  %v511_v7 = vld [vmem:[%s5768_s27 + $0x448] sm:$0xff] }
 0x175   : > { %3408 = vst [vmem:[%s6757_s5 + $0x198] sm:$0xff] %v975_v43  ;;  %v977_v9 = vpop.f32.mrb[35].mxu0  ;;  %4782 = vmatmul.mubr.msk.f32.gmra.mrb[140].mxu0 %vm518_vm0, %v7049_v63 }
 0x176   : > { %v5014_v12 = vpop.f32.mrb[34].mxu1  ;;  %3409 = vst [vmem:[%s6757_s5 + $0x1a0] sm:$0xff] %v977_v9  ;;  %4783 = vmatprep.mubr.msk.f32.mxu0 %vm518_vm0, %v7067_v38 }
 0x177   : > { %3464 = vst [vmem:[%s6757_s5 + $0x358] sm:$0xff] %v5014_v12  ;;  %v1396_v13 = vpop.f32.mrb[35].mxu1  ;;  %4670 = vmatmul.mubr.msk.f32.gmra.mrb[140].mxu1 %vm518_vm0, %v7052_v35 }
 0x178   : > { %3461 = vst [vmem:[%s6757_s5 + $0x340] sm:$0xff] %v1396_v13  ;;  %4671 = vmatprep.mubr.msk.f32.mxu1 %vm518_vm0, %v7070_v8  ;;  %v981_v14 = vpop.f32.mrb[36].mxu0 }
 0x179   : > { %3411 = vst [vmem:[%s6757_s5 + $0x1b0] sm:$0xff] %v981_v14  ;;  %v983_v15 = vpop.f32.mrb[37].mxu0  ;;  %4784 = vmatmul.mubr.msk.f32.gmra.mrb[142].mxu0 %vm518_vm0, %v7067_v38 }
 0x17a   : > { %v5017_v16 = vpop.f32.mrb[36].mxu1  ;;  %3412 = vst [vmem:[%s6757_s5 + $0x1b8] sm:$0xff] %v983_v15  ;;  %4785 = vmatprep.mubr.msk.f32.mxu0 %vm518_vm0, %v7085_v47 }
 0x17b   : > { %3470 = vst [vmem:[%s6757_s5 + $0x388] sm:$0xff] %v5017_v16  ;;  %v1406_v18 = vpop.f32.mrb[37].mxu1  ;;  %4672 = vmatmul.mubr.msk.f32.gmra.mrb[142].mxu1 %vm518_vm0, %v7070_v8 }
 0x17c   : > { %3467 = vst [vmem:[%s6757_s5 + $0x370] sm:$0xff] %v1406_v18  ;;  %5113 = vmatprep.mubr.msk.f32.mxu1 %vm518_vm0, %v6793_v40  ;;  %v987_v20 = vpop.f32.mrb[38].mxu0  ;;  %v7118_v40 = vld [vmem:[%s5817_s30 + $0x350] sm:$0xff] }
 0x17d   : > { %3414 = vst [vmem:[%s6757_s5 + $0x1c8] sm:$0xff] %v987_v20  ;;  %v989_v11 = vpop.f32.mrb[39].mxu0  ;;  %4786 = vmatmul.mubr.msk.f32.gmra.mrb[144].mxu0 %vm518_vm0, %v7085_v47 }
 0x17e   : > { %v5020_v17 = vpop.f32.mrb[38].mxu1  ;;  %3415 = vst [vmem:[%s6757_s5 + $0x1d0] sm:$0xff] %v989_v11  ;;  %4787 = vmatprep.mubr.msk.f32.mxu0 %vm518_vm0, %v7102_v53 }
 0x17f   : > { %3476 = vst [vmem:[%s6757_s5 + $0x3b8] sm:$0xff] %v5020_v17  ;;  %v1416_v22 = vpop.f32.mrb[39].mxu1  ;;  %5114 = vmatmul.mubr.msk.f32.vlgmr.msra.gmra.mrb[144].mxu1 %vm518_vm0, %v6812_v23 }
 0x180   : > { %3473 = vst [vmem:[%s6757_s5 + $0x3a0] sm:$0xff] %v1416_v22  ;;  %5486 = vmatpush3.bf16.xpose.msk.msra.mxu1 %vm5772_vm1, %v6577_v28  ;;  %5116 = vmatprep.mubr.msk.f32.mxu1 %vm518_vm0, %v6831_v41  ;;  %v993_v25 = vpop.f32.mrb[40].mxu0  ;;  %v507_v28 = vld [vmem:[%s5768_s27 + $0x428] sm:$0xff]  ;;  %v7137_v41 = vld [vmem:[%s5817_s30 + $0x358] sm:$0xff] }
 0x181   : > { %5489 = vmatprep.subr.msk.bf16.mxu1 %vm5772_vm1, %v5487_v2  ;;  %3417 = vst [vmem:[%s6757_s5 + $0x1e0] sm:$0xff] %v993_v25  ;;  %v995_v23 = vpop.f32.mrb[41].mxu0  ;;  %4788 = vmatmul.mubr.msk.f32.gmra.mrb[146].mxu0 %vm518_vm0, %v7102_v53  ;;  %v5493_v44 = vpack.c.bf16 %v507_v28, %v506_v29  ;;  %v515_v29 = vld [vmem:[%s5768_s27 + $0x468] sm:$0xff] }
 0x182   : > { %v5023_v36 = vpop.f32.mrb[40].mxu1  ;;  %3418 = vst [vmem:[%s6757_s5 + $0x1e8] sm:$0xff] %v995_v23  ;;  %4789 = vmatprep.mubr.msk.f32.mxu0 %vm518_vm0, %v7118_v40 }
 0x183   : > { %3482 = vst [vmem:[%s6757_s5 + $0x3e8] sm:$0xff] %v5023_v36  ;;  %v1426_v37 = vpop.f32.mrb[41].mxu1  ;;  %5117 = vmatmul.mubr.msk.f32.gmra.mrb[146].mxu1 %vm518_vm0, %v6850_v49  ;;  %v514_v36 = vld [vmem:[%s5768_s27 + $0x460] sm:$0xff] }
 0x184   : > { %3479 = vst [vmem:[%s6757_s5 + $0x3d0] sm:$0xff] %v1426_v37  ;;  %5119 = vmatprep.mubr.msk.f32.mxu1 %vm518_vm0, %v6869_v58  ;;  %v999_v39 = vpop.f32.mrb[42].mxu0  ;;  %v7154_v58 = vld [vmem:[%s5817_s30 + $0x360] sm:$0xff]  ;;  %v7275_v37 = vld [vmem:[%s5817_s30 + $0x398] sm:$0xff] }
 0x185   : > { %3420 = vst [vmem:[%s6757_s5 + $0x1f8] sm:$0xff] %v999_v39  ;;  %v1001_v45 = vpop.f32.mrb[43].mxu0  ;;  %4790 = vmatmul.mubr.msk.f32.gmra.mrb[148].mxu0 %vm518_vm0, %v7118_v40 }
 0x186   : > { %v5026_v46 = vpop.f32.mrb[42].mxu1  ;;  %3421 = vst [vmem:[%s6757_s5 + $0x200] sm:$0xff] %v1001_v45  ;;  %4791 = vmatprep.mubr.msk.f32.mxu0 %vm518_vm0, %v7137_v41 }
 0x187   : > { %3488 = vst [vmem:[%s6757_s5 + $0x418] sm:$0xff] %v5026_v46  ;;  %v1436_v49 = vpop.f32.mrb[43].mxu1  ;;  %5120 = vmatmul.mubr.msk.f32.gmra.mrb[148].mxu1 %vm518_vm0, %v6888_v4  ;;  %v508_v4 = vld [vmem:[%s5768_s27 + $0x430] sm:$0xff] }
 0x188   : > { %3485 = vst [vmem:[%s6757_s5 + $0x400] sm:$0xff] %v1436_v49  ;;  %5492 = vmatpush3.bf16.xpose.msk.msra.mxu1 %vm5772_vm1, %v5487_v2  ;;  %5122 = vmatprep.mubr.msk.f32.mxu1 %vm518_vm0, %v6907_v10  ;;  %v1005_v48 = vpop.f32.mrb[44].mxu0  ;;  %v7173_v10 = vld [vmem:[%s5817_s30 + $0x368] sm:$0xff]  ;;  %v5499_v61 = vpack.c.bf16 %v509_v32, %v508_v4  ;;  %v516_v32 = vld [vmem:[%s5768_s27 + $0x470] sm:$0xff] }
 0x189   : > { %5495 = vmatprep.subr.msk.bf16.mxu1 %vm5772_vm1, %v5493_v44  ;;  %3423 = vst [vmem:[%s6757_s5 + $0x210] sm:$0xff] %v1005_v48  ;;  %v1007_v50 = vpop.f32.mrb[45].mxu0  ;;  %4792 = vmatmul.mubr.msk.f32.gmra.mrb[150].mxu0 %vm518_vm0, %v7137_v41  ;;  %v7288_v48 = vld [vmem:[%s5817_s30 + $0x3a0] sm:$0xff] }
 0x18a   : > { %v5029_v54 = vpop.f32.mrb[44].mxu1  ;;  %3424 = vst [vmem:[%s6757_s5 + $0x218] sm:$0xff] %v1007_v50  ;;  %4793 = vmatprep.mubr.msk.f32.mxu0 %vm518_vm0, %v7154_v58 }
 0x18b   : > { %3494 = vst [vmem:[%s6757_s5 + $0x448] sm:$0xff] %v5029_v54  ;;  %v1446_v33 = vpop.f32.mrb[45].mxu1  ;;  %5123 = vmatmul.mubr.msk.f32.gmra.mrb[150].mxu1 %vm518_vm0, %v6924_v51 }
 0x18c   : > { %3491 = vst [vmem:[%s6757_s5 + $0x430] sm:$0xff] %v1446_v33  ;;  %5125 = vmatprep.mubr.msk.f32.mxu1 %vm518_vm0, %v6944_v19  ;;  %v1011_v57 = vpop.f32.mrb[46].mxu0  ;;  %v7190_v19 = vld [vmem:[%s5817_s30 + $0x370] sm:$0xff]  ;;  %v517_v33 = vld [vmem:[%s5768_s27 + $0x478] sm:$0xff] }
 0x18d   : > { %3426 = vst [vmem:[%s6757_s5 + $0x228] sm:$0xff] %v1011_v57  ;;  %v1013_v34 = vpop.f32.mrb[47].mxu0  ;;  %4794 = vmatmul.mubr.msk.f32.gmra.mrb[152].mxu0 %vm518_vm0, %v7154_v58 }
 0x18e   : > { %v5032_v62 = vpop.f32.mrb[46].mxu1  ;;  %3427 = vst [vmem:[%s6757_s5 + $0x230] sm:$0xff] %v1013_v34  ;;  %4795 = vmatprep.mubr.msk.f32.mxu0 %vm518_vm0, %v7173_v10 }
 0x18f   : > { %3500 = vst [vmem:[%s6757_s5 + $0x478] sm:$0xff] %v5032_v62  ;;  %v1456_v51 = vpop.f32.mrb[47].mxu1  ;;  %5126 = vmatmul.mubr.msk.f32.gmra.mrb[152].mxu1 %vm518_vm0, %v6962_v21  ;;  %v510_v21 = vld [vmem:[%s5768_s27 + $0x440] sm:$0xff]  ;;  %v5523_v62 = vpack.c.bf16 %v517_v33, %v516_v32 }
 0x190   : > { %3497 = vst [vmem:[%s6757_s5 + $0x460] sm:$0xff] %v1456_v51  ;;  %5498 = vmatpush3.bf16.xpose.msk.msra.mxu1 %vm5772_vm1, %v5493_v44  ;;  %5128 = vmatprep.mubr.msk.f32.mxu1 %vm518_vm0, %v6980_v24  ;;  %v1017_v1 = vpop.f32.mrb[48].mxu0  ;;  %v7209_v24 = vld [vmem:[%s5817_s30 + $0x378] sm:$0xff]  ;;  %v5505_v12 = vpack.c.bf16 %v511_v7, %v510_v21  ;;  %v5517_v44 = vpack.c.bf16 %v515_v29, %v514_v36 }
 0x191   : > { %5501 = vmatprep.subr.msk.bf16.mxu1 %vm5772_vm1, %v5499_v61  ;;  %3429 = vst [vmem:[%s6757_s5 + $0x240] sm:$0xff] %v1017_v1  ;;  %v1019_v5 = vpop.f32.mrb[49].mxu0  ;;  %4796 = vmatmul.mubr.msk.f32.gmra.mrb[154].mxu0 %vm518_vm0, %v7173_v10 }
 0x192   : > { %v1819_v6 = vpop.f32.mrb[48].mxu1  ;;  %3430 = vst [vmem:[%s6757_s5 + $0x248] sm:$0xff] %v1019_v5  ;;  %4797 = vmatprep.mubr.msk.f32.mxu0 %vm518_vm0, %v7190_v19 }
 0x193   : > { %3501 = vst [vmem:[%s6757_s5 + $0x480] sm:$0xff] %v1819_v6  ;;  %v1821_v43 = vpop.f32.mrb[49].mxu1  ;;  %5129 = vmatmul.mubr.msk.f32.gmra.mrb[154].mxu1 %vm518_vm0, %v6998_v30  ;;  %v7316_v6 = vld [vmem:[%s5817_s30 + $0x3b0] sm:$0xff] }
 0x194   : > { %3502 = vst [vmem:[%s6757_s5 + $0x488] sm:$0xff] %v1821_v43  ;;  %5131 = vmatprep.mubr.msk.f32.mxu1 %vm518_vm0, %v7016_v52  ;;  %v1023_v9 = vpop.f32.mrb[50].mxu0  ;;  %v7226_v52 = vld [vmem:[%s5817_s30 + $0x380] sm:$0xff] }
 0x195   : > { %3432 = vst [vmem:[%s6757_s5 + $0x258] sm:$0xff] %v1023_v9  ;;  %v1025_v13 = vpop.f32.mrb[51].mxu0  ;;  %4798 = vmatmul.mubr.msk.f32.gmra.mrb[156].mxu0 %vm518_vm0, %v7190_v19 }
 0x196   : > { %v1825_v14 = vpop.f32.mrb[50].mxu1  ;;  %3433 = vst [vmem:[%s6757_s5 + $0x260] sm:$0xff] %v1025_v13  ;;  %4799 = vmatprep.mubr.msk.f32.mxu0 %vm518_vm0, %v7209_v24 }
 0x197   : > { %3504 = vst [vmem:[%s6757_s5 + $0x498] sm:$0xff] %v1825_v14  ;;  %v1827_v30 = vpop.f32.mrb[51].mxu1  ;;  %5132 = vmatmul.mubr.msk.f32.gmra.mrb[156].mxu1 %vm518_vm0, %v7034_v59  ;;  %v512_v59 = vld [vmem:[%s5768_s27 + $0x450] sm:$0xff] }
 0x198   : > { %3505 = vst [vmem:[%s6757_s5 + $0x4a0] sm:$0xff] %v1827_v30  ;;  %5504 = vmatpush3.bf16.xpose.msk.msra.mxu1 %vm5772_vm1, %v5499_v61  ;;  %5134 = vmatprep.mubr.msk.f32.mxu1 %vm518_vm0, %v7052_v35  ;;  %v1029_v15 = vpop.f32.mrb[52].mxu0  ;;  %v7245_v35 = vld [vmem:[%s5817_s30 + $0x388] sm:$0xff]  ;;  %v5511_v2 = vpack.c.bf16 %v513_v56, %v512_v59 }
 0x199   : > { %5507 = vmatprep.subr.msk.bf16.mxu1 %vm5772_vm1, %v5505_v12  ;;  %3435 = vst [vmem:[%s6757_s5 + $0x270] sm:$0xff] %v1029_v15  ;;  %v1031_v16 = vpop.f32.mrb[53].mxu0  ;;  %4800 = vmatmul.mubr.msk.f32.gmra.mrb[158].mxu0 %vm518_vm0, %v7209_v24  ;;  %v7303_v61 = vld [vmem:[%s5817_s30 + $0x3a8] sm:$0xff] }
 0x19a   : > { %v1831_v27 = vpop.f32.mrb[52].mxu1  ;;  %3436 = vst [vmem:[%s6757_s5 + $0x278] sm:$0xff] %v1031_v16  ;;  %4801 = vmatprep.mubr.msk.f32.mxu0 %vm518_vm0, %v7226_v52  ;;  %v7342_v16 = vld [vmem:[%s5817_s30 + $0x3c0] sm:$0xff] }
 0x19b   : > { %3507 = vst [vmem:[%s6757_s5 + $0x4b0] sm:$0xff] %v1831_v27  ;;  %v1833_v18 = vpop.f32.mrb[53].mxu1  ;;  %5135 = vmatmul.mubr.msk.f32.gmra.mrb[158].mxu1 %vm518_vm0, %v7070_v8 }
 0x19c   : > { %3508 = vst [vmem:[%s6757_s5 + $0x4b8] sm:$0xff] %v1833_v18  ;;  %5169 = vmatprep.mubr.msk.f32.mxu1 %vm518_vm0, %v6941_v60  ;;  %v1035_v20 = vpop.f32.mrb[54].mxu0  ;;  %v7260_v60 = vld [vmem:[%s5817_s30 + $0x390] sm:$0xff] }
 0x19d   : > { %3438 = vst [vmem:[%s6757_s5 + $0x288] sm:$0xff] %v1035_v20  ;;  %v1037_v11 = vpop.f32.mrb[55].mxu0  ;;  %4802 = vmatmul.mubr.msk.f32.gmra.mrb[160].mxu0 %vm518_vm0, %v7226_v52 }
 0x19e   : > { %v1837_v17 = vpop.f32.mrb[54].mxu1  ;;  %3439 = vst [vmem:[%s6757_s5 + $0x290] sm:$0xff] %v1037_v11  ;;  %4803 = vmatprep.mubr.msk.f32.mxu0 %vm518_vm0, %v7245_v35 }
 0x19f   : > { %3510 = vst [vmem:[%s6757_s5 + $0x4c8] sm:$0xff] %v1837_v17  ;;  %v1839_v8 = vpop.f32.mrb[55].mxu1 }
 0x1a0   : > { %3511 = vst [vmem:[%s6757_s5 + $0x4d0] sm:$0xff] %v1839_v8  ;;  %5510 = vmatpush3.bf16.xpose.msk.msra.mxu1 %vm5772_vm1, %v5505_v12  ;;  %v1041_v22 = vpop.f32.mrb[56].mxu0  ;;  %v7329_v12 = vld [vmem:[%s5817_s30 + $0x3b8] sm:$0xff]  ;;  %v7368_v8 = vld [vmem:[%s5817_s30 + $0x3d0] sm:$0xff] }
 0x1a1   : > { %5513 = vmatprep.subr.msk.bf16.mxu1 %vm5772_vm1, %v5511_v2  ;;  %3441 = vst [vmem:[%s6757_s5 + $0x2a0] sm:$0xff] %v1041_v22  ;;  %v1043_v25 = vpop.f32.mrb[57].mxu0  ;;  %4804 = vmatmul.mubr.msk.f32.gmra.mrb[162].mxu0 %vm518_vm0, %v7245_v35 }
 0x1a2   : > { %v1843_v23 = vpop.f32.mrb[56].mxu1  ;;  %3442 = vst [vmem:[%s6757_s5 + $0x2a8] sm:$0xff] %v1043_v25  ;;  %4805 = vmatprep.mubr.msk.f32.mxu0 %vm518_vm0, %v7260_v60 }
 0x1a3   : > { %3513 = vst [vmem:[%s6757_s5 + $0x4e0] sm:$0xff] %v1843_v23  ;;  %v1845_v28 = vpop.f32.mrb[57].mxu1 }
 0x1a4   : > { %3514 = vst [vmem:[%s6757_s5 + $0x4e8] sm:$0xff] %v1845_v28  ;;  %v1047_v39 = vpop.f32.mrb[58].mxu0 }
 0x1a5   : > { %3444 = vst [vmem:[%s6757_s5 + $0x2b8] sm:$0xff] %v1047_v39  ;;  %v1049_v45 = vpop.f32.mrb[59].mxu0  ;;  %4806 = vmatmul.mubr.msk.f32.gmra.mrb[164].mxu0 %vm518_vm0, %v7260_v60 }
 0x1a6   : > { %v1849_v46 = vpop.f32.mrb[58].mxu1  ;;  %3445 = vst [vmem:[%s6757_s5 + $0x2c0] sm:$0xff] %v1049_v45  ;;  %4807 = vmatprep.mubr.msk.f32.mxu0 %vm518_vm0, %v7275_v37 }
 0x1a7   : > { %3516 = vst [vmem:[%s6757_s5 + $0x4f8] sm:$0xff] %v1849_v46  ;;  %v1851_v49 = vpop.f32.mrb[59].mxu1 }
 0x1a8   : > { %3517 = vst [vmem:[%s6757_s5 + $0x500] sm:$0xff] %v1851_v49  ;;  %5516 = vmatpush3.bf16.xpose.msk.msra.mxu1 %vm5772_vm1, %v5511_v2  ;;  %v1053_v50 = vpop.f32.mrb[60].mxu0 }
 0x1a9   : > { %5519 = vmatprep.subr.msk.bf16.mxu1 %vm5772_vm1, %v5517_v44  ;;  %3447 = vst [vmem:[%s6757_s5 + $0x2d0] sm:$0xff] %v1053_v50  ;;  %v1055_v54 = vpop.f32.mrb[61].mxu0  ;;  %4808 = vmatmul.mubr.msk.f32.gmra.mrb[166].mxu0 %vm518_vm0, %v7275_v37 }
 0x1aa   : > { %v1855_v4 = vpop.f32.mrb[60].mxu1  ;;  %3448 = vst [vmem:[%s6757_s5 + $0x2d8] sm:$0xff] %v1055_v54  ;;  %4809 = vmatprep.mubr.msk.f32.mxu0 %vm518_vm0, %v7288_v48 }
 0x1ab   : > { %3519 = vst [vmem:[%s6757_s5 + $0x510] sm:$0xff] %v1855_v4  ;;  %v1857_v57 = vpop.f32.mrb[61].mxu1 }
 0x1ac   : > { %3520 = vst [vmem:[%s6757_s5 + $0x518] sm:$0xff] %v1857_v57  ;;  %v1059_v34 = vpop.f32.mrb[62].mxu0 }
 0x1ad   : > { %3450 = vst [vmem:[%s6757_s5 + $0x2e8] sm:$0xff] %v1059_v34  ;;  %v1061_v51 = vpop.f32.mrb[63].mxu0  ;;  %4810 = vmatmul.mubr.msk.f32.gmra.mrb[168].mxu0 %vm518_vm0, %v7288_v48 }
 0x1ae   : > { %v1861_v1 = vpop.f32.mrb[62].mxu1  ;;  %3451 = vst [vmem:[%s6757_s5 + $0x2f0] sm:$0xff] %v1061_v51  ;;  %4811 = vmatprep.mubr.msk.f32.mxu0 %vm518_vm0, %v7303_v61 }
 0x1af   : > { %3522 = vst [vmem:[%s6757_s5 + $0x528] sm:$0xff] %v1861_v1  ;;  %v1863_v5 = vpop.f32.mrb[63].mxu1 }
 0x1b0   : > { %3523 = vst [vmem:[%s6757_s5 + $0x530] sm:$0xff] %v1863_v5  ;;  %5522 = vmatpush3.bf16.xpose.msk.msra.mxu1 %vm5772_vm1, %v5517_v44  ;;  %v1065_v21 = vpop.f32.mrb[64].mxu0 }
 0x1b1   : > { %5525 = vmatprep.subr.msk.bf16.mxu1 %vm5772_vm1, %v5523_v62  ;;  %3453 = vst [vmem:[%s6757_s5 + $0x300] sm:$0xff] %v1065_v21  ;;  %v1067_v7 = vpop.f32.mrb[65].mxu0  ;;  %4812 = vmatmul.mubr.msk.f32.gmra.mrb[170].mxu0 %vm518_vm0, %v7303_v61 }
 0x1b2   : > { %v1867_v43 = vpop.f32.mrb[64].mxu1  ;;  %3454 = vst [vmem:[%s6757_s5 + $0x308] sm:$0xff] %v1067_v7  ;;  %4813 = vmatprep.mubr.msk.f32.mxu0 %vm518_vm0, %v7316_v6 }
 0x1b3   : > { %3525 = vst [vmem:[%s6757_s5 + $0x540] sm:$0xff] %v1867_v43  ;;  %v1869_v9 = vpop.f32.mrb[65].mxu1 }
 0x1b4   : > { %3526 = vst [vmem:[%s6757_s5 + $0x548] sm:$0xff] %v1869_v9  ;;  %v1071_v13 = vpop.f32.mrb[66].mxu0 }
 0x1b5   : > { %3456 = vst [vmem:[%s6757_s5 + $0x318] sm:$0xff] %v1071_v13  ;;  %v1073_v14 = vpop.f32.mrb[67].mxu0  ;;  %4814 = vmatmul.mubr.msk.f32.gmra.mrb[172].mxu0 %vm518_vm0, %v7316_v6 }
 0x1b6   : > { %v1873_v30 = vpop.f32.mrb[66].mxu1  ;;  %3457 = vst [vmem:[%s6757_s5 + $0x320] sm:$0xff] %v1073_v14  ;;  %4815 = vmatprep.mubr.msk.f32.mxu0 %vm518_vm0, %v7329_v12 }
 0x1b7   : > { %3528 = vst [vmem:[%s6757_s5 + $0x558] sm:$0xff] %v1873_v30  ;;  %v1875_v15 = vpop.f32.mrb[67].mxu1 }
 0x1b8   : > { %3529 = vst [vmem:[%s6757_s5 + $0x560] sm:$0xff] %v1875_v15  ;;  %5528 = vmatpush3.bf16.xpose.msk.msra.mxu1 %vm5772_vm1, %v5523_v62  ;;  %v1077_v27 = vpop.f32.mrb[68].mxu0 }
 0x1b9   : > { %3459 = vst [vmem:[%s6757_s5 + $0x330] sm:$0xff] %v1077_v27  ;;  %v1079_v59 = vpop.f32.mrb[69].mxu0  ;;  %4816 = vmatmul.mubr.msk.f32.gmra.mrb[174].mxu0 %vm518_vm0, %v7329_v12 }
 0x1ba   : > { %v1879_v56 = vpop.f32.mrb[68].mxu1  ;;  %3460 = vst [vmem:[%s6757_s5 + $0x338] sm:$0xff] %v1079_v59  ;;  %4817 = vmatprep.mubr.msk.f32.mxu0 %vm518_vm0, %v7342_v16 }
 0x1bb   : > { %3531 = vst [vmem:[%s6757_s5 + $0x570] sm:$0xff] %v1879_v56  ;;  %v1881_v18 = vpop.f32.mrb[69].mxu1 }
 0x1bc   : > { %3532 = vst [vmem:[%s6757_s5 + $0x578] sm:$0xff] %v1881_v18  ;;  %v1083_v20 = vpop.f32.mrb[70].mxu0 }
 0x1bd   : > { %3462 = vst [vmem:[%s6757_s5 + $0x348] sm:$0xff] %v1083_v20  ;;  %v1085_v2 = vpop.f32.mrb[71].mxu0  ;;  %4818 = vmatmul.mubr.msk.f32.gmra.mrb[176].mxu0 %vm518_vm0, %v7342_v16 }
 0x1be   : > { %v1885_v11 = vpop.f32.mrb[70].mxu1  ;;  %3463 = vst [vmem:[%s6757_s5 + $0x350] sm:$0xff] %v1085_v2  ;;  %4819 = vmatprep.mubr.msk.f32.mxu0 %vm518_vm0, %v7353_v0 }
 0x1bf   : > { %3534 = vst [vmem:[%s6757_s5 + $0x588] sm:$0xff] %v1885_v11  ;;  %5170 = vmatmul.mubr.msk.f32.vlgmr.msra.gmra.mrb[160].mxu1 %vm518_vm0, %v6959_v3  ;;  %v1887_v17 = vpop.f32.mrb[71].mxu1 }
 0x1c0   : > { %3535 = vst [vmem:[%s6757_s5 + $0x590] sm:$0xff] %v1887_v17  ;;  %5172 = vmatprep.mubr.msk.f32.mxu1 %vm518_vm0, %v6977_v26  ;;  %v1089_v22 = vpop.f32.mrb[72].mxu0  ;;  %v7383_v26 = vld [vmem:[%s5817_s30 + $0x3d8] sm:$0xff] }
 0x1c1   : > { %3465 = vst [vmem:[%s6757_s5 + $0x360] sm:$0xff] %v1089_v22  ;;  %v1091_v25 = vpop.f32.mrb[73].mxu0  ;;  %4820 = vmatmul.mubr.msk.f32.gmra.mrb[178].mxu0 %vm518_vm0, %v7353_v0 }
 0x1c2   : > { %v1891_v23 = vpop.f32.mrb[72].mxu1  ;;  %3466 = vst [vmem:[%s6757_s5 + $0x368] sm:$0xff] %v1091_v25  ;;  %4821 = vmatprep.mubr.msk.f32.mxu0 %vm518_vm0, %v7368_v8 }
 0x1c3   : > { %3537 = vst [vmem:[%s6757_s5 + $0x5a0] sm:$0xff] %v1891_v23  ;;  %5173 = vmatmul.mubr.msk.f32.gmra.mrb[162].mxu1 %vm518_vm0, %v6995_v42  ;;  %v1893_v3 = vpop.f32.mrb[73].mxu1 }
 0x1c4   : > { %3538 = vst [vmem:[%s6757_s5 + $0x5a8] sm:$0xff] %v1893_v3  ;;  %5175 = vmatprep.mubr.msk.f32.mxu1 %vm518_vm0, %v7013_v31  ;;  %v1095_v36 = vpop.f32.mrb[74].mxu0  ;;  %v7398_v31 = vld [vmem:[%s5817_s30 + $0x3e0] sm:$0xff] }
 0x1c5   : > { %3468 = vst [vmem:[%s6757_s5 + $0x378] sm:$0xff] %v1095_v36  ;;  %v1097_v29 = vpop.f32.mrb[75].mxu0  ;;  %4822 = vmatmul.mubr.msk.f32.gmra.mrb[180].mxu0 %vm518_vm0, %v7368_v8  ;;  %v7578_v36 = vld [vmem:[%s5817_s30 + $0x440] sm:$0xff] }
 0x1c6   : > { %v1897_v28 = vpop.f32.mrb[74].mxu1  ;;  %3469 = vst [vmem:[%s6757_s5 + $0x380] sm:$0xff] %v1097_v29  ;;  %4823 = vmatprep.mubr.msk.f32.mxu0 %vm518_vm0, %v7383_v26 }
 0x1c7   : > { %3540 = vst [vmem:[%s6757_s5 + $0x5b8] sm:$0xff] %v1897_v28  ;;  %5176 = vmatmul.mubr.msk.f32.gmra.mrb[164].mxu1 %vm518_vm0, %v7031_v55  ;;  %v1899_v42 = vpop.f32.mrb[75].mxu1 }
 0x1c8   : > { %3541 = vst [vmem:[%s6757_s5 + $0x5c0] sm:$0xff] %v1899_v42  ;;  %5178 = vmatprep.mubr.msk.f32.mxu1 %vm518_vm0, %v7049_v63  ;;  %v1101_v39 = vpop.f32.mrb[76].mxu0  ;;  %v7413_v63 = vld [vmem:[%s5817_s30 + $0x3e8] sm:$0xff] }
 0x1c9   : > { %3471 = vst [vmem:[%s6757_s5 + $0x390] sm:$0xff] %v1101_v39  ;;  %v1103_v44 = vpop.f32.mrb[77].mxu0  ;;  %4824 = vmatmul.mubr.msk.f32.gmra.mrb[182].mxu0 %vm518_vm0, %v7383_v26  ;;  %v367_v39 = vld [vmem:[%s5817_s30 + $0x448] sm:$0xff] }
 0x1ca   : > { %v1903_v45 = vpop.f32.mrb[76].mxu1  ;;  %3472 = vst [vmem:[%s6757_s5 + $0x398] sm:$0xff] %v1103_v44  ;;  %4825 = vmatprep.mubr.msk.f32.mxu0 %vm518_vm0, %v7398_v31 }
 0x1cb   : > { %3543 = vst [vmem:[%s6757_s5 + $0x5d0] sm:$0xff] %v1903_v45  ;;  %5179 = vmatmul.mubr.msk.f32.gmra.mrb[166].mxu1 %vm518_vm0, %v7067_v38  ;;  %v1905_v55 = vpop.f32.mrb[77].mxu1 }
 0x1cc   : > { %3544 = vst [vmem:[%s6757_s5 + $0x5d8] sm:$0xff] %v1905_v55  ;;  %5181 = vmatprep.mubr.msk.f32.mxu1 %vm518_vm0, %v7085_v47  ;;  %v1107_v46 = vpop.f32.mrb[78].mxu0  ;;  %v7428_v47 = vld [vmem:[%s5817_s30 + $0x3f0] sm:$0xff] }
 0x1cd   : > { %3474 = vst [vmem:[%s6757_s5 + $0x3a8] sm:$0xff] %v1107_v46  ;;  %v1109_v49 = vpop.f32.mrb[79].mxu0  ;;  %4826 = vmatmul.mubr.msk.f32.gmra.mrb[184].mxu0 %vm518_vm0, %v7398_v31  ;;  %v368_v46 = vld [vmem:[%s5817_s30 + $0x450] sm:$0xff] }
 0x1ce   : > { %v1909_v50 = vpop.f32.mrb[78].mxu1  ;;  %3475 = vst [vmem:[%s6757_s5 + $0x3b0] sm:$0xff] %v1109_v49  ;;  %4827 = vmatprep.mubr.msk.f32.mxu0 %vm518_vm0, %v7413_v63 }
 0x1cf   : > { %3546 = vst [vmem:[%s6757_s5 + $0x5e8] sm:$0xff] %v1909_v50  ;;  %5182 = vmatmul.mubr.msk.f32.gmra.mrb[168].mxu1 %vm518_vm0, %v7102_v53  ;;  %v1911_v38 = vpop.f32.mrb[79].mxu1 }
 0x1d0   : > { %3547 = vst [vmem:[%s6757_s5 + $0x5f0] sm:$0xff] %v1911_v38  ;;  %5184 = vmatprep.mubr.msk.f32.mxu1 %vm518_vm0, %v7118_v40  ;;  %v1113_v54 = vpop.f32.mrb[80].mxu0  ;;  %v7443_v40 = vld [vmem:[%s5817_s30 + $0x3f8] sm:$0xff] }
 0x1d1   : > { %3477 = vst [vmem:[%s6757_s5 + $0x3c0] sm:$0xff] %v1113_v54  ;;  %v1115_v4 = vpop.f32.mrb[81].mxu0  ;;  %4828 = vmatmul.mubr.msk.f32.gmra.mrb[186].mxu0 %vm518_vm0, %v7413_v63  ;;  %v369_v54 = vld [vmem:[%s5817_s30 + $0x458] sm:$0xff] }
 0x1d2   : > { %v1915_v32 = vpop.f32.mrb[80].mxu1  ;;  %3478 = vst [vmem:[%s6757_s5 + $0x3c8] sm:$0xff] %v1115_v4  ;;  %4829 = vmatprep.mubr.msk.f32.mxu0 %vm518_vm0, %v7428_v47 }
 0x1d3   : > { %3549 = vst [vmem:[%s6757_s5 + $0x600] sm:$0xff] %v1915_v32  ;;  %5185 = vmatmul.mubr.msk.f32.gmra.mrb[170].mxu1 %vm518_vm0, %v7137_v41  ;;  %v1917_v53 = vpop.f32.mrb[81].mxu1 }
 0x1d4   : > { %3550 = vst [vmem:[%s6757_s5 + $0x608] sm:$0xff] %v1917_v53  ;;  %5187 = vmatprep.mubr.msk.f32.mxu1 %vm518_vm0, %v7154_v58  ;;  %v1119_v33 = vpop.f32.mrb[82].mxu0  ;;  %v7458_v58 = vld [vmem:[%s5817_s30 + $0x400] sm:$0xff] }
 0x1d5   : > { %3480 = vst [vmem:[%s6757_s5 + $0x3d8] sm:$0xff] %v1119_v33  ;;  %v1121_v57 = vpop.f32.mrb[83].mxu0  ;;  %4830 = vmatmul.mubr.msk.f32.gmra.mrb[188].mxu0 %vm518_vm0, %v7428_v47  ;;  %v370_v33 = vld [vmem:[%s5817_s30 + $0x460] sm:$0xff] }
 0x1d6   : > { %v1921_v34 = vpop.f32.mrb[82].mxu1  ;;  %3481 = vst [vmem:[%s6757_s5 + $0x3e0] sm:$0xff] %v1121_v57  ;;  %4831 = vmatprep.mubr.msk.f32.mxu0 %vm518_vm0, %v7443_v40 }
 0x1d7   : > { %3552 = vst [vmem:[%s6757_s5 + $0x618] sm:$0xff] %v1921_v34  ;;  %5188 = vmatmul.mubr.msk.f32.gmra.mrb[172].mxu1 %vm518_vm0, %v7173_v10  ;;  %v1923_v41 = vpop.f32.mrb[83].mxu1 }
 0x1d8   : > { %3553 = vst [vmem:[%s6757_s5 + $0x620] sm:$0xff] %v1923_v41  ;;  %5190 = vmatprep.mubr.msk.f32.mxu1 %vm518_vm0, %v7190_v19  ;;  %v1125_v62 = vpop.f32.mrb[84].mxu0  ;;  %v7473_v19 = vld [vmem:[%s5817_s30 + $0x408] sm:$0xff] }
 0x1d9   : > { %3483 = vst [vmem:[%s6757_s5 + $0x3f0] sm:$0xff] %v1125_v62  ;;  %v1127_v51 = vpop.f32.mrb[85].mxu0  ;;  %4832 = vmatmul.mubr.msk.f32.gmra.mrb[190].mxu0 %vm518_vm0, %v7443_v40  ;;  %v371_v62 = vld [vmem:[%s5817_s30 + $0x468] sm:$0xff] }
 0x1da   : > { %v1927_v1 = vpop.f32.mrb[84].mxu1  ;;  %3484 = vst [vmem:[%s6757_s5 + $0x3f8] sm:$0xff] %v1127_v51  ;;  %4833 = vmatprep.mubr.msk.f32.mxu0 %vm518_vm0, %v7458_v58 }
 0x1db   : > { %3555 = vst [vmem:[%s6757_s5 + $0x630] sm:$0xff] %v1927_v1  ;;  %5191 = vmatmul.mubr.msk.f32.gmra.mrb[174].mxu1 %vm518_vm0, %v7209_v24  ;;  %v1929_v10 = vpop.f32.mrb[85].mxu1 }
 0x1dc   : > { %3556 = vst [vmem:[%s6757_s5 + $0x638] sm:$0xff] %v1929_v10  ;;  %5193 = vmatprep.mubr.msk.f32.mxu1 %vm518_vm0, %v7226_v52  ;;  %v1131_v5 = vpop.f32.mrb[86].mxu0  ;;  %v7488_v52 = vld [vmem:[%s5817_s30 + $0x410] sm:$0xff] }
 0x1dd   : > { %3486 = vst [vmem:[%s6757_s5 + $0x408] sm:$0xff] %v1131_v5  ;;  %v1133_v21 = vpop.f32.mrb[87].mxu0  ;;  %4834 = vmatmul.mubr.msk.f32.gmra.mrb[192].mxu0 %vm518_vm0, %v7458_v58  ;;  %v372_v5 = vld [vmem:[%s5817_s30 + $0x470] sm:$0xff] }
 0x1de   : > { %v1933_v7 = vpop.f32.mrb[86].mxu1  ;;  %3487 = vst [vmem:[%s6757_s5 + $0x410] sm:$0xff] %v1133_v21  ;;  %4835 = vmatprep.mubr.msk.f32.mxu0 %vm518_vm0, %v7473_v19 }
 0x1df   : > { %3558 = vst [vmem:[%s6757_s5 + $0x648] sm:$0xff] %v1933_v7  ;;  %5194 = vmatmul.mubr.msk.f32.gmra.mrb[176].mxu1 %vm518_vm0, %v7245_v35  ;;  %v1935_v24 = vpop.f32.mrb[87].mxu1 }
 0x1e0   : > { %3559 = vst [vmem:[%s6757_s5 + $0x650] sm:$0xff] %v1935_v24  ;;  %5196 = vmatprep.mubr.msk.f32.mxu1 %vm518_vm0, %v7260_v60  ;;  %v1137_v43 = vpop.f32.mrb[88].mxu0  ;;  %v7503_v60 = vld [vmem:[%s5817_s30 + $0x418] sm:$0xff] }
 0x1e1   : > { %3489 = vst [vmem:[%s6757_s5 + $0x420] sm:$0xff] %v1137_v43  ;;  %v1139_v9 = vpop.f32.mrb[89].mxu0  ;;  %4836 = vmatmul.mubr.msk.f32.gmra.mrb[194].mxu0 %vm518_vm0, %v7473_v19  ;;  %v373_v43 = vld [vmem:[%s5817_s30 + $0x478] sm:$0xff] }
 0x1e2   : > { %v1939_v13 = vpop.f32.mrb[88].mxu1  ;;  %3490 = vst [vmem:[%s6757_s5 + $0x428] sm:$0xff] %v1139_v9  ;;  %4837 = vmatprep.mubr.msk.f32.mxu0 %vm518_vm0, %v7488_v52 }
 0x1e3   : > { %3561 = vst [vmem:[%s6757_s5 + $0x660] sm:$0xff] %v1939_v13  ;;  %5197 = vmatmul.mubr.msk.f32.gmra.mrb[178].mxu1 %vm518_vm0, %v7275_v37  ;;  %v1941_v35 = vpop.f32.mrb[89].mxu1 }
 0x1e4   : > { %3562 = vst [vmem:[%s6757_s5 + $0x668] sm:$0xff] %v1941_v35  ;;  %5199 = vmatprep.mubr.msk.f32.mxu1 %vm518_vm0, %v7288_v48  ;;  %v1143_v14 = vpop.f32.mrb[90].mxu0  ;;  %v7518_v48 = vld [vmem:[%s5817_s30 + $0x420] sm:$0xff] }
 0x1e5   : > { %3492 = vst [vmem:[%s6757_s5 + $0x438] sm:$0xff] %v1143_v14  ;;  %v1145_v30 = vpop.f32.mrb[91].mxu0  ;;  %4838 = vmatmul.mubr.msk.f32.gmra.mrb[196].mxu0 %vm518_vm0, %v7488_v52 }
 0x1e6   : > { %v1945_v15 = vpop.f32.mrb[90].mxu1  ;;  %3493 = vst [vmem:[%s6757_s5 + $0x440] sm:$0xff] %v1145_v30  ;;  %4839 = vmatprep.mubr.msk.f32.mxu0 %vm518_vm0, %v7503_v60 }
 0x1e7   : > { %3564 = vst [vmem:[%s6757_s5 + $0x678] sm:$0xff] %v1945_v15  ;;  %5200 = vmatmul.mubr.msk.f32.gmra.mrb[180].mxu1 %vm518_vm0, %v7303_v61  ;;  %v1947_v37 = vpop.f32.mrb[91].mxu1 }
 0x1e8   : > { %3565 = vst [vmem:[%s6757_s5 + $0x680] sm:$0xff] %v1947_v37  ;;  %5202 = vmatprep.mubr.msk.f32.mxu1 %vm518_vm0, %v7316_v6  ;;  %v1149_v27 = vpop.f32.mrb[92].mxu0  ;;  %v7533_v6 = vld [vmem:[%s5817_s30 + $0x428] sm:$0xff] }
 0x1e9   : > { %3495 = vst [vmem:[%s6757_s5 + $0x450] sm:$0xff] %v1149_v27  ;;  %v1151_v59 = vpop.f32.mrb[93].mxu0  ;;  %4840 = vmatmul.mubr.msk.f32.gmra.mrb[198].mxu0 %vm518_vm0, %v7503_v60 }
 0x1ea   : > { %v1951_v56 = vpop.f32.mrb[92].mxu1  ;;  %3496 = vst [vmem:[%s6757_s5 + $0x458] sm:$0xff] %v1151_v59  ;;  %4841 = vmatprep.mubr.msk.f32.mxu0 %vm518_vm0, %v7518_v48 }
 0x1eb   : > { %3567 = vst [vmem:[%s6757_s5 + $0x690] sm:$0xff] %v1951_v56  ;;  %5203 = vmatmul.mubr.msk.f32.gmra.mrb[182].mxu1 %vm518_vm0, %v7329_v12  ;;  %v1953_v61 = vpop.f32.mrb[93].mxu1 }
 0x1ec   : > { %3568 = vst [vmem:[%s6757_s5 + $0x698] sm:$0xff] %v1953_v61  ;;  %5205 = vmatprep.mubr.msk.f32.mxu1 %vm518_vm0, %v7342_v16  ;;  %v1155_v18 = vpop.f32.mrb[94].mxu0  ;;  %v7548_v16 = vld [vmem:[%s5817_s30 + $0x430] sm:$0xff] }
 0x1ed   : > { %3498 = vst [vmem:[%s6757_s5 + $0x468] sm:$0xff] %v1155_v18  ;;  %v1157_v20 = vpop.f32.mrb[95].mxu0  ;;  %4842 = vmatmul.mubr.msk.f32.gmra.mrb[200].mxu0 %vm518_vm0, %v7518_v48 }
 0x1ee   : > { %v1957_v2 = vpop.f32.mrb[94].mxu1  ;;  %3499 = vst [vmem:[%s6757_s5 + $0x470] sm:$0xff] %v1157_v20  ;;  %4843 = vmatprep.mubr.msk.f32.mxu0 %vm518_vm0, %v7533_v6 }
 0x1ef   : > { %3570 = vst [vmem:[%s6757_s5 + $0x6a8] sm:$0xff] %v1957_v2  ;;  %5206 = vmatmul.mubr.msk.f32.gmra.mrb[184].mxu1 %vm518_vm0, %v7353_v0  ;;  %v1959_v12 = vpop.f32.mrb[95].mxu1 }
 0x1f0   : > { %3571 = vst [vmem:[%s6757_s5 + $0x6b0] sm:$0xff] %v1959_v12  ;;  %5208 = vmatprep.mubr.msk.f32.mxu1 %vm518_vm0, %v7368_v8  ;;  %v5067_v11 = vpop.f32.mrb[96].mxu0  ;;  %v7563_v8 = vld [vmem:[%s5817_s30 + $0x438] sm:$0xff] }
 0x1f1   : > { %3506 = vst [vmem:[%s6757_s5 + $0x4a8] sm:$0xff] %v5067_v11  ;;  %v2172_v22 = vpop.f32.mrb[97].mxu0  ;;  %4844 = vmatmul.mubr.msk.f32.gmra.mrb[202].mxu0 %vm518_vm0, %v7533_v6 }
 0x1f2   : > { %v1963_v17 = vpop.f32.mrb[96].mxu1  ;;  %3503 = vst [vmem:[%s6757_s5 + $0x490] sm:$0xff] %v2172_v22  ;;  %4845 = vmatprep.mubr.msk.f32.mxu0 %vm518_vm0, %v7548_v16 }
 0x1f3   : > { %3573 = vst [vmem:[%s6757_s5 + $0x6c0] sm:$0xff] %v1963_v17  ;;  %5209 = vmatmul.mubr.msk.f32.gmra.mrb[186].mxu1 %vm518_vm0, %v7383_v26  ;;  %v1965_v0 = vpop.f32.mrb[97].mxu1 }
 0x1f4   : > { %3574 = vst [vmem:[%s6757_s5 + $0x6c8] sm:$0xff] %v1965_v0  ;;  %5211 = vmatprep.mubr.msk.f32.mxu1 %vm518_vm0, %v7398_v31  ;;  %v5070_v25 = vpop.f32.mrb[98].mxu0 }
 0x1f5   : > { %3512 = vst [vmem:[%s6757_s5 + $0x4d8] sm:$0xff] %v5070_v25  ;;  %v2182_v3 = vpop.f32.mrb[99].mxu0  ;;  %4846 = vmatmul.mubr.msk.f32.gmra.mrb[204].mxu0 %vm518_vm0, %v7548_v16 }
 0x1f6   : > { %v1969_v23 = vpop.f32.mrb[98].mxu1  ;;  %3509 = vst [vmem:[%s6757_s5 + $0x4c0] sm:$0xff] %v2182_v3  ;;  %4847 = vmatprep.mubr.msk.f32.mxu0 %vm518_vm0, %v7563_v8 }
 0x1f7   : > { %3576 = vst [vmem:[%s6757_s5 + $0x6d8] sm:$0xff] %v1969_v23  ;;  %5212 = vmatmul.mubr.msk.f32.gmra.mrb[188].mxu1 %vm518_vm0, %v7413_v63  ;;  %v1971_v26 = vpop.f32.mrb[99].mxu1 }
 0x1f8   : > { %3577 = vst [vmem:[%s6757_s5 + $0x6e0] sm:$0xff] %v1971_v26  ;;  %5214 = vmatprep.mubr.msk.f32.mxu1 %vm518_vm0, %v7428_v47  ;;  %v5073_v29 = vpop.f32.mrb[100].mxu0 }
 0x1f9   : > { %3518 = vst [vmem:[%s6757_s5 + $0x508] sm:$0xff] %v5073_v29  ;;  %v2192_v42 = vpop.f32.mrb[101].mxu0  ;;  %4848 = vmatmul.mubr.msk.f32.gmra.mrb[206].mxu0 %vm518_vm0, %v7563_v8 }
 0x1fa   : > { %v1975_v28 = vpop.f32.mrb[100].mxu1  ;;  %3515 = vst [vmem:[%s6757_s5 + $0x4f0] sm:$0xff] %v2192_v42  ;;  %4849 = vmatprep.mubr.msk.f32.mxu0 %vm518_vm0, %v7578_v36 }
 0x1fb   : > { %3579 = vst [vmem:[%s6757_s5 + $0x6f0] sm:$0xff] %v1975_v28  ;;  %5215 = vmatmul.mubr.msk.f32.gmra.mrb[190].mxu1 %vm518_vm0, %v7443_v40  ;;  %v1977_v31 = vpop.f32.mrb[101].mxu1 }
 0x1fc   : > { %3580 = vst [vmem:[%s6757_s5 + $0x6f8] sm:$0xff] %v1977_v31  ;;  %5217 = vmatprep.mubr.msk.f32.mxu1 %vm518_vm0, %v7458_v58  ;;  %v5076_v44 = vpop.f32.mrb[102].mxu0 }
 0x1fd   : > { %3524 = vst [vmem:[%s6757_s5 + $0x538] sm:$0xff] %v5076_v44  ;;  %v2202_v55 = vpop.f32.mrb[103].mxu0  ;;  %4850 = vmatmul.mubr.msk.f32.gmra.mrb[208].mxu0 %vm518_vm0, %v7578_v36 }
 0x1fe   : > { %v1981_v45 = vpop.f32.mrb[102].mxu1  ;;  %3521 = vst [vmem:[%s6757_s5 + $0x520] sm:$0xff] %v2202_v55  ;;  %4851 = vmatprep.mubr.msk.f32.mxu0 %vm518_vm0, %v367_v39 }
 0x1ff   : > { %3582 = vst [vmem:[%s6757_s5 + $0x708] sm:$0xff] %v1981_v45  ;;  %5218 = vmatmul.mubr.msk.f32.gmra.mrb[192].mxu1 %vm518_vm0, %v7473_v19  ;;  %v1983_v63 = vpop.f32.mrb[103].mxu1 }
 0x200   : > { %3583 = vst [vmem:[%s6757_s5 + $0x710] sm:$0xff] %v1983_v63  ;;  %5220 = vmatprep.mubr.msk.f32.mxu1 %vm518_vm0, %v7488_v52  ;;  %v5079_v49 = vpop.f32.mrb[104].mxu0 }
 0x201   : > { %3530 = vst [vmem:[%s6757_s5 + $0x568] sm:$0xff] %v5079_v49  ;;  %v2212_v38 = vpop.f32.mrb[105].mxu0  ;;  %4852 = vmatmul.mubr.msk.f32.gmra.mrb[210].mxu0 %vm518_vm0, %v367_v39 }
 0x202   : > { %v1987_v50 = vpop.f32.mrb[104].mxu1  ;;  %3527 = vst [vmem:[%s6757_s5 + $0x550] sm:$0xff] %v2212_v38  ;;  %4853 = vmatprep.mubr.msk.f32.mxu0 %vm518_vm0, %v368_v46 }
 0x203   : > { %3585 = vst [vmem:[%s6757_s5 + $0x720] sm:$0xff] %v1987_v50  ;;  %5221 = vmatmul.mubr.msk.f32.gmra.mrb[194].mxu1 %vm518_vm0, %v7503_v60  ;;  %v1989_v47 = vpop.f32.mrb[105].mxu1 }
 0x204   : > { %3586 = vst [vmem:[%s6757_s5 + $0x728] sm:$0xff] %v1989_v47  ;;  %5223 = vmatprep.mubr.msk.f32.mxu1 %vm518_vm0, %v7518_v48  ;;  %v5082_v4 = vpop.f32.mrb[106].mxu0 }
 0x205   : > { %3536 = vst [vmem:[%s6757_s5 + $0x598] sm:$0xff] %v5082_v4  ;;  %v2222_v53 = vpop.f32.mrb[107].mxu0  ;;  %4854 = vmatmul.mubr.msk.f32.gmra.mrb[212].mxu0 %vm518_vm0, %v368_v46 }
 0x206   : > { %v1993_v32 = vpop.f32.mrb[106].mxu1  ;;  %3533 = vst [vmem:[%s6757_s5 + $0x580] sm:$0xff] %v2222_v53  ;;  %4855 = vmatprep.mubr.msk.f32.mxu0 %vm518_vm0, %v369_v54 }
 0x207   : > { %3588 = vst [vmem:[%s6757_s5 + $0x738] sm:$0xff] %v1993_v32  ;;  %5224 = vmatmul.mubr.msk.f32.gmra.mrb[196].mxu1 %vm518_vm0, %v7533_v6  ;;  %v1995_v40 = vpop.f32.mrb[107].mxu1 }
 0x208   : > { %3589 = vst [vmem:[%s6757_s5 + $0x740] sm:$0xff] %v1995_v40  ;;  %5226 = vmatprep.mubr.msk.f32.mxu1 %vm518_vm0, %v7548_v16  ;;  %v5085_v57 = vpop.f32.mrb[108].mxu0 }
 0x209   : > { %3542 = vst [vmem:[%s6757_s5 + $0x5c8] sm:$0xff] %v5085_v57  ;;  %v2232_v41 = vpop.f32.mrb[109].mxu0  ;;  %4856 = vmatmul.mubr.msk.f32.gmra.mrb[214].mxu0 %vm518_vm0, %v369_v54 }
 0x20a   : > { %v1999_v34 = vpop.f32.mrb[108].mxu1  ;;  %3539 = vst [vmem:[%s6757_s5 + $0x5b0] sm:$0xff] %v2232_v41  ;;  %4857 = vmatprep.mubr.msk.f32.mxu0 %vm518_vm0, %v370_v33 }
 0x20b   : > { %3591 = vst [vmem:[%s6757_s5 + $0x750] sm:$0xff] %v1999_v34  ;;  %5227 = vmatmul.mubr.msk.f32.gmra.mrb[198].mxu1 %vm518_vm0, %v7563_v8  ;;  %v2001_v58 = vpop.f32.mrb[109].mxu1 }
 0x20c   : > { %3592 = vst [vmem:[%s6757_s5 + $0x758] sm:$0xff] %v2001_v58  ;;  %5229 = vmatprep.mubr.msk.f32.mxu1 %vm518_vm0, %v7578_v36  ;;  %v5088_v51 = vpop.f32.mrb[110].mxu0 }
 0x20d   : > { %3548 = vst [vmem:[%s6757_s5 + $0x5f8] sm:$0xff] %v5088_v51  ;;  %v2242_v10 = vpop.f32.mrb[111].mxu0  ;;  %4858 = vmatmul.mubr.msk.f32.gmra.mrb[216].mxu0 %vm518_vm0, %v370_v33 }
 0x20e   : > { %v2005_v1 = vpop.f32.mrb[110].mxu1  ;;  %3545 = vst [vmem:[%s6757_s5 + $0x5e0] sm:$0xff] %v2242_v10  ;;  %4859 = vmatprep.mubr.msk.f32.mxu0 %vm518_vm0, %v371_v62 }
 0x20f   : > { %3594 = vst [vmem:[%s6757_s5 + $0x768] sm:$0xff] %v2005_v1  ;;  %5230 = vmatmul.mubr.msk.f32.gmra.mrb[200].mxu1 %vm518_vm0, %v367_v39  ;;  %v2007_v19 = vpop.f32.mrb[111].mxu1 }
 0x210   : > { %3595 = vst [vmem:[%s6757_s5 + $0x770] sm:$0xff] %v2007_v19  ;;  %5232 = vmatprep.mubr.msk.f32.mxu1 %vm518_vm0, %v368_v46  ;;  %v5091_v21 = vpop.f32.mrb[112].mxu0 }
 0x211   : > { %3554 = vst [vmem:[%s6757_s5 + $0x628] sm:$0xff] %v5091_v21  ;;  %v2252_v24 = vpop.f32.mrb[113].mxu0  ;;  %4860 = vmatmul.mubr.msk.f32.gmra.mrb[218].mxu0 %vm518_vm0, %v371_v62 }
 0x212   : > { %v2011_v7 = vpop.f32.mrb[112].mxu1  ;;  %3551 = vst [vmem:[%s6757_s5 + $0x610] sm:$0xff] %v2252_v24  ;;  %4861 = vmatprep.mubr.msk.f32.mxu0 %vm518_vm0, %v372_v5 }
 0x213   : > { %3597 = vst [vmem:[%s6757_s5 + $0x780] sm:$0xff] %v2011_v7  ;;  %5233 = vmatmul.mubr.msk.f32.gmra.mrb[202].mxu1 %vm518_vm0, %v369_v54  ;;  %v2013_v52 = vpop.f32.mrb[113].mxu1 }
 0x214   : > { %3598 = vst [vmem:[%s6757_s5 + $0x788] sm:$0xff] %v2013_v52  ;;  %5235 = vmatprep.mubr.msk.f32.mxu1 %vm518_vm0, %v370_v33  ;;  %v5094_v9 = vpop.f32.mrb[114].mxu0 }
 0x215   : > { %3560 = vst [vmem:[%s6757_s5 + $0x658] sm:$0xff] %v5094_v9  ;;  %v2262_v35 = vpop.f32.mrb[115].mxu0  ;;  %4862 = vmatmul.mubr.msk.f32.gmra.mrb[220].mxu0 %vm518_vm0, %v372_v5 }
 0x216   : > { %v2017_v13 = vpop.f32.mrb[114].mxu1  ;;  %3557 = vst [vmem:[%s6757_s5 + $0x640] sm:$0xff] %v2262_v35  ;;  %4863 = vmatprep.mubr.msk.f32.mxu0 %vm518_vm0, %v373_v43 }
 0x217   : > { %3600 = vst [vmem:[%s6757_s5 + $0x798] sm:$0xff] %v2017_v13  ;;  %5236 = vmatmul.mubr.msk.f32.gmra.mrb[204].mxu1 %vm518_vm0, %v371_v62  ;;  %v2019_v60 = vpop.f32.mrb[115].mxu1 }
 0x218   : > { %3601 = vst [vmem:[%s6757_s5 + $0x7a0] sm:$0xff] %v2019_v60  ;;  %5238 = vmatprep.mubr.msk.f32.mxu1 %vm518_vm0, %v372_v5  ;;  %v5097_v14 = vpop.f32.mrb[116].mxu0 }
 0x219   : > { %3566 = vst [vmem:[%s6757_s5 + $0x688] sm:$0xff] %v5097_v14  ;;  %v2272_v15 = vpop.f32.mrb[117].mxu0  ;;  %4864 = vmatmul.mubr.msk.f32.gmra.mrb[222].mxu0 %vm518_vm0, %v373_v43 }
 0x21a   : > { %v2023_v30 = vpop.f32.mrb[116].mxu1  ;;  %3563 = vst [vmem:[%s6757_s5 + $0x670] sm:$0xff] %v2272_v15 }
 0x21b   : > { %3603 = vst [vmem:[%s6757_s5 + $0x7b0] sm:$0xff] %v2023_v30  ;;  %5239 = vmatmul.mubr.msk.f32.gmra.mrb[206].mxu1 %vm518_vm0, %v373_v43  ;;  %v2025_v37 = vpop.f32.mrb[117].mxu1 }
 0x21c   : > { %3604 = vst [vmem:[%s6757_s5 + $0x7b8] sm:$0xff] %v2025_v37  ;;  %v5100_v48 = vpop.f32.mrb[118].mxu0 }
 0x21d   : > { %3572 = vst [vmem:[%s6757_s5 + $0x6b8] sm:$0xff] %v5100_v48  ;;  %v2282_v59 = vpop.f32.mrb[119].mxu0 }
 0x21e   : > { %v2029_v27 = vpop.f32.mrb[118].mxu1  ;;  %3569 = vst [vmem:[%s6757_s5 + $0x6a0] sm:$0xff] %v2282_v59 }
 0x21f   : > { %3606 = vst [vmem:[%s6757_s5 + $0x7c8] sm:$0xff] %v2029_v27  ;;  %v2031_v56 = vpop.f32.mrb[119].mxu1 }
 0x220   : > { %3607 = vst [vmem:[%s6757_s5 + $0x7d0] sm:$0xff] %v2031_v56  ;;  %v5103_v61 = vpop.f32.mrb[120].mxu0 }
 0x221   : > { %3578 = vst [vmem:[%s6757_s5 + $0x6e8] sm:$0xff] %v5103_v61  ;;  %v2292_v18 = vpop.f32.mrb[121].mxu0 }
 0x222   : > { %v2035_v6 = vpop.f32.mrb[120].mxu1  ;;  %3575 = vst [vmem:[%s6757_s5 + $0x6d0] sm:$0xff] %v2292_v18 }
 0x223   : > { %3609 = vst [vmem:[%s6757_s5 + $0x7e0] sm:$0xff] %v2035_v6  ;;  %v2037_v20 = vpop.f32.mrb[121].mxu1 }
 0x224   : > { %3610 = vst [vmem:[%s6757_s5 + $0x7e8] sm:$0xff] %v2037_v20  ;;  %v5106_v2 = vpop.f32.mrb[122].mxu0 }
 0x225   : > { %3584 = vst [vmem:[%s6757_s5 + $0x718] sm:$0xff] %v5106_v2  ;;  %v2302_v16 = vpop.f32.mrb[123].mxu0 }
 0x226   : > { %v2041_v12 = vpop.f32.mrb[122].mxu1  ;;  %3581 = vst [vmem:[%s6757_s5 + $0x700] sm:$0xff] %v2302_v16 }
 0x227   : > { %3612 = vst [vmem:[%s6757_s5 + $0x7f8] sm:$0xff] %v2041_v12  ;;  %v2043_v11 = vpop.f32.mrb[123].mxu1 }
 0x228   : > { %3613 = vst [vmem:[%s6757_s5 + $0x800] sm:$0xff] %v2043_v11  ;;  %v5109_v17 = vpop.f32.mrb[124].mxu0 }
 0x229   : > { %3590 = vst [vmem:[%s6757_s5 + $0x748] sm:$0xff] %v5109_v17  ;;  %v2312_v0 = vpop.f32.mrb[125].mxu0 }
 0x22a   : > { %v2047_v22 = vpop.f32.mrb[124].mxu1  ;;  %3587 = vst [vmem:[%s6757_s5 + $0x730] sm:$0xff] %v2312_v0 }
 0x22b   : > { %3615 = vst [vmem:[%s6757_s5 + $0x810] sm:$0xff] %v2047_v22  ;;  %v2049_v8 = vpop.f32.mrb[125].mxu1 }
 0x22c   : > { %3616 = vst [vmem:[%s6757_s5 + $0x818] sm:$0xff] %v2049_v8  ;;  %v5112_v25 = vpop.f32.mrb[126].mxu0 }
 0x22d   : > { %3596 = vst [vmem:[%s6757_s5 + $0x778] sm:$0xff] %v5112_v25  ;;  %v2322_v3 = vpop.f32.mrb[127].mxu0 }
 0x22e   : > { %v2053_v23 = vpop.f32.mrb[126].mxu1  ;;  %3593 = vst [vmem:[%s6757_s5 + $0x760] sm:$0xff] %v2322_v3 }
 0x22f   : > { %3618 = vst [vmem:[%s6757_s5 + $0x828] sm:$0xff] %v2053_v23  ;;  %v2055_v26 = vpop.f32.mrb[127].mxu1 }
 0x230   : > { %3619 = vst [vmem:[%s6757_s5 + $0x830] sm:$0xff] %v2055_v26  ;;  %v2765_v36 = vpop.f32.mrb[128].mxu0 }
 0x231   : > { %3645 = vst [vmem:[%s6757_s5 + $0x900] sm:$0xff] %v2765_v36  ;;  %v2767_v28 = vpop.f32.mrb[129].mxu0 }
 0x232   : > { %v2059_v29 = vpop.f32.mrb[128].mxu1  ;;  %3646 = vst [vmem:[%s6757_s5 + $0x908] sm:$0xff] %v2767_v28 }
 0x233   : > { %3621 = vst [vmem:[%s6757_s5 + $0x840] sm:$0xff] %v2059_v29  ;;  %v2061_v42 = vpop.f32.mrb[129].mxu1 }
 0x234   : > { %3622 = vst [vmem:[%s6757_s5 + $0x848] sm:$0xff] %v2061_v42  ;;  %v2771_v31 = vpop.f32.mrb[130].mxu0 }
 0x235   : > { %3648 = vst [vmem:[%s6757_s5 + $0x918] sm:$0xff] %v2771_v31  ;;  %v2773_v44 = vpop.f32.mrb[131].mxu0 }
 0x236   : > { %v2065_v39 = vpop.f32.mrb[130].mxu1  ;;  %3649 = vst [vmem:[%s6757_s5 + $0x920] sm:$0xff] %v2773_v44 }
 0x237   : > { %3624 = vst [vmem:[%s6757_s5 + $0x858] sm:$0xff] %v2065_v39  ;;  %v2067_v45 = vpop.f32.mrb[131].mxu1 }
 0x238   : > { %3625 = vst [vmem:[%s6757_s5 + $0x860] sm:$0xff] %v2067_v45  ;;  %v2777_v55 = vpop.f32.mrb[132].mxu0 }
 0x239   : > { %3651 = vst [vmem:[%s6757_s5 + $0x930] sm:$0xff] %v2777_v55  ;;  %v2779_v46 = vpop.f32.mrb[133].mxu0 }
 0x23a   : > { %v2071_v63 = vpop.f32.mrb[132].mxu1  ;;  %3652 = vst [vmem:[%s6757_s5 + $0x938] sm:$0xff] %v2779_v46 }
 0x23b   : > { %3627 = vst [vmem:[%s6757_s5 + $0x870] sm:$0xff] %v2071_v63  ;;  %v2073_v49 = vpop.f32.mrb[133].mxu1 }
 0x23c   : > { %3628 = vst [vmem:[%s6757_s5 + $0x878] sm:$0xff] %v2073_v49  ;;  %v2783_v50 = vpop.f32.mrb[134].mxu0 }
 0x23d   : > { %3654 = vst [vmem:[%s6757_s5 + $0x948] sm:$0xff] %v2783_v50  ;;  %v2785_v47 = vpop.f32.mrb[135].mxu0 }
 0x23e   : > { %v2077_v38 = vpop.f32.mrb[134].mxu1  ;;  %3655 = vst [vmem:[%s6757_s5 + $0x950] sm:$0xff] %v2785_v47 }
 0x23f   : > { %3630 = vst [vmem:[%s6757_s5 + $0x888] sm:$0xff] %v2077_v38  ;;  %v2079_v54 = vpop.f32.mrb[135].mxu1 }
 0x240   : > { %3631 = vst [vmem:[%s6757_s5 + $0x890] sm:$0xff] %v2079_v54  ;;  %v2789_v4 = vpop.f32.mrb[136].mxu0 }
 0x241   : > { %3657 = vst [vmem:[%s6757_s5 + $0x960] sm:$0xff] %v2789_v4  ;;  %v2791_v53 = vpop.f32.mrb[137].mxu0 }
 0x242   : > { %v2083_v32 = vpop.f32.mrb[136].mxu1  ;;  %3658 = vst [vmem:[%s6757_s5 + $0x968] sm:$0xff] %v2791_v53 }
 0x243   : > { %3633 = vst [vmem:[%s6757_s5 + $0x8a0] sm:$0xff] %v2083_v32  ;;  %v2085_v40 = vpop.f32.mrb[137].mxu1 }
 0x244   : > { %3634 = vst [vmem:[%s6757_s5 + $0x8a8] sm:$0xff] %v2085_v40  ;;  %v2795_v33 = vpop.f32.mrb[138].mxu0 }
 0x245   : > { %3660 = vst [vmem:[%s6757_s5 + $0x978] sm:$0xff] %v2795_v33  ;;  %v2797_v34 = vpop.f32.mrb[139].mxu0 }
 0x246   : > { %v2089_v57 = vpop.f32.mrb[138].mxu1  ;;  %3661 = vst [vmem:[%s6757_s5 + $0x980] sm:$0xff] %v2797_v34 }
 0x247   : > { %3636 = vst [vmem:[%s6757_s5 + $0x8b8] sm:$0xff] %v2089_v57  ;;  %v2091_v41 = vpop.f32.mrb[139].mxu1 }
 0x248   : > { %3637 = vst [vmem:[%s6757_s5 + $0x8c0] sm:$0xff] %v2091_v41  ;;  %v2801_v58 = vpop.f32.mrb[140].mxu0 }
 0x249   : > { %3663 = vst [vmem:[%s6757_s5 + $0x990] sm:$0xff] %v2801_v58  ;;  %v2803_v51 = vpop.f32.mrb[141].mxu0 }
 0x24a   : > { %v2095_v62 = vpop.f32.mrb[140].mxu1  ;;  %3664 = vst [vmem:[%s6757_s5 + $0x998] sm:$0xff] %v2803_v51 }
 0x24b   : > { %3639 = vst [vmem:[%s6757_s5 + $0x8d0] sm:$0xff] %v2095_v62  ;;  %v2097_v1 = vpop.f32.mrb[141].mxu1 }
 0x24c   : > { %3640 = vst [vmem:[%s6757_s5 + $0x8d8] sm:$0xff] %v2097_v1  ;;  %v2807_v10 = vpop.f32.mrb[142].mxu0 }
 0x24d   : > { %3666 = vst [vmem:[%s6757_s5 + $0x9a8] sm:$0xff] %v2807_v10  ;;  %v2809_v5 = vpop.f32.mrb[143].mxu0 }
 0x24e   : > { %v2101_v19 = vpop.f32.mrb[142].mxu1  ;;  %3667 = vst [vmem:[%s6757_s5 + $0x9b0] sm:$0xff] %v2809_v5 }
 0x24f   : > { %3642 = vst [vmem:[%s6757_s5 + $0x8e8] sm:$0xff] %v2101_v19  ;;  %v2103_v21 = vpop.f32.mrb[143].mxu1 }
 0x250   : > { %3643 = vst [vmem:[%s6757_s5 + $0x8f0] sm:$0xff] %v2103_v21  ;;  %v2813_v7 = vpop.f32.mrb[144].mxu0 }
 0x251   : > { %3669 = vst [vmem:[%s6757_s5 + $0x9c0] sm:$0xff] %v2813_v7  ;;  %v2815_v52 = vpop.f32.mrb[145].mxu0 }
 0x252   : > { %v5115_v24 = vpop.f32.mrb[144].mxu1  ;;  %3670 = vst [vmem:[%s6757_s5 + $0x9c8] sm:$0xff] %v2815_v52 }
 0x253   : > { %3602 = vst [vmem:[%s6757_s5 + $0x7a8] sm:$0xff] %v5115_v24  ;;  %v2332_v43 = vpop.f32.mrb[145].mxu1 }
 0x254   : > { %3599 = vst [vmem:[%s6757_s5 + $0x790] sm:$0xff] %v2332_v43  ;;  %v2819_v9 = vpop.f32.mrb[146].mxu0 }
 0x255   : > { %3672 = vst [vmem:[%s6757_s5 + $0x9d8] sm:$0xff] %v2819_v9  ;;  %v2821_v13 = vpop.f32.mrb[147].mxu0 }
 0x256   : > { %v5118_v35 = vpop.f32.mrb[146].mxu1  ;;  %3673 = vst [vmem:[%s6757_s5 + $0x9e0] sm:$0xff] %v2821_v13 }
 0x257   : > { %3608 = vst [vmem:[%s6757_s5 + $0x7d8] sm:$0xff] %v5118_v35  ;;  %v2342_v60 = vpop.f32.mrb[147].mxu1 }
 0x258   : > { %3605 = vst [vmem:[%s6757_s5 + $0x7c0] sm:$0xff] %v2342_v60  ;;  %v2825_v14 = vpop.f32.mrb[148].mxu0 }
 0x259   : > { %3675 = vst [vmem:[%s6757_s5 + $0x9f0] sm:$0xff] %v2825_v14  ;;  %v2827_v30 = vpop.f32.mrb[149].mxu0 }
 0x25a   : > { %v5121_v15 = vpop.f32.mrb[148].mxu1  ;;  %3676 = vst [vmem:[%s6757_s5 + $0x9f8] sm:$0xff] %v2827_v30 }
 0x25b   : > { %3614 = vst [vmem:[%s6757_s5 + $0x808] sm:$0xff] %v5121_v15  ;;  %v2352_v37 = vpop.f32.mrb[149].mxu1 }
 0x25c   : > { %3611 = vst [vmem:[%s6757_s5 + $0x7f0] sm:$0xff] %v2352_v37  ;;  %v2831_v48 = vpop.f32.mrb[150].mxu0 }
 0x25d   : > { %3678 = vst [vmem:[%s6757_s5 + $0xa08] sm:$0xff] %v2831_v48  ;;  %v2833_v27 = vpop.f32.mrb[151].mxu0 }
 0x25e   : > { %v5124_v59 = vpop.f32.mrb[150].mxu1  ;;  %3679 = vst [vmem:[%s6757_s5 + $0xa10] sm:$0xff] %v2833_v27 }
 0x25f   : > { %3620 = vst [vmem:[%s6757_s5 + $0x838] sm:$0xff] %v5124_v59  ;;  %v2362_v56 = vpop.f32.mrb[151].mxu1 }
 0x260   : > { %3617 = vst [vmem:[%s6757_s5 + $0x820] sm:$0xff] %v2362_v56  ;;  %v2837_v61 = vpop.f32.mrb[152].mxu0 }
 0x261   : > { %3681 = vst [vmem:[%s6757_s5 + $0xa20] sm:$0xff] %v2837_v61  ;;  %v2839_v6 = vpop.f32.mrb[153].mxu0 }
 0x262   : > { %v5127_v18 = vpop.f32.mrb[152].mxu1  ;;  %3682 = vst [vmem:[%s6757_s5 + $0xa28] sm:$0xff] %v2839_v6 }
 0x263   : > { %3626 = vst [vmem:[%s6757_s5 + $0x868] sm:$0xff] %v5127_v18  ;;  %v2372_v20 = vpop.f32.mrb[153].mxu1 }
 0x264   : > { %3623 = vst [vmem:[%s6757_s5 + $0x850] sm:$0xff] %v2372_v20  ;;  %v2843_v2 = vpop.f32.mrb[154].mxu0 }
 0x265   : > { %3684 = vst [vmem:[%s6757_s5 + $0xa38] sm:$0xff] %v2843_v2  ;;  %v2845_v12 = vpop.f32.mrb[155].mxu0 }
 0x266   : > { %v5130_v16 = vpop.f32.mrb[154].mxu1  ;;  %3685 = vst [vmem:[%s6757_s5 + $0xa40] sm:$0xff] %v2845_v12 }
 0x267   : > { %3632 = vst [vmem:[%s6757_s5 + $0x898] sm:$0xff] %v5130_v16  ;;  %v2382_v11 = vpop.f32.mrb[155].mxu1 }
 0x268   : > { %3629 = vst [vmem:[%s6757_s5 + $0x880] sm:$0xff] %v2382_v11  ;;  %v2849_v17 = vpop.f32.mrb[156].mxu0 }
 0x269   : > { %3687 = vst [vmem:[%s6757_s5 + $0xa50] sm:$0xff] %v2849_v17  ;;  %v2851_v22 = vpop.f32.mrb[157].mxu0 }
 0x26a   : > { %v5133_v0 = vpop.f32.mrb[156].mxu1  ;;  %3688 = vst [vmem:[%s6757_s5 + $0xa58] sm:$0xff] %v2851_v22 }
 0x26b   : > { %3638 = vst [vmem:[%s6757_s5 + $0x8c8] sm:$0xff] %v5133_v0  ;;  %v2392_v8 = vpop.f32.mrb[157].mxu1 }
 0x26c   : > { %3635 = vst [vmem:[%s6757_s5 + $0x8b0] sm:$0xff] %v2392_v8  ;;  %v2855_v25 = vpop.f32.mrb[158].mxu0 }
 0x26d   : > { %3690 = vst [vmem:[%s6757_s5 + $0xa68] sm:$0xff] %v2855_v25  ;;  %v2857_v23 = vpop.f32.mrb[159].mxu0 }
 0x26e   : > { %v5136_v3 = vpop.f32.mrb[158].mxu1  ;;  %3691 = vst [vmem:[%s6757_s5 + $0xa70] sm:$0xff] %v2857_v23 }
 0x26f   : > { %3644 = vst [vmem:[%s6757_s5 + $0x8f8] sm:$0xff] %v5136_v3  ;;  %v2402_v26 = vpop.f32.mrb[159].mxu1 }
 0x270   : > { %3641 = vst [vmem:[%s6757_s5 + $0x8e0] sm:$0xff] %v2402_v26  ;;  %v2861_v36 = vpop.f32.mrb[160].mxu0 }
 0x271   : > { %3693 = vst [vmem:[%s6757_s5 + $0xa80] sm:$0xff] %v2861_v36  ;;  %v2863_v29 = vpop.f32.mrb[161].mxu0 }
 0x272   : > { %3694 = vst [vmem:[%s6757_s5 + $0xa88] sm:$0xff] %v2863_v29 }
 0x274   : > { %v2867_v28 = vpop.f32.mrb[162].mxu0 }
 0x275   : > { %3696 = vst [vmem:[%s6757_s5 + $0xa98] sm:$0xff] %v2867_v28  ;;  %v2869_v42 = vpop.f32.mrb[163].mxu0 }
 0x276   : > { %3697 = vst [vmem:[%s6757_s5 + $0xaa0] sm:$0xff] %v2869_v42 }
 0x278   : > { %v2873_v31 = vpop.f32.mrb[164].mxu0 }
 0x279   : > { %3699 = vst [vmem:[%s6757_s5 + $0xab0] sm:$0xff] %v2873_v31  ;;  %v2875_v39 = vpop.f32.mrb[165].mxu0 }
 0x27a   : > { %3700 = vst [vmem:[%s6757_s5 + $0xab8] sm:$0xff] %v2875_v39 }
 0x27c   : > { %v2879_v44 = vpop.f32.mrb[166].mxu0 }
 0x27d   : > { %3702 = vst [vmem:[%s6757_s5 + $0xac8] sm:$0xff] %v2879_v44  ;;  %v2881_v45 = vpop.f32.mrb[167].mxu0 }
 0x27e   : > { %3703 = vst [vmem:[%s6757_s5 + $0xad0] sm:$0xff] %v2881_v45 }
 0x280   : > { %v2885_v55 = vpop.f32.mrb[168].mxu0 }
 0x281   : > { %3705 = vst [vmem:[%s6757_s5 + $0xae0] sm:$0xff] %v2885_v55  ;;  %v2887_v63 = vpop.f32.mrb[169].mxu0 }
 0x282   : > { %3706 = vst [vmem:[%s6757_s5 + $0xae8] sm:$0xff] %v2887_v63 }
 0x284   : > { %v2891_v46 = vpop.f32.mrb[170].mxu0 }
 0x285   : > { %3708 = vst [vmem:[%s6757_s5 + $0xaf8] sm:$0xff] %v2891_v46  ;;  %v2893_v49 = vpop.f32.mrb[171].mxu0 }
 0x286   : > { %3709 = vst [vmem:[%s6757_s5 + $0xb00] sm:$0xff] %v2893_v49 }
 0x288   : > { %v2897_v50 = vpop.f32.mrb[172].mxu0 }
 0x289   : > { %3711 = vst [vmem:[%s6757_s5 + $0xb10] sm:$0xff] %v2897_v50  ;;  %v2899_v38 = vpop.f32.mrb[173].mxu0 }
 0x28a   : > { %3712 = vst [vmem:[%s6757_s5 + $0xb18] sm:$0xff] %v2899_v38 }
 0x28c   : > { %v2903_v47 = vpop.f32.mrb[174].mxu0 }
 0x28d   : > { %3714 = vst [vmem:[%s6757_s5 + $0xb28] sm:$0xff] %v2903_v47  ;;  %v2905_v54 = vpop.f32.mrb[175].mxu0 }
 0x28e   : > { %3715 = vst [vmem:[%s6757_s5 + $0xb30] sm:$0xff] %v2905_v54 }
 0x290   : > { %v2909_v4 = vpop.f32.mrb[176].mxu0 }
 0x291   : > { %3717 = vst [vmem:[%s6757_s5 + $0xb40] sm:$0xff] %v2909_v4  ;;  %v2911_v53 = vpop.f32.mrb[177].mxu0 }
 0x292   : > { %v5171_v32 = vpop.f32.mrb[160].mxu1  ;;  %3718 = vst [vmem:[%s6757_s5 + $0xb48] sm:$0xff] %v2911_v53 }
 0x293   : > { %3650 = vst [vmem:[%s6757_s5 + $0x928] sm:$0xff] %v5171_v32  ;;  %v3118_v40 = vpop.f32.mrb[161].mxu1 }
 0x294   : > { %3647 = vst [vmem:[%s6757_s5 + $0x910] sm:$0xff] %v3118_v40  ;;  %v2915_v33 = vpop.f32.mrb[178].mxu0 }
 0x295   : > { %3720 = vst [vmem:[%s6757_s5 + $0xb58] sm:$0xff] %v2915_v33  ;;  %v2917_v34 = vpop.f32.mrb[179].mxu0 }
 0x296   : > { %v5174_v57 = vpop.f32.mrb[162].mxu1  ;;  %3721 = vst [vmem:[%s6757_s5 + $0xb60] sm:$0xff] %v2917_v34 }
 0x297   : > { %3656 = vst [vmem:[%s6757_s5 + $0x958] sm:$0xff] %v5174_v57  ;;  %v3128_v41 = vpop.f32.mrb[163].mxu1 }
 0x298   : > { %3653 = vst [vmem:[%s6757_s5 + $0x940] sm:$0xff] %v3128_v41  ;;  %v2921_v58 = vpop.f32.mrb[180].mxu0 }
 0x299   : > { %3723 = vst [vmem:[%s6757_s5 + $0xb70] sm:$0xff] %v2921_v58  ;;  %v2923_v51 = vpop.f32.mrb[181].mxu0 }
 0x29a   : > { %v5177_v62 = vpop.f32.mrb[164].mxu1  ;;  %3724 = vst [vmem:[%s6757_s5 + $0xb78] sm:$0xff] %v2923_v51 }
 0x29b   : > { %3662 = vst [vmem:[%s6757_s5 + $0x988] sm:$0xff] %v5177_v62  ;;  %v3138_v1 = vpop.f32.mrb[165].mxu1 }
 0x29c   : > { %3659 = vst [vmem:[%s6757_s5 + $0x970] sm:$0xff] %v3138_v1  ;;  %v2927_v10 = vpop.f32.mrb[182].mxu0 }
 0x29d   : > { %3726 = vst [vmem:[%s6757_s5 + $0xb88] sm:$0xff] %v2927_v10  ;;  %v2929_v5 = vpop.f32.mrb[183].mxu0 }
 0x29e   : > { %v5180_v19 = vpop.f32.mrb[166].mxu1  ;;  %3727 = vst [vmem:[%s6757_s5 + $0xb90] sm:$0xff] %v2929_v5 }
 0x29f   : > { %3668 = vst [vmem:[%s6757_s5 + $0x9b8] sm:$0xff] %v5180_v19  ;;  %v3148_v21 = vpop.f32.mrb[167].mxu1 }
 0x2a0   : > { %3665 = vst [vmem:[%s6757_s5 + $0x9a0] sm:$0xff] %v3148_v21  ;;  %v2933_v7 = vpop.f32.mrb[184].mxu0 }
 0x2a1   : > { %3729 = vst [vmem:[%s6757_s5 + $0xba0] sm:$0xff] %v2933_v7  ;;  %v2935_v52 = vpop.f32.mrb[185].mxu0 }
 0x2a2   : > { %v5183_v24 = vpop.f32.mrb[168].mxu1  ;;  %3730 = vst [vmem:[%s6757_s5 + $0xba8] sm:$0xff] %v2935_v52 }
 0x2a3   : > { %3674 = vst [vmem:[%s6757_s5 + $0x9e8] sm:$0xff] %v5183_v24  ;;  %v3158_v43 = vpop.f32.mrb[169].mxu1 }
 0x2a4   : > { %3671 = vst [vmem:[%s6757_s5 + $0x9d0] sm:$0xff] %v3158_v43  ;;  %v2939_v9 = vpop.f32.mrb[186].mxu0 }
 0x2a5   : > { %3732 = vst [vmem:[%s6757_s5 + $0xbb8] sm:$0xff] %v2939_v9  ;;  %v2941_v35 = vpop.f32.mrb[187].mxu0 }
 0x2a6   : > { %v5186_v13 = vpop.f32.mrb[170].mxu1  ;;  %3733 = vst [vmem:[%s6757_s5 + $0xbc0] sm:$0xff] %v2941_v35 }
 0x2a7   : > { %3680 = vst [vmem:[%s6757_s5 + $0xa18] sm:$0xff] %v5186_v13  ;;  %v3168_v60 = vpop.f32.mrb[171].mxu1 }
 0x2a8   : > { %3677 = vst [vmem:[%s6757_s5 + $0xa00] sm:$0xff] %v3168_v60  ;;  %v2945_v14 = vpop.f32.mrb[188].mxu0 }
 0x2a9   : > { %3735 = vst [vmem:[%s6757_s5 + $0xbd0] sm:$0xff] %v2945_v14  ;;  %v2947_v15 = vpop.f32.mrb[189].mxu0 }
 0x2aa   : > { %v5189_v30 = vpop.f32.mrb[172].mxu1  ;;  %3736 = vst [vmem:[%s6757_s5 + $0xbd8] sm:$0xff] %v2947_v15 }
 0x2ab   : > { %3686 = vst [vmem:[%s6757_s5 + $0xa48] sm:$0xff] %v5189_v30  ;;  %v3178_v37 = vpop.f32.mrb[173].mxu1 }
 0x2ac   : > { %3683 = vst [vmem:[%s6757_s5 + $0xa30] sm:$0xff] %v3178_v37  ;;  %v2951_v48 = vpop.f32.mrb[190].mxu0 }
 0x2ad   : > { %3738 = vst [vmem:[%s6757_s5 + $0xbe8] sm:$0xff] %v2951_v48  ;;  %v2953_v59 = vpop.f32.mrb[191].mxu0 }
 0x2ae   : > { %v5192_v27 = vpop.f32.mrb[174].mxu1  ;;  %3739 = vst [vmem:[%s6757_s5 + $0xbf0] sm:$0xff] %v2953_v59 }
 0x2af   : > { %3692 = vst [vmem:[%s6757_s5 + $0xa78] sm:$0xff] %v5192_v27  ;;  %v3188_v56 = vpop.f32.mrb[175].mxu1 }
 0x2b0   : > { %3689 = vst [vmem:[%s6757_s5 + $0xa60] sm:$0xff] %v3188_v56  ;;  %v2957_v61 = vpop.f32.mrb[192].mxu0 }
 0x2b1   : > { %3741 = vst [vmem:[%s6757_s5 + $0xc00] sm:$0xff] %v2957_v61  ;;  %v2959_v18 = vpop.f32.mrb[193].mxu0 }
 0x2b2   : > { %v5195_v6 = vpop.f32.mrb[176].mxu1  ;;  %3742 = vst [vmem:[%s6757_s5 + $0xc08] sm:$0xff] %v2959_v18 }
 0x2b3   : > { %3698 = vst [vmem:[%s6757_s5 + $0xaa8] sm:$0xff] %v5195_v6  ;;  %v3198_v20 = vpop.f32.mrb[177].mxu1 }
 0x2b4   : > { %3695 = vst [vmem:[%s6757_s5 + $0xa90] sm:$0xff] %v3198_v20  ;;  %v2963_v2 = vpop.f32.mrb[194].mxu0 }
 0x2b5   : > { %3744 = vst [vmem:[%s6757_s5 + $0xc18] sm:$0xff] %v2963_v2  ;;  %v2965_v16 = vpop.f32.mrb[195].mxu0 }
 0x2b6   : > { %v5198_v12 = vpop.f32.mrb[178].mxu1  ;;  %3745 = vst [vmem:[%s6757_s5 + $0xc20] sm:$0xff] %v2965_v16 }
 0x2b7   : > { %3704 = vst [vmem:[%s6757_s5 + $0xad8] sm:$0xff] %v5198_v12  ;;  %v3208_v11 = vpop.f32.mrb[179].mxu1 }
 0x2b8   : > { %3701 = vst [vmem:[%s6757_s5 + $0xac0] sm:$0xff] %v3208_v11  ;;  %v2969_v17 = vpop.f32.mrb[196].mxu0 }
 0x2b9   : > { %3747 = vst [vmem:[%s6757_s5 + $0xc30] sm:$0xff] %v2969_v17  ;;  %v2971_v0 = vpop.f32.mrb[197].mxu0 }
 0x2ba   : > { %v5201_v22 = vpop.f32.mrb[180].mxu1  ;;  %3748 = vst [vmem:[%s6757_s5 + $0xc38] sm:$0xff] %v2971_v0 }
 0x2bb   : > { %3710 = vst [vmem:[%s6757_s5 + $0xb08] sm:$0xff] %v5201_v22  ;;  %v3218_v8 = vpop.f32.mrb[181].mxu1 }
 0x2bc   : > { %3707 = vst [vmem:[%s6757_s5 + $0xaf0] sm:$0xff] %v3218_v8  ;;  %v2975_v25 = vpop.f32.mrb[198].mxu0 }
 0x2bd   : > { %3750 = vst [vmem:[%s6757_s5 + $0xc48] sm:$0xff] %v2975_v25  ;;  %v2977_v3 = vpop.f32.mrb[199].mxu0 }
 0x2be   : > { %v5204_v23 = vpop.f32.mrb[182].mxu1  ;;  %3751 = vst [vmem:[%s6757_s5 + $0xc50] sm:$0xff] %v2977_v3 }
 0x2bf   : > { %3716 = vst [vmem:[%s6757_s5 + $0xb38] sm:$0xff] %v5204_v23  ;;  %v3228_v26 = vpop.f32.mrb[183].mxu1 }
 0x2c0   : > { %3713 = vst [vmem:[%s6757_s5 + $0xb20] sm:$0xff] %v3228_v26  ;;  %v2981_v36 = vpop.f32.mrb[200].mxu0 }
 0x2c1   : > { %3753 = vst [vmem:[%s6757_s5 + $0xc60] sm:$0xff] %v2981_v36  ;;  %v2983_v28 = vpop.f32.mrb[201].mxu0 }
 0x2c2   : > { %v5207_v29 = vpop.f32.mrb[184].mxu1  ;;  %3754 = vst [vmem:[%s6757_s5 + $0xc68] sm:$0xff] %v2983_v28 }
 0x2c3   : > { %3722 = vst [vmem:[%s6757_s5 + $0xb68] sm:$0xff] %v5207_v29  ;;  %v3238_v42 = vpop.f32.mrb[185].mxu1 }
 0x2c4   : > { %3719 = vst [vmem:[%s6757_s5 + $0xb50] sm:$0xff] %v3238_v42  ;;  %v2987_v31 = vpop.f32.mrb[202].mxu0 }
 0x2c5   : > { %3756 = vst [vmem:[%s6757_s5 + $0xc78] sm:$0xff] %v2987_v31  ;;  %v2989_v44 = vpop.f32.mrb[203].mxu0 }
 0x2c6   : > { %v5210_v39 = vpop.f32.mrb[186].mxu1  ;;  %3757 = vst [vmem:[%s6757_s5 + $0xc80] sm:$0xff] %v2989_v44 }
 0x2c7   : > { %3728 = vst [vmem:[%s6757_s5 + $0xb98] sm:$0xff] %v5210_v39  ;;  %v3248_v45 = vpop.f32.mrb[187].mxu1 }
 0x2c8   : > { %3725 = vst [vmem:[%s6757_s5 + $0xb80] sm:$0xff] %v3248_v45  ;;  %v2993_v55 = vpop.f32.mrb[204].mxu0 }
 0x2c9   : > { %3759 = vst [vmem:[%s6757_s5 + $0xc90] sm:$0xff] %v2993_v55  ;;  %v2995_v46 = vpop.f32.mrb[205].mxu0 }
 0x2ca   : > { %v5213_v63 = vpop.f32.mrb[188].mxu1  ;;  %3760 = vst [vmem:[%s6757_s5 + $0xc98] sm:$0xff] %v2995_v46 }
 0x2cb   : > { %3734 = vst [vmem:[%s6757_s5 + $0xbc8] sm:$0xff] %v5213_v63  ;;  %v3258_v49 = vpop.f32.mrb[189].mxu1 }
 0x2cc   : > { %3731 = vst [vmem:[%s6757_s5 + $0xbb0] sm:$0xff] %v3258_v49  ;;  %v2999_v50 = vpop.f32.mrb[206].mxu0 }
 0x2cd   : > { %3762 = vst [vmem:[%s6757_s5 + $0xca8] sm:$0xff] %v2999_v50  ;;  %v3001_v47 = vpop.f32.mrb[207].mxu0 }
 0x2ce   : > { %v5216_v38 = vpop.f32.mrb[190].mxu1  ;;  %3763 = vst [vmem:[%s6757_s5 + $0xcb0] sm:$0xff] %v3001_v47 }
 0x2cf   : > { %3740 = vst [vmem:[%s6757_s5 + $0xbf8] sm:$0xff] %v5216_v38  ;;  %v3268_v54 = vpop.f32.mrb[191].mxu1 }
 0x2d0   : > { %3737 = vst [vmem:[%s6757_s5 + $0xbe0] sm:$0xff] %v3268_v54  ;;  %v3005_v4 = vpop.f32.mrb[208].mxu0 }
 0x2d1   : > { %3765 = vst [vmem:[%s6757_s5 + $0xcc0] sm:$0xff] %v3005_v4  ;;  %v3007_v53 = vpop.f32.mrb[209].mxu0 }
 0x2d2   : > { %v5219_v32 = vpop.f32.mrb[192].mxu1  ;;  %3766 = vst [vmem:[%s6757_s5 + $0xcc8] sm:$0xff] %v3007_v53 }
 0x2d3   : > { %3746 = vst [vmem:[%s6757_s5 + $0xc28] sm:$0xff] %v5219_v32  ;;  %v3278_v40 = vpop.f32.mrb[193].mxu1 }
 0x2d4   : > { %3743 = vst [vmem:[%s6757_s5 + $0xc10] sm:$0xff] %v3278_v40  ;;  %v3011_v33 = vpop.f32.mrb[210].mxu0 }
 0x2d5   : > { %3768 = vst [vmem:[%s6757_s5 + $0xcd8] sm:$0xff] %v3011_v33  ;;  %v3013_v34 = vpop.f32.mrb[211].mxu0 }
 0x2d6   : > { %v5222_v57 = vpop.f32.mrb[194].mxu1  ;;  %3769 = vst [vmem:[%s6757_s5 + $0xce0] sm:$0xff] %v3013_v34 }
 0x2d7   : > { %3752 = vst [vmem:[%s6757_s5 + $0xc58] sm:$0xff] %v5222_v57  ;;  %v3288_v41 = vpop.f32.mrb[195].mxu1 }
 0x2d8   : > { %3749 = vst [vmem:[%s6757_s5 + $0xc40] sm:$0xff] %v3288_v41  ;;  %v3017_v58 = vpop.f32.mrb[212].mxu0 }
 0x2d9   : > { %3771 = vst [vmem:[%s6757_s5 + $0xcf0] sm:$0xff] %v3017_v58  ;;  %v3019_v51 = vpop.f32.mrb[213].mxu0 }
 0x2da   : > { %v5225_v62 = vpop.f32.mrb[196].mxu1  ;;  %3772 = vst [vmem:[%s6757_s5 + $0xcf8] sm:$0xff] %v3019_v51 }
 0x2db   : > { %3758 = vst [vmem:[%s6757_s5 + $0xc88] sm:$0xff] %v5225_v62  ;;  %v3298_v1 = vpop.f32.mrb[197].mxu1 }
 0x2dc   : > { %3755 = vst [vmem:[%s6757_s5 + $0xc70] sm:$0xff] %v3298_v1  ;;  %v3023_v10 = vpop.f32.mrb[214].mxu0 }
 0x2dd   : > { %3774 = vst [vmem:[%s6757_s5 + $0xd08] sm:$0xff] %v3023_v10  ;;  %v3025_v5 = vpop.f32.mrb[215].mxu0 }
 0x2de   : > { %v5228_v19 = vpop.f32.mrb[198].mxu1  ;;  %3775 = vst [vmem:[%s6757_s5 + $0xd10] sm:$0xff] %v3025_v5 }
 0x2df   : > { %3764 = vst [vmem:[%s6757_s5 + $0xcb8] sm:$0xff] %v5228_v19  ;;  %v3308_v21 = vpop.f32.mrb[199].mxu1 }
 0x2e0   : > { %3761 = vst [vmem:[%s6757_s5 + $0xca0] sm:$0xff] %v3308_v21  ;;  %v3029_v7 = vpop.f32.mrb[216].mxu0 }
 0x2e1   : > { %3777 = vst [vmem:[%s6757_s5 + $0xd20] sm:$0xff] %v3029_v7  ;;  %v3031_v52 = vpop.f32.mrb[217].mxu0 }
 0x2e2   : > { %v5231_v24 = vpop.f32.mrb[200].mxu1  ;;  %3778 = vst [vmem:[%s6757_s5 + $0xd28] sm:$0xff] %v3031_v52 }
 0x2e3   : > { %3770 = vst [vmem:[%s6757_s5 + $0xce8] sm:$0xff] %v5231_v24  ;;  %v3318_v43 = vpop.f32.mrb[201].mxu1 }
 0x2e4   : > { %3767 = vst [vmem:[%s6757_s5 + $0xcd0] sm:$0xff] %v3318_v43  ;;  %v3035_v9 = vpop.f32.mrb[218].mxu0 }
 0x2e5   : > { %3780 = vst [vmem:[%s6757_s5 + $0xd38] sm:$0xff] %v3035_v9  ;;  %v3037_v35 = vpop.f32.mrb[219].mxu0 }
 0x2e6   : > { %v5234_v13 = vpop.f32.mrb[202].mxu1  ;;  %3781 = vst [vmem:[%s6757_s5 + $0xd40] sm:$0xff] %v3037_v35 }
 0x2e7   : > { %3776 = vst [vmem:[%s6757_s5 + $0xd18] sm:$0xff] %v5234_v13  ;;  %v3328_v60 = vpop.f32.mrb[203].mxu1 }
 0x2e8   : > { %3773 = vst [vmem:[%s6757_s5 + $0xd00] sm:$0xff] %v3328_v60  ;;  %v3041_v14 = vpop.f32.mrb[220].mxu0 }
 0x2e9   : > { %3783 = vst [vmem:[%s6757_s5 + $0xd50] sm:$0xff] %v3041_v14  ;;  %v3043_v15 = vpop.f32.mrb[221].mxu0 }
 0x2ea   : > { %v5237_v30 = vpop.f32.mrb[204].mxu1  ;;  %3784 = vst [vmem:[%s6757_s5 + $0xd58] sm:$0xff] %v3043_v15 }
 0x2eb   : > { %3782 = vst [vmem:[%s6757_s5 + $0xd48] sm:$0xff] %v5237_v30  ;;  %v3338_v37 = vpop.f32.mrb[205].mxu1 }
 0x2ec   : > { %3779 = vst [vmem:[%s6757_s5 + $0xd30] sm:$0xff] %v3338_v37  ;;  %v3047_v48 = vpop.f32.mrb[222].mxu0 }
 0x2ed   : > { %3786 = vst [vmem:[%s6757_s5 + $0xd68] sm:$0xff] %v3047_v48  ;;  %v3049_v59 = vpop.f32.mrb[223].mxu0 }
 0x2ee   : > { %v5240_v27 = vpop.f32.mrb[206].mxu1  ;;  %3787 = vst [vmem:[%s6757_s5 + $0xd70] sm:$0xff] %v3049_v59 }
 0x2ef   : > { %3788 = vst [vmem:[%s6757_s5 + $0xd78] sm:$0xff] %v5240_v27  ;;  %v3348_v56 = vpop.f32.mrb[207].mxu1 }
 0x2f0   : > { %3785 = vst [vmem:[%s6757_s5 + $0xd60] sm:$0xff] %v3348_v56 }
 0x2f1   : > { %5619 = shalt.err (!%p5616_p5)
}
 0x2f2   : > { %s5620_s25 = scalar_lea.hbm %s7867_s16, 55296  ;;  %s5624_s28 = scalar_lea.hbm %s7925_s2, 221184 }
 0x2f3   : > { %p5621_p6 = scmp.ne.s32.totalorder %s7867_s16, %s5620_s25  ;;  %p5625_p10 = scmp.lt.u32.totalorder %s7867_s16, %s7925_s2 }
 0x2f4   : > { %p5626_p11 = scmp.lt.u32.totalorder %s5624_s28, %s5620_s25  ;;  %p5628_p13 = scmp.lt.u32.totalorder %s5620_s25, %s7867_s16 }
 0x2f5   : > { %p5622_p7 = pnand %p5621_p6, %p5744_p4 }
 0x2f6   : > { %p5627_p12 = por %p5626_p11, %p5625_p10 }
 0x2f7   : > { %p5623_p9 = pneg %p5622_p7 }
 0x2f8   : > { %p5629_p0 = por %p5628_p13, %p5627_p12 }
 0x2fa   : > { %p5630_p1 = pnand %p5629_p0, %p5623_p9 }
 0x2fc   : > { %5633 = shalt.err (!%p5630_p1)
}
 0x2fd   : > { %s5687_s3 = smov 384   ;;  %s5688_s4 = smov 24  }
 0x2fe   : > { %5548 = dma.vmem_to_hbm [thread:$0]  (%p5744_p4), %s7869_s7, 55296, %s7867_s16, %s7877_s12, %s5687_s3, %s5687_s3, %s5688_s4  }
 0x2ff PF: > { %p5555_p2 = scmp.ge.s32.totalorder %s5684_s14, 2  ;;  %s3824_s5 = sand.u32 1, %s5664_s9  }
 0x300   : > { %s3825_s6 = scalar_lea.sflag [#allocation3], %s3824_s5 }
 0x301   : > { %p5551_p3 = pnand %p5555_p2, %p5751_p8 }
 0x303   : > { %5659 = dma.done.wait (!%p5551_p3), %s3825_s6, 55296  }
 0x304   : > { %5661 = vsyncadd (!%p5551_p3), %s3825_s6, 4294912000  ;;  %s15_s14 = sadd.s32 1, %s5684_s14   ;;  %s7930_s9 = smov %s5668_s10 }
 0x305   : > { %p12_p5 = scmp.ge.s32.totalorder %s15_s14, 6   ;;  %s7931_s10 = smov %s5672_s11 }
 0x306   : > { %s7932_s11 = smov %s5757_s22  ;;  %s7933_s12 = smov %s5680_s13 }
 0x307   : > { %s7934_s13 = smov %s7936_s17  ;;  %14 = sbr.rel (!%p12_p5) target bundleno = 4 (0x4), region = 66 }
 0x30e   :  { %3830 = vsyncpa [#allocation3], 1 }
 0x30f   :  { %3832 = vsyncpa [#allocation3 + $0x1], 1 }

</bundles_post_ra>
